<compile_context>
chip_gen: v6e
topology: v6e:2x2x1
jax: 0.10.0
libtpu: 0.0.40
codegen_flags: <defaults>
</compile_context>

<pallas_src>
import math
import functools

import jax
import jax.numpy as jnp
from jax.experimental import pallas as pl
from jax.experimental.pallas import tpu as pltpu  # noqa: F401  (not needed: no grid / scratch)

# Small shapes consistent with the module (d_model divisible by nhead).
D_MODEL = 32
N_HEADS = 4
N_LAYERS = 2
D_FF = 64
BATCH = 2
SEQ = 8
EPS = 1e-5  # PyTorch LayerNorm default

PER_LAYER_ARRAYS = 16


def _layer_norm(x, gamma, beta):
    mu = jnp.mean(x, axis=-1, keepdims=True)
    var = jnp.mean((x - mu) ** 2, axis=-1, keepdims=True)
    return (x - mu) * jax.lax.rsqrt(var + EPS) * gamma + beta


def fused_transformer_head_kernel(x_ref, *refs, batch, seq, num_layers, num_heads):
    """Entire TransformerHead forward for the whole batch in one program invocation.

    x_ref : (batch*seq, d_model) activations (VMEM).
    refs  : num_layers * 16 per-layer weight refs, then w_cls, b_cls, then o_ref.
    All intermediate activations stay resident in VMEM/vregs; only the (batch, 1)
    logits are stored to the output.
    """
    o_ref = refs[-1]
    w_cls_ref, b_cls_ref = refs[-3], refs[-2]

    d = x_ref.shape[-1]
    dh = d // num_heads
    n_tok = batch * seq

    x = x_ref[...].astype(jnp.float32)                              # (B*S, D)

    for l in range(num_layers):                                     # static unroll (2 layers)
        (w_q, w_k, w_v, b_q, b_k, b_v, w_o, b_o,
         g1, be1, w1, b1, w2, b2, g2, be2) = refs[l * PER_LAYER_ARRAYS:(l + 1) * PER_LAYER_ARRAYS]

        # --- multi-head self-attention ---
        # Heads unrolled statically. Per-head Q/K/V projections are separate small
        # 2-D matmuls (weights split per head on the host), so no lane slicing of
        # activations.  The output projection is accumulated per head, which also
        # removes the head concatenation.
        attn = None
        for h in range(num_heads):
            qh = jnp.dot(x, w_q[h], preferred_element_type=jnp.float32) + b_q[h]   # (B*S, dh)
            kh = jnp.dot(x, w_k[h], preferred_element_type=jnp.float32) + b_k[h]
            vh = jnp.dot(x, w_v[h], preferred_element_type=jnp.float32) + b_v[h]
            qh = qh.reshape(batch, seq, dh)
            kh = kh.reshape(batch, seq, dh)
            vh = vh.reshape(batch, seq, dh)
            # 1/sqrt(dh) already folded into w_q/b_q on the host.
            s = jnp.einsum("bqd,bkd->bqk", qh, kh,
                           preferred_element_type=jnp.float32)      # (B, S, S)
            s = s - jnp.max(s, axis=-1, keepdims=True)
            p = jnp.exp(s)
            p = p * pl.reciprocal(jnp.sum(p, axis=-1, keepdims=True), approx=True)
            oh = jnp.einsum("bqk,bkd->bqd", p, vh,
                            preferred_element_type=jnp.float32)     # (B, S, dh)
            contrib = jnp.dot(oh.reshape(n_tok, dh), w_o[h],
                              preferred_element_type=jnp.float32)   # (B*S, D)
            attn = contrib if attn is None else attn + contrib
        attn = attn + b_o[...]

        # --- add & norm 1 ---
        y = _layer_norm(x + attn, g1[...], be1[...])

        # --- feed-forward (ReLU) ---
        h1 = jnp.maximum(
            jnp.dot(y, w1[...], preferred_element_type=jnp.float32) + b1[...], 0.0)
        h2 = jnp.dot(h1, w2[...], preferred_element_type=jnp.float32) + b2[...]

        # --- add & norm 2 ---
        x = _layer_norm(y + h2, g2[...], be2[...])

    # --- classifier on token 0 of each sequence ---
    x0 = x.reshape(batch, seq, d)[:, 0, :]                          # (B, D)
    logits = (jnp.dot(x0, w_cls_ref[...], preferred_element_type=jnp.float32)
              + b_cls_ref[...])
    o_ref[...] = logits.astype(o_ref.dtype)


# ----------------------------- host-side wrappers ------------------------------

def _prepare_layer(lp, num_heads):
    """Convert PyTorch-layout layer params into the kernel layout:
    per-head projection weights with the softmax 1/sqrt(dh) scale folded into Q."""
    d = lp["w_qkv"].shape[0]
    dh = d // num_heads
    scale = 1.0 / math.sqrt(dh)

    def split_heads_w(w):   # (D, D) -> (H, D, dh)
        return jnp.transpose(w.reshape(d, num_heads, dh), (1, 0, 2))

    def split_heads_b(b):   # (1, D) -> (H, 1, dh)
        return jnp.transpose(b.reshape(1, num_heads, dh), (1, 0, 2))

    w_q = split_heads_w(lp["w_qkv"][:, :d] * scale)
    w_k = split_heads_w(lp["w_qkv"][:, d:2 * d])
    w_v = split_heads_w(lp["w_qkv"][:, 2 * d:])
    b_q = split_heads_b(lp["b_qkv"][:, :d] * scale)
    b_k = split_heads_b(lp["b_qkv"][:, d:2 * d])
    b_v = split_heads_b(lp["b_qkv"][:, 2 * d:])
    w_o = lp["w_o"].reshape(num_heads, dh, d)          # row-block h -> (H, dh, D)

    return [w_q, w_k, w_v, b_q, b_k, b_v, w_o, lp["b_o"],
            lp["g1"], lp["be1"], lp["w1"], lp["b1"],
            lp["w2"], lp["b2"], lp["g2"], lp["be2"]]


def transformer_head_forward(x, params):
    """x: (B, S, D) -> logits (B, 1). Single fused pallas_call, no grid."""
    B, S, D = x.shape
    flat_args = []
    for lp in params["layers"]:
        flat_args.extend(_prepare_layer(lp, N_HEADS))
    flat_args.append(params["w_cls"])
    flat_args.append(params["b_cls"])

    kernel = functools.partial(
        fused_transformer_head_kernel,
        batch=B, seq=S, num_layers=len(params["layers"]), num_heads=N_HEADS)

    # No grid / BlockSpecs: every operand is mapped whole into VMEM (total footprint
    # ~70 KiB, far below VMEM on v5e/v6e/v7x), so there is exactly one dispatch and
    # no intermediate HBM round trips.
    return pl.pallas_call(
        kernel,
        out_shape=jax.ShapeDtypeStruct((B, 1), jnp.float32),
    )(x.reshape(B * S, D), *flat_args)


# ------------------------- parameter init & reference -------------------------

def init_params(key):
    def dense(k, shape, scale=0.02):
        return scale * jax.random.normal(k, shape, dtype=jnp.float32)

    layers = []
    for _ in range(N_LAYERS):
        key, *ks = jax.random.split(key, 7)
        layers.append(dict(
            w_qkv=dense(ks[0], (D_MODEL, 3 * D_MODEL)),
            b_qkv=dense(ks[1], (1, 3 * D_MODEL)),
            w_o=dense(ks[2], (D_MODEL, D_MODEL)),
            b_o=jnp.zeros((1, D_MODEL), jnp.float32),
            g1=jnp.ones((1, D_MODEL), jnp.float32),
            be1=jnp.zeros((1, D_MODEL), jnp.float32),
            w1=dense(ks[3], (D_MODEL, D_FF)),
            b1=dense(ks[4], (1, D_FF)),
            w2=dense(ks[5], (D_FF, D_MODEL)),
            b2=jnp.zeros((1, D_MODEL), jnp.float32),
            g2=jnp.ones((1, D_MODEL), jnp.float32),
            be2=jnp.zeros((1, D_MODEL), jnp.float32),
        ))
    key, k1, k2 = jax.random.split(key, 3)
    return dict(layers=layers,
                w_cls=dense(k1, (D_MODEL, 1)),
                b_cls=dense(k2, (1, 1)))


def reference_forward(x, params):
    """Pure-JAX reference with identical math (post-norm encoder layers)."""
    x = x.astype(jnp.float32)
    dh = D_MODEL // N_HEADS
    for lp in params["layers"]:
        qkv = x @ lp["w_qkv"] + lp["b_qkv"]
        q, k, v = qkv[..., :D_MODEL], qkv[..., D_MODEL:2 * D_MODEL], qkv[..., 2 * D_MODEL:]
        B, S, _ = x.shape
        q = q.reshape(B, S, N_HEADS, dh).transpose(0, 2, 1, 3)
        k = k.reshape(B, S, N_HEADS, dh).transpose(0, 2, 1, 3)
        v = v.reshape(B, S, N_HEADS, dh).transpose(0, 2, 1, 3)
        s = jnp.einsum("bhqd,bhkd->bhqk", q, k) / math.sqrt(dh)
        p = jax.nn.softmax(s, axis=-1)
        attn = jnp.einsum("bhqk,bhkd->bhqd", p, v).transpose(0, 2, 1, 3).reshape(B, S, D_MODEL)
        attn = attn @ lp["w_o"] + lp["b_o"]
        y = _layer_norm(x + attn, lp["g1"], lp["be1"])
        h = jnp.maximum(y @ lp["w1"] + lp["b1"], 0.0) @ lp["w2"] + lp["b2"]
        x = _layer_norm(y + h, lp["g2"], lp["be2"])
    return x[:, 0, :] @ params["w_cls"] + params["b_cls"]


if __name__ == "__main__":
    key = jax.random.PRNGKey(0)
    kx, kp = jax.random.split(key)
    x = jax.random.normal(kx, (BATCH, SEQ, D_MODEL), dtype=jnp.float32)
    params = init_params(kp)

    out = jax.block_until_ready(transformer_head_forward(x, params))
    ref = reference_forward(x, params)

    assert out.shape == (BATCH, 1), out.shape
    assert jnp.allclose(out, ref, rtol=1e-4, atol=1e-4), (out, ref)

    print("KERNEL_OK")
</pallas_src>

<mosaic_0001>
module attributes {stable_mosaic.version = 11 : i64} {
  func.func @fused_transformer_head_kernel(%arg0: memref<16x32xf32, #tpu.memory_space<vmem>>, %arg1: memref<4x32x8xf32, #tpu.memory_space<vmem>>, %arg2: memref<4x32x8xf32, #tpu.memory_space<vmem>>, %arg3: memref<4x32x8xf32, #tpu.memory_space<vmem>>, %arg4: memref<4x1x8xf32, #tpu.memory_space<vmem>>, %arg5: memref<4x1x8xf32, #tpu.memory_space<vmem>>, %arg6: memref<4x1x8xf32, #tpu.memory_space<vmem>>, %arg7: memref<4x8x32xf32, #tpu.memory_space<vmem>>, %arg8: memref<1x32xf32, #tpu.memory_space<vmem>>, %arg9: memref<1x32xf32, #tpu.memory_space<vmem>>, %arg10: memref<1x32xf32, #tpu.memory_space<vmem>>, %arg11: memref<32x64xf32, #tpu.memory_space<vmem>>, %arg12: memref<1x64xf32, #tpu.memory_space<vmem>>, %arg13: memref<64x32xf32, #tpu.memory_space<vmem>>, %arg14: memref<1x32xf32, #tpu.memory_space<vmem>>, %arg15: memref<1x32xf32, #tpu.memory_space<vmem>>, %arg16: memref<1x32xf32, #tpu.memory_space<vmem>>, %arg17: memref<4x32x8xf32, #tpu.memory_space<vmem>>, %arg18: memref<4x32x8xf32, #tpu.memory_space<vmem>>, %arg19: memref<4x32x8xf32, #tpu.memory_space<vmem>>, %arg20: memref<4x1x8xf32, #tpu.memory_space<vmem>>, %arg21: memref<4x1x8xf32, #tpu.memory_space<vmem>>, %arg22: memref<4x1x8xf32, #tpu.memory_space<vmem>>, %arg23: memref<4x8x32xf32, #tpu.memory_space<vmem>>, %arg24: memref<1x32xf32, #tpu.memory_space<vmem>>, %arg25: memref<1x32xf32, #tpu.memory_space<vmem>>, %arg26: memref<1x32xf32, #tpu.memory_space<vmem>>, %arg27: memref<32x64xf32, #tpu.memory_space<vmem>>, %arg28: memref<1x64xf32, #tpu.memory_space<vmem>>, %arg29: memref<64x32xf32, #tpu.memory_space<vmem>>, %arg30: memref<1x32xf32, #tpu.memory_space<vmem>>, %arg31: memref<1x32xf32, #tpu.memory_space<vmem>>, %arg32: memref<1x32xf32, #tpu.memory_space<vmem>>, %arg33: memref<32x1xf32, #tpu.memory_space<vmem>>, %arg34: memref<1x1xf32, #tpu.memory_space<vmem>>, %arg35: memref<2x1xf32, #tpu.memory_space<vmem>>) attributes {dimension_semantics = [], scalar_prefetch = 0 : i64, scratch_operands = 0 : i64, tpu.core_type = #tpu.core_type<tc>} {
    %c0 = arith.constant 0 : index
    %c0_0 = arith.constant 0 : index
    %0 = vector.load %arg0[%c0, %c0_0] : memref<16x32xf32, #tpu.memory_space<vmem>>, vector<16x32xf32>
    %c0_1 = arith.constant 0 : index
    %c0_2 = arith.constant 0 : index
    %c0_3 = arith.constant 0 : index
    %1 = vector.load %arg1[%c0_1, %c0_2, %c0_3] : memref<4x32x8xf32, #tpu.memory_space<vmem>>, vector<1x32x8xf32>
    %2 = vector.shape_cast %1 : vector<1x32x8xf32> to vector<32x8xf32>
    %cst = arith.constant dense<0.000000e+00> : vector<16x8xf32>
    %3 = tpu.matmul %0, %2, %cst {dimension_numbers = #tpu.dot_dimension_numbers<[1], [0], [0], [1], [0, 0, 1, 1], [], []>} : vector<16x32xf32>, vector<32x8xf32>, vector<16x8xf32> -> vector<16x8xf32>
    %c0_4 = arith.constant 0 : index
    %c0_5 = arith.constant 0 : index
    %c0_6 = arith.constant 0 : index
    %4 = vector.load %arg4[%c0_4, %c0_5, %c0_6] : memref<4x1x8xf32, #tpu.memory_space<vmem>>, vector<1x1x8xf32>
    %5 = vector.shape_cast %4 : vector<1x1x8xf32> to vector<1x8xf32>
    %6 = vector.broadcast %5 : vector<1x8xf32> to vector<16x8xf32>
    %7 = arith.addf %3, %6 : vector<16x8xf32>
    %c0_7 = arith.constant 0 : index
    %c0_8 = arith.constant 0 : index
    %c0_9 = arith.constant 0 : index
    %8 = vector.load %arg2[%c0_7, %c0_8, %c0_9] : memref<4x32x8xf32, #tpu.memory_space<vmem>>, vector<1x32x8xf32>
    %9 = vector.shape_cast %8 : vector<1x32x8xf32> to vector<32x8xf32>
    %cst_10 = arith.constant dense<0.000000e+00> : vector<16x8xf32>
    %10 = tpu.matmul %0, %9, %cst_10 {dimension_numbers = #tpu.dot_dimension_numbers<[1], [0], [0], [1], [0, 0, 1, 1], [], []>} : vector<16x32xf32>, vector<32x8xf32>, vector<16x8xf32> -> vector<16x8xf32>
    %c0_11 = arith.constant 0 : index
    %c0_12 = arith.constant 0 : index
    %c0_13 = arith.constant 0 : index
    %11 = vector.load %arg5[%c0_11, %c0_12, %c0_13] : memref<4x1x8xf32, #tpu.memory_space<vmem>>, vector<1x1x8xf32>
    %12 = vector.shape_cast %11 : vector<1x1x8xf32> to vector<1x8xf32>
    %13 = vector.broadcast %12 : vector<1x8xf32> to vector<16x8xf32>
    %14 = arith.addf %10, %13 : vector<16x8xf32>
    %c0_14 = arith.constant 0 : index
    %c0_15 = arith.constant 0 : index
    %c0_16 = arith.constant 0 : index
    %15 = vector.load %arg3[%c0_14, %c0_15, %c0_16] : memref<4x32x8xf32, #tpu.memory_space<vmem>>, vector<1x32x8xf32>
    %16 = vector.shape_cast %15 : vector<1x32x8xf32> to vector<32x8xf32>
    %cst_17 = arith.constant dense<0.000000e+00> : vector<16x8xf32>
    %17 = tpu.matmul %0, %16, %cst_17 {dimension_numbers = #tpu.dot_dimension_numbers<[1], [0], [0], [1], [0, 0, 1, 1], [], []>} : vector<16x32xf32>, vector<32x8xf32>, vector<16x8xf32> -> vector<16x8xf32>
    %c0_18 = arith.constant 0 : index
    %c0_19 = arith.constant 0 : index
    %c0_20 = arith.constant 0 : index
    %18 = vector.load %arg6[%c0_18, %c0_19, %c0_20] : memref<4x1x8xf32, #tpu.memory_space<vmem>>, vector<1x1x8xf32>
    %19 = vector.shape_cast %18 : vector<1x1x8xf32> to vector<1x8xf32>
    %20 = vector.broadcast %19 : vector<1x8xf32> to vector<16x8xf32>
    %21 = arith.addf %17, %20 : vector<16x8xf32>
    %22 = vector.shape_cast %7 : vector<16x8xf32> to vector<2x8x8xf32>
    %23 = vector.shape_cast %14 : vector<16x8xf32> to vector<2x8x8xf32>
    %24 = vector.shape_cast %21 : vector<16x8xf32> to vector<2x8x8xf32>
    "tpu.trace_start"() <{level = 10 : i32, message = "bqd,bkd->bqk"}> : () -> ()
    %cst_21 = arith.constant dense<0.000000e+00> : vector<2x8x8xf32>
    %25 = tpu.matmul %22, %23, %cst_21 {dimension_numbers = #tpu.dot_dimension_numbers<[2], [2], [1], [1], [0, 0, 0, 1, 1, 1], [0], [0]>} : vector<2x8x8xf32>, vector<2x8x8xf32>, vector<2x8x8xf32> -> vector<2x8x8xf32>
    "tpu.trace_stop"() : () -> ()
    %cst_22 = arith.constant dense<0xFF800000> : vector<2x8xf32>
    %26 = vector.multi_reduction <maximumf>, %25, %cst_22 [2] : vector<2x8x8xf32> to vector<2x8xf32>
    %27 = vector.shape_cast %26 : vector<2x8xf32> to vector<2x8x1xf32>
    %28 = vector.broadcast %27 : vector<2x8x1xf32> to vector<2x8x8xf32>
    %29 = arith.subf %25, %28 : vector<2x8x8xf32>
    %30 = math.exp %29 : vector<2x8x8xf32>
    %cst_23 = arith.constant dense<0.000000e+00> : vector<2x8xf32>
    %31 = vector.multi_reduction <add>, %30, %cst_23 [2] : vector<2x8x8xf32> to vector<2x8xf32>
    %32 = vector.shape_cast %31 : vector<2x8xf32> to vector<2x8x1xf32>
    %33 = tpu.reciprocal %32 {approx = true} : vector<2x8x1xf32> -> vector<2x8x1xf32>
    %34 = vector.broadcast %33 : vector<2x8x1xf32> to vector<2x8x8xf32>
    %35 = arith.mulf %30, %34 : vector<2x8x8xf32>
    "tpu.trace_start"() <{level = 10 : i32, message = "bqk,bkd->bqd"}> : () -> ()
    %cst_24 = arith.constant dense<0.000000e+00> : vector<2x8x8xf32>
    %36 = tpu.matmul %35, %24, %cst_24 {dimension_numbers = #tpu.dot_dimension_numbers<[2], [1], [1], [2], [0, 0, 0, 1, 1, 2], [0], [0]>} : vector<2x8x8xf32>, vector<2x8x8xf32>, vector<2x8x8xf32> -> vector<2x8x8xf32>
    "tpu.trace_stop"() : () -> ()
    %37 = vector.shape_cast %36 : vector<2x8x8xf32> to vector<16x8xf32>
    %c0_25 = arith.constant 0 : index
    %c0_26 = arith.constant 0 : index
    %c0_27 = arith.constant 0 : index
    %38 = vector.load %arg7[%c0_25, %c0_26, %c0_27] : memref<4x8x32xf32, #tpu.memory_space<vmem>>, vector<1x8x32xf32>
    %39 = vector.shape_cast %38 : vector<1x8x32xf32> to vector<8x32xf32>
    %cst_28 = arith.constant dense<0.000000e+00> : vector<16x32xf32>
    %40 = tpu.matmul %37, %39, %cst_28 {dimension_numbers = #tpu.dot_dimension_numbers<[1], [0], [0], [1], [0, 0, 1, 1], [], []>} : vector<16x8xf32>, vector<8x32xf32>, vector<16x32xf32> -> vector<16x32xf32>
    %c1 = arith.constant 1 : index
    %c0_29 = arith.constant 0 : index
    %c0_30 = arith.constant 0 : index
    %41 = vector.load %arg1[%c1, %c0_29, %c0_30] : memref<4x32x8xf32, #tpu.memory_space<vmem>>, vector<1x32x8xf32>
    %42 = vector.shape_cast %41 : vector<1x32x8xf32> to vector<32x8xf32>
    %cst_31 = arith.constant dense<0.000000e+00> : vector<16x8xf32>
    %43 = tpu.matmul %0, %42, %cst_31 {dimension_numbers = #tpu.dot_dimension_numbers<[1], [0], [0], [1], [0, 0, 1, 1], [], []>} : vector<16x32xf32>, vector<32x8xf32>, vector<16x8xf32> -> vector<16x8xf32>
    %c1_32 = arith.constant 1 : index
    %c0_33 = arith.constant 0 : index
    %c0_34 = arith.constant 0 : index
    %44 = vector.load %arg4[%c1_32, %c0_33, %c0_34] : memref<4x1x8xf32, #tpu.memory_space<vmem>>, vector<1x1x8xf32>
    %45 = vector.shape_cast %44 : vector<1x1x8xf32> to vector<1x8xf32>
    %46 = vector.broadcast %45 : vector<1x8xf32> to vector<16x8xf32>
    %47 = arith.addf %43, %46 : vector<16x8xf32>
    %c1_35 = arith.constant 1 : index
    %c0_36 = arith.constant 0 : index
    %c0_37 = arith.constant 0 : index
    %48 = vector.load %arg2[%c1_35, %c0_36, %c0_37] : memref<4x32x8xf32, #tpu.memory_space<vmem>>, vector<1x32x8xf32>
    %49 = vector.shape_cast %48 : vector<1x32x8xf32> to vector<32x8xf32>
    %cst_38 = arith.constant dense<0.000000e+00> : vector<16x8xf32>
    %50 = tpu.matmul %0, %49, %cst_38 {dimension_numbers = #tpu.dot_dimension_numbers<[1], [0], [0], [1], [0, 0, 1, 1], [], []>} : vector<16x32xf32>, vector<32x8xf32>, vector<16x8xf32> -> vector<16x8xf32>
    %c1_39 = arith.constant 1 : index
    %c0_40 = arith.constant 0 : index
    %c0_41 = arith.constant 0 : index
    %51 = vector.load %arg5[%c1_39, %c0_40, %c0_41] : memref<4x1x8xf32, #tpu.memory_space<vmem>>, vector<1x1x8xf32>
    %52 = vector.shape_cast %51 : vector<1x1x8xf32> to vector<1x8xf32>
    %53 = vector.broadcast %52 : vector<1x8xf32> to vector<16x8xf32>
    %54 = arith.addf %50, %53 : vector<16x8xf32>
    %c1_42 = arith.constant 1 : index
    %c0_43 = arith.constant 0 : index
    %c0_44 = arith.constant 0 : index
    %55 = vector.load %arg3[%c1_42, %c0_43, %c0_44] : memref<4x32x8xf32, #tpu.memory_space<vmem>>, vector<1x32x8xf32>
    %56 = vector.shape_cast %55 : vector<1x32x8xf32> to vector<32x8xf32>
    %cst_45 = arith.constant dense<0.000000e+00> : vector<16x8xf32>
    %57 = tpu.matmul %0, %56, %cst_45 {dimension_numbers = #tpu.dot_dimension_numbers<[1], [0], [0], [1], [0, 0, 1, 1], [], []>} : vector<16x32xf32>, vector<32x8xf32>, vector<16x8xf32> -> vector<16x8xf32>
    %c1_46 = arith.constant 1 : index
    %c0_47 = arith.constant 0 : index
    %c0_48 = arith.constant 0 : index
    %58 = vector.load %arg6[%c1_46, %c0_47, %c0_48] : memref<4x1x8xf32, #tpu.memory_space<vmem>>, vector<1x1x8xf32>
    %59 = vector.shape_cast %58 : vector<1x1x8xf32> to vector<1x8xf32>
    %60 = vector.broadcast %59 : vector<1x8xf32> to vector<16x8xf32>
    %61 = arith.addf %57, %60 : vector<16x8xf32>
    %62 = vector.shape_cast %47 : vector<16x8xf32> to vector<2x8x8xf32>
    %63 = vector.shape_cast %54 : vector<16x8xf32> to vector<2x8x8xf32>
    %64 = vector.shape_cast %61 : vector<16x8xf32> to vector<2x8x8xf32>
    "tpu.trace_start"() <{level = 10 : i32, message = "bqd,bkd->bqk"}> : () -> ()
    %cst_49 = arith.constant dense<0.000000e+00> : vector<2x8x8xf32>
    %65 = tpu.matmul %62, %63, %cst_49 {dimension_numbers = #tpu.dot_dimension_numbers<[2], [2], [1], [1], [0, 0, 0, 1, 1, 1], [0], [0]>} : vector<2x8x8xf32>, vector<2x8x8xf32>, vector<2x8x8xf32> -> vector<2x8x8xf32>
    "tpu.trace_stop"() : () -> ()
    %cst_50 = arith.constant dense<0xFF800000> : vector<2x8xf32>
    %66 = vector.multi_reduction <maximumf>, %65, %cst_50 [2] : vector<2x8x8xf32> to vector<2x8xf32>
    %67 = vector.shape_cast %66 : vector<2x8xf32> to vector<2x8x1xf32>
    %68 = vector.broadcast %67 : vector<2x8x1xf32> to vector<2x8x8xf32>
    %69 = arith.subf %65, %68 : vector<2x8x8xf32>
    %70 = math.exp %69 : vector<2x8x8xf32>
    %cst_51 = arith.constant dense<0.000000e+00> : vector<2x8xf32>
    %71 = vector.multi_reduction <add>, %70, %cst_51 [2] : vector<2x8x8xf32> to vector<2x8xf32>
    %72 = vector.shape_cast %71 : vector<2x8xf32> to vector<2x8x1xf32>
    %73 = tpu.reciprocal %72 {approx = true} : vector<2x8x1xf32> -> vector<2x8x1xf32>
    %74 = vector.broadcast %73 : vector<2x8x1xf32> to vector<2x8x8xf32>
    %75 = arith.mulf %70, %74 : vector<2x8x8xf32>
    "tpu.trace_start"() <{level = 10 : i32, message = "bqk,bkd->bqd"}> : () -> ()
    %cst_52 = arith.constant dense<0.000000e+00> : vector<2x8x8xf32>
    %76 = tpu.matmul %75, %64, %cst_52 {dimension_numbers = #tpu.dot_dimension_numbers<[2], [1], [1], [2], [0, 0, 0, 1, 1, 2], [0], [0]>} : vector<2x8x8xf32>, vector<2x8x8xf32>, vector<2x8x8xf32> -> vector<2x8x8xf32>
    "tpu.trace_stop"() : () -> ()
    %77 = vector.shape_cast %76 : vector<2x8x8xf32> to vector<16x8xf32>
    %c1_53 = arith.constant 1 : index
    %c0_54 = arith.constant 0 : index
    %c0_55 = arith.constant 0 : index
    %78 = vector.load %arg7[%c1_53, %c0_54, %c0_55] : memref<4x8x32xf32, #tpu.memory_space<vmem>>, vector<1x8x32xf32>
    %79 = vector.shape_cast %78 : vector<1x8x32xf32> to vector<8x32xf32>
    %cst_56 = arith.constant dense<0.000000e+00> : vector<16x32xf32>
    %80 = tpu.matmul %77, %79, %cst_56 {dimension_numbers = #tpu.dot_dimension_numbers<[1], [0], [0], [1], [0, 0, 1, 1], [], []>} : vector<16x8xf32>, vector<8x32xf32>, vector<16x32xf32> -> vector<16x32xf32>
    %81 = arith.addf %40, %80 : vector<16x32xf32>
    %c2 = arith.constant 2 : index
    %c0_57 = arith.constant 0 : index
    %c0_58 = arith.constant 0 : index
    %82 = vector.load %arg1[%c2, %c0_57, %c0_58] : memref<4x32x8xf32, #tpu.memory_space<vmem>>, vector<1x32x8xf32>
    %83 = vector.shape_cast %82 : vector<1x32x8xf32> to vector<32x8xf32>
    %cst_59 = arith.constant dense<0.000000e+00> : vector<16x8xf32>
    %84 = tpu.matmul %0, %83, %cst_59 {dimension_numbers = #tpu.dot_dimension_numbers<[1], [0], [0], [1], [0, 0, 1, 1], [], []>} : vector<16x32xf32>, vector<32x8xf32>, vector<16x8xf32> -> vector<16x8xf32>
    %c2_60 = arith.constant 2 : index
    %c0_61 = arith.constant 0 : index
    %c0_62 = arith.constant 0 : index
    %85 = vector.load %arg4[%c2_60, %c0_61, %c0_62] : memref<4x1x8xf32, #tpu.memory_space<vmem>>, vector<1x1x8xf32>
    %86 = vector.shape_cast %85 : vector<1x1x8xf32> to vector<1x8xf32>
    %87 = vector.broadcast %86 : vector<1x8xf32> to vector<16x8xf32>
    %88 = arith.addf %84, %87 : vector<16x8xf32>
    %c2_63 = arith.constant 2 : index
    %c0_64 = arith.constant 0 : index
    %c0_65 = arith.constant 0 : index
    %89 = vector.load %arg2[%c2_63, %c0_64, %c0_65] : memref<4x32x8xf32, #tpu.memory_space<vmem>>, vector<1x32x8xf32>
    %90 = vector.shape_cast %89 : vector<1x32x8xf32> to vector<32x8xf32>
    %cst_66 = arith.constant dense<0.000000e+00> : vector<16x8xf32>
    %91 = tpu.matmul %0, %90, %cst_66 {dimension_numbers = #tpu.dot_dimension_numbers<[1], [0], [0], [1], [0, 0, 1, 1], [], []>} : vector<16x32xf32>, vector<32x8xf32>, vector<16x8xf32> -> vector<16x8xf32>
    %c2_67 = arith.constant 2 : index
    %c0_68 = arith.constant 0 : index
    %c0_69 = arith.constant 0 : index
    %92 = vector.load %arg5[%c2_67, %c0_68, %c0_69] : memref<4x1x8xf32, #tpu.memory_space<vmem>>, vector<1x1x8xf32>
    %93 = vector.shape_cast %92 : vector<1x1x8xf32> to vector<1x8xf32>
    %94 = vector.broadcast %93 : vector<1x8xf32> to vector<16x8xf32>
    %95 = arith.addf %91, %94 : vector<16x8xf32>
    %c2_70 = arith.constant 2 : index
    %c0_71 = arith.constant 0 : index
    %c0_72 = arith.constant 0 : index
    %96 = vector.load %arg3[%c2_70, %c0_71, %c0_72] : memref<4x32x8xf32, #tpu.memory_space<vmem>>, vector<1x32x8xf32>
    %97 = vector.shape_cast %96 : vector<1x32x8xf32> to vector<32x8xf32>
    %cst_73 = arith.constant dense<0.000000e+00> : vector<16x8xf32>
    %98 = tpu.matmul %0, %97, %cst_73 {dimension_numbers = #tpu.dot_dimension_numbers<[1], [0], [0], [1], [0, 0, 1, 1], [], []>} : vector<16x32xf32>, vector<32x8xf32>, vector<16x8xf32> -> vector<16x8xf32>
    %c2_74 = arith.constant 2 : index
    %c0_75 = arith.constant 0 : index
    %c0_76 = arith.constant 0 : index
    %99 = vector.load %arg6[%c2_74, %c0_75, %c0_76] : memref<4x1x8xf32, #tpu.memory_space<vmem>>, vector<1x1x8xf32>
    %100 = vector.shape_cast %99 : vector<1x1x8xf32> to vector<1x8xf32>
    %101 = vector.broadcast %100 : vector<1x8xf32> to vector<16x8xf32>
    %102 = arith.addf %98, %101 : vector<16x8xf32>
    %103 = vector.shape_cast %88 : vector<16x8xf32> to vector<2x8x8xf32>
    %104 = vector.shape_cast %95 : vector<16x8xf32> to vector<2x8x8xf32>
    %105 = vector.shape_cast %102 : vector<16x8xf32> to vector<2x8x8xf32>
    "tpu.trace_start"() <{level = 10 : i32, message = "bqd,bkd->bqk"}> : () -> ()
    %cst_77 = arith.constant dense<0.000000e+00> : vector<2x8x8xf32>
    %106 = tpu.matmul %103, %104, %cst_77 {dimension_numbers = #tpu.dot_dimension_numbers<[2], [2], [1], [1], [0, 0, 0, 1, 1, 1], [0], [0]>} : vector<2x8x8xf32>, vector<2x8x8xf32>, vector<2x8x8xf32> -> vector<2x8x8xf32>
    "tpu.trace_stop"() : () -> ()
    %cst_78 = arith.constant dense<0xFF800000> : vector<2x8xf32>
    %107 = vector.multi_reduction <maximumf>, %106, %cst_78 [2] : vector<2x8x8xf32> to vector<2x8xf32>
    %108 = vector.shape_cast %107 : vector<2x8xf32> to vector<2x8x1xf32>
    %109 = vector.broadcast %108 : vector<2x8x1xf32> to vector<2x8x8xf32>
    %110 = arith.subf %106, %109 : vector<2x8x8xf32>
    %111 = math.exp %110 : vector<2x8x8xf32>
    %cst_79 = arith.constant dense<0.000000e+00> : vector<2x8xf32>
    %112 = vector.multi_reduction <add>, %111, %cst_79 [2] : vector<2x8x8xf32> to vector<2x8xf32>
    %113 = vector.shape_cast %112 : vector<2x8xf32> to vector<2x8x1xf32>
    %114 = tpu.reciprocal %113 {approx = true} : vector<2x8x1xf32> -> vector<2x8x1xf32>
    %115 = vector.broadcast %114 : vector<2x8x1xf32> to vector<2x8x8xf32>
    %116 = arith.mulf %111, %115 : vector<2x8x8xf32>
    "tpu.trace_start"() <{level = 10 : i32, message = "bqk,bkd->bqd"}> : () -> ()
    %cst_80 = arith.constant dense<0.000000e+00> : vector<2x8x8xf32>
    %117 = tpu.matmul %116, %105, %cst_80 {dimension_numbers = #tpu.dot_dimension_numbers<[2], [1], [1], [2], [0, 0, 0, 1, 1, 2], [0], [0]>} : vector<2x8x8xf32>, vector<2x8x8xf32>, vector<2x8x8xf32> -> vector<2x8x8xf32>
    "tpu.trace_stop"() : () -> ()
    %118 = vector.shape_cast %117 : vector<2x8x8xf32> to vector<16x8xf32>
    %c2_81 = arith.constant 2 : index
    %c0_82 = arith.constant 0 : index
    %c0_83 = arith.constant 0 : index
    %119 = vector.load %arg7[%c2_81, %c0_82, %c0_83] : memref<4x8x32xf32, #tpu.memory_space<vmem>>, vector<1x8x32xf32>
    %120 = vector.shape_cast %119 : vector<1x8x32xf32> to vector<8x32xf32>
    %cst_84 = arith.constant dense<0.000000e+00> : vector<16x32xf32>
    %121 = tpu.matmul %118, %120, %cst_84 {dimension_numbers = #tpu.dot_dimension_numbers<[1], [0], [0], [1], [0, 0, 1, 1], [], []>} : vector<16x8xf32>, vector<8x32xf32>, vector<16x32xf32> -> vector<16x32xf32>
    %122 = arith.addf %81, %121 : vector<16x32xf32>
    %c3 = arith.constant 3 : index
    %c0_85 = arith.constant 0 : index
    %c0_86 = arith.constant 0 : index
    %123 = vector.load %arg1[%c3, %c0_85, %c0_86] : memref<4x32x8xf32, #tpu.memory_space<vmem>>, vector<1x32x8xf32>
    %124 = vector.shape_cast %123 : vector<1x32x8xf32> to vector<32x8xf32>
    %cst_87 = arith.constant dense<0.000000e+00> : vector<16x8xf32>
    %125 = tpu.matmul %0, %124, %cst_87 {dimension_numbers = #tpu.dot_dimension_numbers<[1], [0], [0], [1], [0, 0, 1, 1], [], []>} : vector<16x32xf32>, vector<32x8xf32>, vector<16x8xf32> -> vector<16x8xf32>
    %c3_88 = arith.constant 3 : index
    %c0_89 = arith.constant 0 : index
    %c0_90 = arith.constant 0 : index
    %126 = vector.load %arg4[%c3_88, %c0_89, %c0_90] : memref<4x1x8xf32, #tpu.memory_space<vmem>>, vector<1x1x8xf32>
    %127 = vector.shape_cast %126 : vector<1x1x8xf32> to vector<1x8xf32>
    %128 = vector.broadcast %127 : vector<1x8xf32> to vector<16x8xf32>
    %129 = arith.addf %125, %128 : vector<16x8xf32>
    %c3_91 = arith.constant 3 : index
    %c0_92 = arith.constant 0 : index
    %c0_93 = arith.constant 0 : index
    %130 = vector.load %arg2[%c3_91, %c0_92, %c0_93] : memref<4x32x8xf32, #tpu.memory_space<vmem>>, vector<1x32x8xf32>
    %131 = vector.shape_cast %130 : vector<1x32x8xf32> to vector<32x8xf32>
    %cst_94 = arith.constant dense<0.000000e+00> : vector<16x8xf32>
    %132 = tpu.matmul %0, %131, %cst_94 {dimension_numbers = #tpu.dot_dimension_numbers<[1], [0], [0], [1], [0, 0, 1, 1], [], []>} : vector<16x32xf32>, vector<32x8xf32>, vector<16x8xf32> -> vector<16x8xf32>
    %c3_95 = arith.constant 3 : index
    %c0_96 = arith.constant 0 : index
    %c0_97 = arith.constant 0 : index
    %133 = vector.load %arg5[%c3_95, %c0_96, %c0_97] : memref<4x1x8xf32, #tpu.memory_space<vmem>>, vector<1x1x8xf32>
    %134 = vector.shape_cast %133 : vector<1x1x8xf32> to vector<1x8xf32>
    %135 = vector.broadcast %134 : vector<1x8xf32> to vector<16x8xf32>
    %136 = arith.addf %132, %135 : vector<16x8xf32>
    %c3_98 = arith.constant 3 : index
    %c0_99 = arith.constant 0 : index
    %c0_100 = arith.constant 0 : index
    %137 = vector.load %arg3[%c3_98, %c0_99, %c0_100] : memref<4x32x8xf32, #tpu.memory_space<vmem>>, vector<1x32x8xf32>
    %138 = vector.shape_cast %137 : vector<1x32x8xf32> to vector<32x8xf32>
    %cst_101 = arith.constant dense<0.000000e+00> : vector<16x8xf32>
    %139 = tpu.matmul %0, %138, %cst_101 {dimension_numbers = #tpu.dot_dimension_numbers<[1], [0], [0], [1], [0, 0, 1, 1], [], []>} : vector<16x32xf32>, vector<32x8xf32>, vector<16x8xf32> -> vector<16x8xf32>
    %c3_102 = arith.constant 3 : index
    %c0_103 = arith.constant 0 : index
    %c0_104 = arith.constant 0 : index
    %140 = vector.load %arg6[%c3_102, %c0_103, %c0_104] : memref<4x1x8xf32, #tpu.memory_space<vmem>>, vector<1x1x8xf32>
    %141 = vector.shape_cast %140 : vector<1x1x8xf32> to vector<1x8xf32>
    %142 = vector.broadcast %141 : vector<1x8xf32> to vector<16x8xf32>
    %143 = arith.addf %139, %142 : vector<16x8xf32>
    %144 = vector.shape_cast %129 : vector<16x8xf32> to vector<2x8x8xf32>
    %145 = vector.shape_cast %136 : vector<16x8xf32> to vector<2x8x8xf32>
    %146 = vector.shape_cast %143 : vector<16x8xf32> to vector<2x8x8xf32>
    "tpu.trace_start"() <{level = 10 : i32, message = "bqd,bkd->bqk"}> : () -> ()
    %cst_105 = arith.constant dense<0.000000e+00> : vector<2x8x8xf32>
    %147 = tpu.matmul %144, %145, %cst_105 {dimension_numbers = #tpu.dot_dimension_numbers<[2], [2], [1], [1], [0, 0, 0, 1, 1, 1], [0], [0]>} : vector<2x8x8xf32>, vector<2x8x8xf32>, vector<2x8x8xf32> -> vector<2x8x8xf32>
    "tpu.trace_stop"() : () -> ()
    %cst_106 = arith.constant dense<0xFF800000> : vector<2x8xf32>
    %148 = vector.multi_reduction <maximumf>, %147, %cst_106 [2] : vector<2x8x8xf32> to vector<2x8xf32>
    %149 = vector.shape_cast %148 : vector<2x8xf32> to vector<2x8x1xf32>
    %150 = vector.broadcast %149 : vector<2x8x1xf32> to vector<2x8x8xf32>
    %151 = arith.subf %147, %150 : vector<2x8x8xf32>
    %152 = math.exp %151 : vector<2x8x8xf32>
    %cst_107 = arith.constant dense<0.000000e+00> : vector<2x8xf32>
    %153 = vector.multi_reduction <add>, %152, %cst_107 [2] : vector<2x8x8xf32> to vector<2x8xf32>
    %154 = vector.shape_cast %153 : vector<2x8xf32> to vector<2x8x1xf32>
    %155 = tpu.reciprocal %154 {approx = true} : vector<2x8x1xf32> -> vector<2x8x1xf32>
    %156 = vector.broadcast %155 : vector<2x8x1xf32> to vector<2x8x8xf32>
    %157 = arith.mulf %152, %156 : vector<2x8x8xf32>
    "tpu.trace_start"() <{level = 10 : i32, message = "bqk,bkd->bqd"}> : () -> ()
    %cst_108 = arith.constant dense<0.000000e+00> : vector<2x8x8xf32>
    %158 = tpu.matmul %157, %146, %cst_108 {dimension_numbers = #tpu.dot_dimension_numbers<[2], [1], [1], [2], [0, 0, 0, 1, 1, 2], [0], [0]>} : vector<2x8x8xf32>, vector<2x8x8xf32>, vector<2x8x8xf32> -> vector<2x8x8xf32>
    "tpu.trace_stop"() : () -> ()
    %159 = vector.shape_cast %158 : vector<2x8x8xf32> to vector<16x8xf32>
    %c3_109 = arith.constant 3 : index
    %c0_110 = arith.constant 0 : index
    %c0_111 = arith.constant 0 : index
    %160 = vector.load %arg7[%c3_109, %c0_110, %c0_111] : memref<4x8x32xf32, #tpu.memory_space<vmem>>, vector<1x8x32xf32>
    %161 = vector.shape_cast %160 : vector<1x8x32xf32> to vector<8x32xf32>
    %cst_112 = arith.constant dense<0.000000e+00> : vector<16x32xf32>
    %162 = tpu.matmul %159, %161, %cst_112 {dimension_numbers = #tpu.dot_dimension_numbers<[1], [0], [0], [1], [0, 0, 1, 1], [], []>} : vector<16x8xf32>, vector<8x32xf32>, vector<16x32xf32> -> vector<16x32xf32>
    %163 = arith.addf %122, %162 : vector<16x32xf32>
    %c0_113 = arith.constant 0 : index
    %c0_114 = arith.constant 0 : index
    %164 = vector.load %arg8[%c0_113, %c0_114] : memref<1x32xf32, #tpu.memory_space<vmem>>, vector<1x32xf32>
    %165 = vector.broadcast %164 : vector<1x32xf32> to vector<16x32xf32>
    %166 = arith.addf %163, %165 : vector<16x32xf32>
    %167 = arith.addf %0, %166 : vector<16x32xf32>
    %c0_115 = arith.constant 0 : index
    %c0_116 = arith.constant 0 : index
    %168 = vector.load %arg9[%c0_115, %c0_116] : memref<1x32xf32, #tpu.memory_space<vmem>>, vector<1x32xf32>
    %c0_117 = arith.constant 0 : index
    %c0_118 = arith.constant 0 : index
    %169 = vector.load %arg10[%c0_117, %c0_118] : memref<1x32xf32, #tpu.memory_space<vmem>>, vector<1x32xf32>
    %cst_119 = arith.constant dense<0.000000e+00> : vector<16xf32>
    %170 = vector.multi_reduction <add>, %167, %cst_119 [1] : vector<16x32xf32> to vector<16xf32>
    %171 = vector.shape_cast %170 : vector<16xf32> to vector<16x1xf32>
    %cst_120 = arith.constant 3.200000e+01 : f32
    %172 = vector.broadcast %cst_120 : f32 to vector<16x1xf32>
    %173 = arith.divf %171, %172 : vector<16x1xf32>
    %174 = vector.broadcast %173 : vector<16x1xf32> to vector<16x32xf32>
    %175 = arith.subf %167, %174 : vector<16x32xf32>
    %176 = arith.mulf %175, %175 : vector<16x32xf32>
    %cst_121 = arith.constant dense<0.000000e+00> : vector<16xf32>
    %177 = vector.multi_reduction <add>, %176, %cst_121 [1] : vector<16x32xf32> to vector<16xf32>
    %178 = vector.shape_cast %177 : vector<16xf32> to vector<16x1xf32>
    %cst_122 = arith.constant 3.200000e+01 : f32
    %179 = vector.broadcast %cst_122 : f32 to vector<16x1xf32>
    %180 = arith.divf %178, %179 : vector<16x1xf32>
    %181 = vector.broadcast %173 : vector<16x1xf32> to vector<16x32xf32>
    %182 = arith.subf %167, %181 : vector<16x32xf32>
    %cst_123 = arith.constant 9.99999974E-6 : f32
    %183 = vector.broadcast %cst_123 : f32 to vector<16x1xf32>
    %184 = arith.addf %180, %183 : vector<16x1xf32>
    %185 = math.rsqrt %184 : vector<16x1xf32>
    %186 = vector.broadcast %185 : vector<16x1xf32> to vector<16x32xf32>
    %187 = arith.mulf %182, %186 : vector<16x32xf32>
    %188 = vector.broadcast %168 : vector<1x32xf32> to vector<16x32xf32>
    %189 = arith.mulf %187, %188 : vector<16x32xf32>
    %190 = vector.broadcast %169 : vector<1x32xf32> to vector<16x32xf32>
    %191 = arith.addf %189, %190 : vector<16x32xf32>
    %c0_124 = arith.constant 0 : index
    %c0_125 = arith.constant 0 : index
    %192 = vector.load %arg11[%c0_124, %c0_125] : memref<32x64xf32, #tpu.memory_space<vmem>>, vector<32x64xf32>
    %cst_126 = arith.constant dense<0.000000e+00> : vector<16x64xf32>
    %193 = tpu.matmul %191, %192, %cst_126 {dimension_numbers = #tpu.dot_dimension_numbers<[1], [0], [0], [1], [0, 0, 1, 1], [], []>} : vector<16x32xf32>, vector<32x64xf32>, vector<16x64xf32> -> vector<16x64xf32>
    %c0_127 = arith.constant 0 : index
    %c0_128 = arith.constant 0 : index
    %194 = vector.load %arg12[%c0_127, %c0_128] : memref<1x64xf32, #tpu.memory_space<vmem>>, vector<1x64xf32>
    %195 = vector.broadcast %194 : vector<1x64xf32> to vector<16x64xf32>
    %196 = arith.addf %193, %195 : vector<16x64xf32>
    %cst_129 = arith.constant 0.000000e+00 : f32
    %197 = vector.broadcast %cst_129 : f32 to vector<16x64xf32>
    %198 = arith.maximumf %196, %197 : vector<16x64xf32>
    %c0_130 = arith.constant 0 : index
    %c0_131 = arith.constant 0 : index
    %199 = vector.load %arg13[%c0_130, %c0_131] : memref<64x32xf32, #tpu.memory_space<vmem>>, vector<64x32xf32>
    %cst_132 = arith.constant dense<0.000000e+00> : vector<16x32xf32>
    %200 = tpu.matmul %198, %199, %cst_132 {dimension_numbers = #tpu.dot_dimension_numbers<[1], [0], [0], [1], [0, 0, 1, 1], [], []>} : vector<16x64xf32>, vector<64x32xf32>, vector<16x32xf32> -> vector<16x32xf32>
    %c0_133 = arith.constant 0 : index
    %c0_134 = arith.constant 0 : index
    %201 = vector.load %arg14[%c0_133, %c0_134] : memref<1x32xf32, #tpu.memory_space<vmem>>, vector<1x32xf32>
    %202 = vector.broadcast %201 : vector<1x32xf32> to vector<16x32xf32>
    %203 = arith.addf %200, %202 : vector<16x32xf32>
    %204 = arith.addf %191, %203 : vector<16x32xf32>
    %c0_135 = arith.constant 0 : index
    %c0_136 = arith.constant 0 : index
    %205 = vector.load %arg15[%c0_135, %c0_136] : memref<1x32xf32, #tpu.memory_space<vmem>>, vector<1x32xf32>
    %c0_137 = arith.constant 0 : index
    %c0_138 = arith.constant 0 : index
    %206 = vector.load %arg16[%c0_137, %c0_138] : memref<1x32xf32, #tpu.memory_space<vmem>>, vector<1x32xf32>
    %cst_139 = arith.constant dense<0.000000e+00> : vector<16xf32>
    %207 = vector.multi_reduction <add>, %204, %cst_139 [1] : vector<16x32xf32> to vector<16xf32>
    %208 = vector.shape_cast %207 : vector<16xf32> to vector<16x1xf32>
    %cst_140 = arith.constant 3.200000e+01 : f32
    %209 = vector.broadcast %cst_140 : f32 to vector<16x1xf32>
    %210 = arith.divf %208, %209 : vector<16x1xf32>
    %211 = vector.broadcast %210 : vector<16x1xf32> to vector<16x32xf32>
    %212 = arith.subf %204, %211 : vector<16x32xf32>
    %213 = arith.mulf %212, %212 : vector<16x32xf32>
    %cst_141 = arith.constant dense<0.000000e+00> : vector<16xf32>
    %214 = vector.multi_reduction <add>, %213, %cst_141 [1] : vector<16x32xf32> to vector<16xf32>
    %215 = vector.shape_cast %214 : vector<16xf32> to vector<16x1xf32>
    %cst_142 = arith.constant 3.200000e+01 : f32
    %216 = vector.broadcast %cst_142 : f32 to vector<16x1xf32>
    %217 = arith.divf %215, %216 : vector<16x1xf32>
    %218 = vector.broadcast %210 : vector<16x1xf32> to vector<16x32xf32>
    %219 = arith.subf %204, %218 : vector<16x32xf32>
    %cst_143 = arith.constant 9.99999974E-6 : f32
    %220 = vector.broadcast %cst_143 : f32 to vector<16x1xf32>
    %221 = arith.addf %217, %220 : vector<16x1xf32>
    %222 = math.rsqrt %221 : vector<16x1xf32>
    %223 = vector.broadcast %222 : vector<16x1xf32> to vector<16x32xf32>
    %224 = arith.mulf %219, %223 : vector<16x32xf32>
    %225 = vector.broadcast %205 : vector<1x32xf32> to vector<16x32xf32>
    %226 = arith.mulf %224, %225 : vector<16x32xf32>
    %227 = vector.broadcast %206 : vector<1x32xf32> to vector<16x32xf32>
    %228 = arith.addf %226, %227 : vector<16x32xf32>
    %c0_144 = arith.constant 0 : index
    %c0_145 = arith.constant 0 : index
    %c0_146 = arith.constant 0 : index
    %229 = vector.load %arg17[%c0_144, %c0_145, %c0_146] : memref<4x32x8xf32, #tpu.memory_space<vmem>>, vector<1x32x8xf32>
    %230 = vector.shape_cast %229 : vector<1x32x8xf32> to vector<32x8xf32>
    %cst_147 = arith.constant dense<0.000000e+00> : vector<16x8xf32>
    %231 = tpu.matmul %228, %230, %cst_147 {dimension_numbers = #tpu.dot_dimension_numbers<[1], [0], [0], [1], [0, 0, 1, 1], [], []>} : vector<16x32xf32>, vector<32x8xf32>, vector<16x8xf32> -> vector<16x8xf32>
    %c0_148 = arith.constant 0 : index
    %c0_149 = arith.constant 0 : index
    %c0_150 = arith.constant 0 : index
    %232 = vector.load %arg20[%c0_148, %c0_149, %c0_150] : memref<4x1x8xf32, #tpu.memory_space<vmem>>, vector<1x1x8xf32>
    %233 = vector.shape_cast %232 : vector<1x1x8xf32> to vector<1x8xf32>
    %234 = vector.broadcast %233 : vector<1x8xf32> to vector<16x8xf32>
    %235 = arith.addf %231, %234 : vector<16x8xf32>
    %c0_151 = arith.constant 0 : index
    %c0_152 = arith.constant 0 : index
    %c0_153 = arith.constant 0 : index
    %236 = vector.load %arg18[%c0_151, %c0_152, %c0_153] : memref<4x32x8xf32, #tpu.memory_space<vmem>>, vector<1x32x8xf32>
    %237 = vector.shape_cast %236 : vector<1x32x8xf32> to vector<32x8xf32>
    %cst_154 = arith.constant dense<0.000000e+00> : vector<16x8xf32>
    %238 = tpu.matmul %228, %237, %cst_154 {dimension_numbers = #tpu.dot_dimension_numbers<[1], [0], [0], [1], [0, 0, 1, 1], [], []>} : vector<16x32xf32>, vector<32x8xf32>, vector<16x8xf32> -> vector<16x8xf32>
    %c0_155 = arith.constant 0 : index
    %c0_156 = arith.constant 0 : index
    %c0_157 = arith.constant 0 : index
    %239 = vector.load %arg21[%c0_155, %c0_156, %c0_157] : memref<4x1x8xf32, #tpu.memory_space<vmem>>, vector<1x1x8xf32>
    %240 = vector.shape_cast %239 : vector<1x1x8xf32> to vector<1x8xf32>
    %241 = vector.broadcast %240 : vector<1x8xf32> to vector<16x8xf32>
    %242 = arith.addf %238, %241 : vector<16x8xf32>
    %c0_158 = arith.constant 0 : index
    %c0_159 = arith.constant 0 : index
    %c0_160 = arith.constant 0 : index
    %243 = vector.load %arg19[%c0_158, %c0_159, %c0_160] : memref<4x32x8xf32, #tpu.memory_space<vmem>>, vector<1x32x8xf32>
    %244 = vector.shape_cast %243 : vector<1x32x8xf32> to vector<32x8xf32>
    %cst_161 = arith.constant dense<0.000000e+00> : vector<16x8xf32>
    %245 = tpu.matmul %228, %244, %cst_161 {dimension_numbers = #tpu.dot_dimension_numbers<[1], [0], [0], [1], [0, 0, 1, 1], [], []>} : vector<16x32xf32>, vector<32x8xf32>, vector<16x8xf32> -> vector<16x8xf32>
    %c0_162 = arith.constant 0 : index
    %c0_163 = arith.constant 0 : index
    %c0_164 = arith.constant 0 : index
    %246 = vector.load %arg22[%c0_162, %c0_163, %c0_164] : memref<4x1x8xf32, #tpu.memory_space<vmem>>, vector<1x1x8xf32>
    %247 = vector.shape_cast %246 : vector<1x1x8xf32> to vector<1x8xf32>
    %248 = vector.broadcast %247 : vector<1x8xf32> to vector<16x8xf32>
    %249 = arith.addf %245, %248 : vector<16x8xf32>
    %250 = vector.shape_cast %235 : vector<16x8xf32> to vector<2x8x8xf32>
    %251 = vector.shape_cast %242 : vector<16x8xf32> to vector<2x8x8xf32>
    %252 = vector.shape_cast %249 : vector<16x8xf32> to vector<2x8x8xf32>
    "tpu.trace_start"() <{level = 10 : i32, message = "bqd,bkd->bqk"}> : () -> ()
    %cst_165 = arith.constant dense<0.000000e+00> : vector<2x8x8xf32>
    %253 = tpu.matmul %250, %251, %cst_165 {dimension_numbers = #tpu.dot_dimension_numbers<[2], [2], [1], [1], [0, 0, 0, 1, 1, 1], [0], [0]>} : vector<2x8x8xf32>, vector<2x8x8xf32>, vector<2x8x8xf32> -> vector<2x8x8xf32>
    "tpu.trace_stop"() : () -> ()
    %cst_166 = arith.constant dense<0xFF800000> : vector<2x8xf32>
    %254 = vector.multi_reduction <maximumf>, %253, %cst_166 [2] : vector<2x8x8xf32> to vector<2x8xf32>
    %255 = vector.shape_cast %254 : vector<2x8xf32> to vector<2x8x1xf32>
    %256 = vector.broadcast %255 : vector<2x8x1xf32> to vector<2x8x8xf32>
    %257 = arith.subf %253, %256 : vector<2x8x8xf32>
    %258 = math.exp %257 : vector<2x8x8xf32>
    %cst_167 = arith.constant dense<0.000000e+00> : vector<2x8xf32>
    %259 = vector.multi_reduction <add>, %258, %cst_167 [2] : vector<2x8x8xf32> to vector<2x8xf32>
    %260 = vector.shape_cast %259 : vector<2x8xf32> to vector<2x8x1xf32>
    %261 = tpu.reciprocal %260 {approx = true} : vector<2x8x1xf32> -> vector<2x8x1xf32>
    %262 = vector.broadcast %261 : vector<2x8x1xf32> to vector<2x8x8xf32>
    %263 = arith.mulf %258, %262 : vector<2x8x8xf32>
    "tpu.trace_start"() <{level = 10 : i32, message = "bqk,bkd->bqd"}> : () -> ()
    %cst_168 = arith.constant dense<0.000000e+00> : vector<2x8x8xf32>
    %264 = tpu.matmul %263, %252, %cst_168 {dimension_numbers = #tpu.dot_dimension_numbers<[2], [1], [1], [2], [0, 0, 0, 1, 1, 2], [0], [0]>} : vector<2x8x8xf32>, vector<2x8x8xf32>, vector<2x8x8xf32> -> vector<2x8x8xf32>
    "tpu.trace_stop"() : () -> ()
    %265 = vector.shape_cast %264 : vector<2x8x8xf32> to vector<16x8xf32>
    %c0_169 = arith.constant 0 : index
    %c0_170 = arith.constant 0 : index
    %c0_171 = arith.constant 0 : index
    %266 = vector.load %arg23[%c0_169, %c0_170, %c0_171] : memref<4x8x32xf32, #tpu.memory_space<vmem>>, vector<1x8x32xf32>
    %267 = vector.shape_cast %266 : vector<1x8x32xf32> to vector<8x32xf32>
    %cst_172 = arith.constant dense<0.000000e+00> : vector<16x32xf32>
    %268 = tpu.matmul %265, %267, %cst_172 {dimension_numbers = #tpu.dot_dimension_numbers<[1], [0], [0], [1], [0, 0, 1, 1], [], []>} : vector<16x8xf32>, vector<8x32xf32>, vector<16x32xf32> -> vector<16x32xf32>
    %c1_173 = arith.constant 1 : index
    %c0_174 = arith.constant 0 : index
    %c0_175 = arith.constant 0 : index
    %269 = vector.load %arg17[%c1_173, %c0_174, %c0_175] : memref<4x32x8xf32, #tpu.memory_space<vmem>>, vector<1x32x8xf32>
    %270 = vector.shape_cast %269 : vector<1x32x8xf32> to vector<32x8xf32>
    %cst_176 = arith.constant dense<0.000000e+00> : vector<16x8xf32>
    %271 = tpu.matmul %228, %270, %cst_176 {dimension_numbers = #tpu.dot_dimension_numbers<[1], [0], [0], [1], [0, 0, 1, 1], [], []>} : vector<16x32xf32>, vector<32x8xf32>, vector<16x8xf32> -> vector<16x8xf32>
    %c1_177 = arith.constant 1 : index
    %c0_178 = arith.constant 0 : index
    %c0_179 = arith.constant 0 : index
    %272 = vector.load %arg20[%c1_177, %c0_178, %c0_179] : memref<4x1x8xf32, #tpu.memory_space<vmem>>, vector<1x1x8xf32>
    %273 = vector.shape_cast %272 : vector<1x1x8xf32> to vector<1x8xf32>
    %274 = vector.broadcast %273 : vector<1x8xf32> to vector<16x8xf32>
    %275 = arith.addf %271, %274 : vector<16x8xf32>
    %c1_180 = arith.constant 1 : index
    %c0_181 = arith.constant 0 : index
    %c0_182 = arith.constant 0 : index
    %276 = vector.load %arg18[%c1_180, %c0_181, %c0_182] : memref<4x32x8xf32, #tpu.memory_space<vmem>>, vector<1x32x8xf32>
    %277 = vector.shape_cast %276 : vector<1x32x8xf32> to vector<32x8xf32>
    %cst_183 = arith.constant dense<0.000000e+00> : vector<16x8xf32>
    %278 = tpu.matmul %228, %277, %cst_183 {dimension_numbers = #tpu.dot_dimension_numbers<[1], [0], [0], [1], [0, 0, 1, 1], [], []>} : vector<16x32xf32>, vector<32x8xf32>, vector<16x8xf32> -> vector<16x8xf32>
    %c1_184 = arith.constant 1 : index
    %c0_185 = arith.constant 0 : index
    %c0_186 = arith.constant 0 : index
    %279 = vector.load %arg21[%c1_184, %c0_185, %c0_186] : memref<4x1x8xf32, #tpu.memory_space<vmem>>, vector<1x1x8xf32>
    %280 = vector.shape_cast %279 : vector<1x1x8xf32> to vector<1x8xf32>
    %281 = vector.broadcast %280 : vector<1x8xf32> to vector<16x8xf32>
    %282 = arith.addf %278, %281 : vector<16x8xf32>
    %c1_187 = arith.constant 1 : index
    %c0_188 = arith.constant 0 : index
    %c0_189 = arith.constant 0 : index
    %283 = vector.load %arg19[%c1_187, %c0_188, %c0_189] : memref<4x32x8xf32, #tpu.memory_space<vmem>>, vector<1x32x8xf32>
    %284 = vector.shape_cast %283 : vector<1x32x8xf32> to vector<32x8xf32>
    %cst_190 = arith.constant dense<0.000000e+00> : vector<16x8xf32>
    %285 = tpu.matmul %228, %284, %cst_190 {dimension_numbers = #tpu.dot_dimension_numbers<[1], [0], [0], [1], [0, 0, 1, 1], [], []>} : vector<16x32xf32>, vector<32x8xf32>, vector<16x8xf32> -> vector<16x8xf32>
    %c1_191 = arith.constant 1 : index
    %c0_192 = arith.constant 0 : index
    %c0_193 = arith.constant 0 : index
    %286 = vector.load %arg22[%c1_191, %c0_192, %c0_193] : memref<4x1x8xf32, #tpu.memory_space<vmem>>, vector<1x1x8xf32>
    %287 = vector.shape_cast %286 : vector<1x1x8xf32> to vector<1x8xf32>
    %288 = vector.broadcast %287 : vector<1x8xf32> to vector<16x8xf32>
    %289 = arith.addf %285, %288 : vector<16x8xf32>
    %290 = vector.shape_cast %275 : vector<16x8xf32> to vector<2x8x8xf32>
    %291 = vector.shape_cast %282 : vector<16x8xf32> to vector<2x8x8xf32>
    %292 = vector.shape_cast %289 : vector<16x8xf32> to vector<2x8x8xf32>
    "tpu.trace_start"() <{level = 10 : i32, message = "bqd,bkd->bqk"}> : () -> ()
    %cst_194 = arith.constant dense<0.000000e+00> : vector<2x8x8xf32>
    %293 = tpu.matmul %290, %291, %cst_194 {dimension_numbers = #tpu.dot_dimension_numbers<[2], [2], [1], [1], [0, 0, 0, 1, 1, 1], [0], [0]>} : vector<2x8x8xf32>, vector<2x8x8xf32>, vector<2x8x8xf32> -> vector<2x8x8xf32>
    "tpu.trace_stop"() : () -> ()
    %cst_195 = arith.constant dense<0xFF800000> : vector<2x8xf32>
    %294 = vector.multi_reduction <maximumf>, %293, %cst_195 [2] : vector<2x8x8xf32> to vector<2x8xf32>
    %295 = vector.shape_cast %294 : vector<2x8xf32> to vector<2x8x1xf32>
    %296 = vector.broadcast %295 : vector<2x8x1xf32> to vector<2x8x8xf32>
    %297 = arith.subf %293, %296 : vector<2x8x8xf32>
    %298 = math.exp %297 : vector<2x8x8xf32>
    %cst_196 = arith.constant dense<0.000000e+00> : vector<2x8xf32>
    %299 = vector.multi_reduction <add>, %298, %cst_196 [2] : vector<2x8x8xf32> to vector<2x8xf32>
    %300 = vector.shape_cast %299 : vector<2x8xf32> to vector<2x8x1xf32>
    %301 = tpu.reciprocal %300 {approx = true} : vector<2x8x1xf32> -> vector<2x8x1xf32>
    %302 = vector.broadcast %301 : vector<2x8x1xf32> to vector<2x8x8xf32>
    %303 = arith.mulf %298, %302 : vector<2x8x8xf32>
    "tpu.trace_start"() <{level = 10 : i32, message = "bqk,bkd->bqd"}> : () -> ()
    %cst_197 = arith.constant dense<0.000000e+00> : vector<2x8x8xf32>
    %304 = tpu.matmul %303, %292, %cst_197 {dimension_numbers = #tpu.dot_dimension_numbers<[2], [1], [1], [2], [0, 0, 0, 1, 1, 2], [0], [0]>} : vector<2x8x8xf32>, vector<2x8x8xf32>, vector<2x8x8xf32> -> vector<2x8x8xf32>
    "tpu.trace_stop"() : () -> ()
    %305 = vector.shape_cast %304 : vector<2x8x8xf32> to vector<16x8xf32>
    %c1_198 = arith.constant 1 : index
    %c0_199 = arith.constant 0 : index
    %c0_200 = arith.constant 0 : index
    %306 = vector.load %arg23[%c1_198, %c0_199, %c0_200] : memref<4x8x32xf32, #tpu.memory_space<vmem>>, vector<1x8x32xf32>
    %307 = vector.shape_cast %306 : vector<1x8x32xf32> to vector<8x32xf32>
    %cst_201 = arith.constant dense<0.000000e+00> : vector<16x32xf32>
    %308 = tpu.matmul %305, %307, %cst_201 {dimension_numbers = #tpu.dot_dimension_numbers<[1], [0], [0], [1], [0, 0, 1, 1], [], []>} : vector<16x8xf32>, vector<8x32xf32>, vector<16x32xf32> -> vector<16x32xf32>
    %309 = arith.addf %268, %308 : vector<16x32xf32>
    %c2_202 = arith.constant 2 : index
    %c0_203 = arith.constant 0 : index
    %c0_204 = arith.constant 0 : index
    %310 = vector.load %arg17[%c2_202, %c0_203, %c0_204] : memref<4x32x8xf32, #tpu.memory_space<vmem>>, vector<1x32x8xf32>
    %311 = vector.shape_cast %310 : vector<1x32x8xf32> to vector<32x8xf32>
    %cst_205 = arith.constant dense<0.000000e+00> : vector<16x8xf32>
    %312 = tpu.matmul %228, %311, %cst_205 {dimension_numbers = #tpu.dot_dimension_numbers<[1], [0], [0], [1], [0, 0, 1, 1], [], []>} : vector<16x32xf32>, vector<32x8xf32>, vector<16x8xf32> -> vector<16x8xf32>
    %c2_206 = arith.constant 2 : index
    %c0_207 = arith.constant 0 : index
    %c0_208 = arith.constant 0 : index
    %313 = vector.load %arg20[%c2_206, %c0_207, %c0_208] : memref<4x1x8xf32, #tpu.memory_space<vmem>>, vector<1x1x8xf32>
    %314 = vector.shape_cast %313 : vector<1x1x8xf32> to vector<1x8xf32>
    %315 = vector.broadcast %314 : vector<1x8xf32> to vector<16x8xf32>
    %316 = arith.addf %312, %315 : vector<16x8xf32>
    %c2_209 = arith.constant 2 : index
    %c0_210 = arith.constant 0 : index
    %c0_211 = arith.constant 0 : index
    %317 = vector.load %arg18[%c2_209, %c0_210, %c0_211] : memref<4x32x8xf32, #tpu.memory_space<vmem>>, vector<1x32x8xf32>
    %318 = vector.shape_cast %317 : vector<1x32x8xf32> to vector<32x8xf32>
    %cst_212 = arith.constant dense<0.000000e+00> : vector<16x8xf32>
    %319 = tpu.matmul %228, %318, %cst_212 {dimension_numbers = #tpu.dot_dimension_numbers<[1], [0], [0], [1], [0, 0, 1, 1], [], []>} : vector<16x32xf32>, vector<32x8xf32>, vector<16x8xf32> -> vector<16x8xf32>
    %c2_213 = arith.constant 2 : index
    %c0_214 = arith.constant 0 : index
    %c0_215 = arith.constant 0 : index
    %320 = vector.load %arg21[%c2_213, %c0_214, %c0_215] : memref<4x1x8xf32, #tpu.memory_space<vmem>>, vector<1x1x8xf32>
    %321 = vector.shape_cast %320 : vector<1x1x8xf32> to vector<1x8xf32>
    %322 = vector.broadcast %321 : vector<1x8xf32> to vector<16x8xf32>
    %323 = arith.addf %319, %322 : vector<16x8xf32>
    %c2_216 = arith.constant 2 : index
    %c0_217 = arith.constant 0 : index
    %c0_218 = arith.constant 0 : index
    %324 = vector.load %arg19[%c2_216, %c0_217, %c0_218] : memref<4x32x8xf32, #tpu.memory_space<vmem>>, vector<1x32x8xf32>
    %325 = vector.shape_cast %324 : vector<1x32x8xf32> to vector<32x8xf32>
    %cst_219 = arith.constant dense<0.000000e+00> : vector<16x8xf32>
    %326 = tpu.matmul %228, %325, %cst_219 {dimension_numbers = #tpu.dot_dimension_numbers<[1], [0], [0], [1], [0, 0, 1, 1], [], []>} : vector<16x32xf32>, vector<32x8xf32>, vector<16x8xf32> -> vector<16x8xf32>
    %c2_220 = arith.constant 2 : index
    %c0_221 = arith.constant 0 : index
    %c0_222 = arith.constant 0 : index
    %327 = vector.load %arg22[%c2_220, %c0_221, %c0_222] : memref<4x1x8xf32, #tpu.memory_space<vmem>>, vector<1x1x8xf32>
    %328 = vector.shape_cast %327 : vector<1x1x8xf32> to vector<1x8xf32>
    %329 = vector.broadcast %328 : vector<1x8xf32> to vector<16x8xf32>
    %330 = arith.addf %326, %329 : vector<16x8xf32>
    %331 = vector.shape_cast %316 : vector<16x8xf32> to vector<2x8x8xf32>
    %332 = vector.shape_cast %323 : vector<16x8xf32> to vector<2x8x8xf32>
    %333 = vector.shape_cast %330 : vector<16x8xf32> to vector<2x8x8xf32>
    "tpu.trace_start"() <{level = 10 : i32, message = "bqd,bkd->bqk"}> : () -> ()
    %cst_223 = arith.constant dense<0.000000e+00> : vector<2x8x8xf32>
    %334 = tpu.matmul %331, %332, %cst_223 {dimension_numbers = #tpu.dot_dimension_numbers<[2], [2], [1], [1], [0, 0, 0, 1, 1, 1], [0], [0]>} : vector<2x8x8xf32>, vector<2x8x8xf32>, vector<2x8x8xf32> -> vector<2x8x8xf32>
    "tpu.trace_stop"() : () -> ()
    %cst_224 = arith.constant dense<0xFF800000> : vector<2x8xf32>
    %335 = vector.multi_reduction <maximumf>, %334, %cst_224 [2] : vector<2x8x8xf32> to vector<2x8xf32>
    %336 = vector.shape_cast %335 : vector<2x8xf32> to vector<2x8x1xf32>
    %337 = vector.broadcast %336 : vector<2x8x1xf32> to vector<2x8x8xf32>
    %338 = arith.subf %334, %337 : vector<2x8x8xf32>
    %339 = math.exp %338 : vector<2x8x8xf32>
    %cst_225 = arith.constant dense<0.000000e+00> : vector<2x8xf32>
    %340 = vector.multi_reduction <add>, %339, %cst_225 [2] : vector<2x8x8xf32> to vector<2x8xf32>
    %341 = vector.shape_cast %340 : vector<2x8xf32> to vector<2x8x1xf32>
    %342 = tpu.reciprocal %341 {approx = true} : vector<2x8x1xf32> -> vector<2x8x1xf32>
    %343 = vector.broadcast %342 : vector<2x8x1xf32> to vector<2x8x8xf32>
    %344 = arith.mulf %339, %343 : vector<2x8x8xf32>
    "tpu.trace_start"() <{level = 10 : i32, message = "bqk,bkd->bqd"}> : () -> ()
    %cst_226 = arith.constant dense<0.000000e+00> : vector<2x8x8xf32>
    %345 = tpu.matmul %344, %333, %cst_226 {dimension_numbers = #tpu.dot_dimension_numbers<[2], [1], [1], [2], [0, 0, 0, 1, 1, 2], [0], [0]>} : vector<2x8x8xf32>, vector<2x8x8xf32>, vector<2x8x8xf32> -> vector<2x8x8xf32>
    "tpu.trace_stop"() : () -> ()
    %346 = vector.shape_cast %345 : vector<2x8x8xf32> to vector<16x8xf32>
    %c2_227 = arith.constant 2 : index
    %c0_228 = arith.constant 0 : index
    %c0_229 = arith.constant 0 : index
    %347 = vector.load %arg23[%c2_227, %c0_228, %c0_229] : memref<4x8x32xf32, #tpu.memory_space<vmem>>, vector<1x8x32xf32>
    %348 = vector.shape_cast %347 : vector<1x8x32xf32> to vector<8x32xf32>
    %cst_230 = arith.constant dense<0.000000e+00> : vector<16x32xf32>
    %349 = tpu.matmul %346, %348, %cst_230 {dimension_numbers = #tpu.dot_dimension_numbers<[1], [0], [0], [1], [0, 0, 1, 1], [], []>} : vector<16x8xf32>, vector<8x32xf32>, vector<16x32xf32> -> vector<16x32xf32>
    %350 = arith.addf %309, %349 : vector<16x32xf32>
    %c3_231 = arith.constant 3 : index
    %c0_232 = arith.constant 0 : index
    %c0_233 = arith.constant 0 : index
    %351 = vector.load %arg17[%c3_231, %c0_232, %c0_233] : memref<4x32x8xf32, #tpu.memory_space<vmem>>, vector<1x32x8xf32>
    %352 = vector.shape_cast %351 : vector<1x32x8xf32> to vector<32x8xf32>
    %cst_234 = arith.constant dense<0.000000e+00> : vector<16x8xf32>
    %353 = tpu.matmul %228, %352, %cst_234 {dimension_numbers = #tpu.dot_dimension_numbers<[1], [0], [0], [1], [0, 0, 1, 1], [], []>} : vector<16x32xf32>, vector<32x8xf32>, vector<16x8xf32> -> vector<16x8xf32>
    %c3_235 = arith.constant 3 : index
    %c0_236 = arith.constant 0 : index
    %c0_237 = arith.constant 0 : index
    %354 = vector.load %arg20[%c3_235, %c0_236, %c0_237] : memref<4x1x8xf32, #tpu.memory_space<vmem>>, vector<1x1x8xf32>
    %355 = vector.shape_cast %354 : vector<1x1x8xf32> to vector<1x8xf32>
    %356 = vector.broadcast %355 : vector<1x8xf32> to vector<16x8xf32>
    %357 = arith.addf %353, %356 : vector<16x8xf32>
    %c3_238 = arith.constant 3 : index
    %c0_239 = arith.constant 0 : index
    %c0_240 = arith.constant 0 : index
    %358 = vector.load %arg18[%c3_238, %c0_239, %c0_240] : memref<4x32x8xf32, #tpu.memory_space<vmem>>, vector<1x32x8xf32>
    %359 = vector.shape_cast %358 : vector<1x32x8xf32> to vector<32x8xf32>
    %cst_241 = arith.constant dense<0.000000e+00> : vector<16x8xf32>
    %360 = tpu.matmul %228, %359, %cst_241 {dimension_numbers = #tpu.dot_dimension_numbers<[1], [0], [0], [1], [0, 0, 1, 1], [], []>} : vector<16x32xf32>, vector<32x8xf32>, vector<16x8xf32> -> vector<16x8xf32>
    %c3_242 = arith.constant 3 : index
    %c0_243 = arith.constant 0 : index
    %c0_244 = arith.constant 0 : index
    %361 = vector.load %arg21[%c3_242, %c0_243, %c0_244] : memref<4x1x8xf32, #tpu.memory_space<vmem>>, vector<1x1x8xf32>
    %362 = vector.shape_cast %361 : vector<1x1x8xf32> to vector<1x8xf32>
    %363 = vector.broadcast %362 : vector<1x8xf32> to vector<16x8xf32>
    %364 = arith.addf %360, %363 : vector<16x8xf32>
    %c3_245 = arith.constant 3 : index
    %c0_246 = arith.constant 0 : index
    %c0_247 = arith.constant 0 : index
    %365 = vector.load %arg19[%c3_245, %c0_246, %c0_247] : memref<4x32x8xf32, #tpu.memory_space<vmem>>, vector<1x32x8xf32>
    %366 = vector.shape_cast %365 : vector<1x32x8xf32> to vector<32x8xf32>
    %cst_248 = arith.constant dense<0.000000e+00> : vector<16x8xf32>
    %367 = tpu.matmul %228, %366, %cst_248 {dimension_numbers = #tpu.dot_dimension_numbers<[1], [0], [0], [1], [0, 0, 1, 1], [], []>} : vector<16x32xf32>, vector<32x8xf32>, vector<16x8xf32> -> vector<16x8xf32>
    %c3_249 = arith.constant 3 : index
    %c0_250 = arith.constant 0 : index
    %c0_251 = arith.constant 0 : index
    %368 = vector.load %arg22[%c3_249, %c0_250, %c0_251] : memref<4x1x8xf32, #tpu.memory_space<vmem>>, vector<1x1x8xf32>
    %369 = vector.shape_cast %368 : vector<1x1x8xf32> to vector<1x8xf32>
    %370 = vector.broadcast %369 : vector<1x8xf32> to vector<16x8xf32>
    %371 = arith.addf %367, %370 : vector<16x8xf32>
    %372 = vector.shape_cast %357 : vector<16x8xf32> to vector<2x8x8xf32>
    %373 = vector.shape_cast %364 : vector<16x8xf32> to vector<2x8x8xf32>
    %374 = vector.shape_cast %371 : vector<16x8xf32> to vector<2x8x8xf32>
    "tpu.trace_start"() <{level = 10 : i32, message = "bqd,bkd->bqk"}> : () -> ()
    %cst_252 = arith.constant dense<0.000000e+00> : vector<2x8x8xf32>
    %375 = tpu.matmul %372, %373, %cst_252 {dimension_numbers = #tpu.dot_dimension_numbers<[2], [2], [1], [1], [0, 0, 0, 1, 1, 1], [0], [0]>} : vector<2x8x8xf32>, vector<2x8x8xf32>, vector<2x8x8xf32> -> vector<2x8x8xf32>
    "tpu.trace_stop"() : () -> ()
    %cst_253 = arith.constant dense<0xFF800000> : vector<2x8xf32>
    %376 = vector.multi_reduction <maximumf>, %375, %cst_253 [2] : vector<2x8x8xf32> to vector<2x8xf32>
    %377 = vector.shape_cast %376 : vector<2x8xf32> to vector<2x8x1xf32>
    %378 = vector.broadcast %377 : vector<2x8x1xf32> to vector<2x8x8xf32>
    %379 = arith.subf %375, %378 : vector<2x8x8xf32>
    %380 = math.exp %379 : vector<2x8x8xf32>
    %cst_254 = arith.constant dense<0.000000e+00> : vector<2x8xf32>
    %381 = vector.multi_reduction <add>, %380, %cst_254 [2] : vector<2x8x8xf32> to vector<2x8xf32>
    %382 = vector.shape_cast %381 : vector<2x8xf32> to vector<2x8x1xf32>
    %383 = tpu.reciprocal %382 {approx = true} : vector<2x8x1xf32> -> vector<2x8x1xf32>
    %384 = vector.broadcast %383 : vector<2x8x1xf32> to vector<2x8x8xf32>
    %385 = arith.mulf %380, %384 : vector<2x8x8xf32>
    "tpu.trace_start"() <{level = 10 : i32, message = "bqk,bkd->bqd"}> : () -> ()
    %cst_255 = arith.constant dense<0.000000e+00> : vector<2x8x8xf32>
    %386 = tpu.matmul %385, %374, %cst_255 {dimension_numbers = #tpu.dot_dimension_numbers<[2], [1], [1], [2], [0, 0, 0, 1, 1, 2], [0], [0]>} : vector<2x8x8xf32>, vector<2x8x8xf32>, vector<2x8x8xf32> -> vector<2x8x8xf32>
    "tpu.trace_stop"() : () -> ()
    %387 = vector.shape_cast %386 : vector<2x8x8xf32> to vector<16x8xf32>
    %c3_256 = arith.constant 3 : index
    %c0_257 = arith.constant 0 : index
    %c0_258 = arith.constant 0 : index
    %388 = vector.load %arg23[%c3_256, %c0_257, %c0_258] : memref<4x8x32xf32, #tpu.memory_space<vmem>>, vector<1x8x32xf32>
    %389 = vector.shape_cast %388 : vector<1x8x32xf32> to vector<8x32xf32>
    %cst_259 = arith.constant dense<0.000000e+00> : vector<16x32xf32>
    %390 = tpu.matmul %387, %389, %cst_259 {dimension_numbers = #tpu.dot_dimension_numbers<[1], [0], [0], [1], [0, 0, 1, 1], [], []>} : vector<16x8xf32>, vector<8x32xf32>, vector<16x32xf32> -> vector<16x32xf32>
    %391 = arith.addf %350, %390 : vector<16x32xf32>
    %c0_260 = arith.constant 0 : index
    %c0_261 = arith.constant 0 : index
    %392 = vector.load %arg24[%c0_260, %c0_261] : memref<1x32xf32, #tpu.memory_space<vmem>>, vector<1x32xf32>
    %393 = vector.broadcast %392 : vector<1x32xf32> to vector<16x32xf32>
    %394 = arith.addf %391, %393 : vector<16x32xf32>
    %395 = arith.addf %228, %394 : vector<16x32xf32>
    %c0_262 = arith.constant 0 : index
    %c0_263 = arith.constant 0 : index
    %396 = vector.load %arg25[%c0_262, %c0_263] : memref<1x32xf32, #tpu.memory_space<vmem>>, vector<1x32xf32>
    %c0_264 = arith.constant 0 : index
    %c0_265 = arith.constant 0 : index
    %397 = vector.load %arg26[%c0_264, %c0_265] : memref<1x32xf32, #tpu.memory_space<vmem>>, vector<1x32xf32>
    %cst_266 = arith.constant dense<0.000000e+00> : vector<16xf32>
    %398 = vector.multi_reduction <add>, %395, %cst_266 [1] : vector<16x32xf32> to vector<16xf32>
    %399 = vector.shape_cast %398 : vector<16xf32> to vector<16x1xf32>
    %cst_267 = arith.constant 3.200000e+01 : f32
    %400 = vector.broadcast %cst_267 : f32 to vector<16x1xf32>
    %401 = arith.divf %399, %400 : vector<16x1xf32>
    %402 = vector.broadcast %401 : vector<16x1xf32> to vector<16x32xf32>
    %403 = arith.subf %395, %402 : vector<16x32xf32>
    %404 = arith.mulf %403, %403 : vector<16x32xf32>
    %cst_268 = arith.constant dense<0.000000e+00> : vector<16xf32>
    %405 = vector.multi_reduction <add>, %404, %cst_268 [1] : vector<16x32xf32> to vector<16xf32>
    %406 = vector.shape_cast %405 : vector<16xf32> to vector<16x1xf32>
    %cst_269 = arith.constant 3.200000e+01 : f32
    %407 = vector.broadcast %cst_269 : f32 to vector<16x1xf32>
    %408 = arith.divf %406, %407 : vector<16x1xf32>
    %409 = vector.broadcast %401 : vector<16x1xf32> to vector<16x32xf32>
    %410 = arith.subf %395, %409 : vector<16x32xf32>
    %cst_270 = arith.constant 9.99999974E-6 : f32
    %411 = vector.broadcast %cst_270 : f32 to vector<16x1xf32>
    %412 = arith.addf %408, %411 : vector<16x1xf32>
    %413 = math.rsqrt %412 : vector<16x1xf32>
    %414 = vector.broadcast %413 : vector<16x1xf32> to vector<16x32xf32>
    %415 = arith.mulf %410, %414 : vector<16x32xf32>
    %416 = vector.broadcast %396 : vector<1x32xf32> to vector<16x32xf32>
    %417 = arith.mulf %415, %416 : vector<16x32xf32>
    %418 = vector.broadcast %397 : vector<1x32xf32> to vector<16x32xf32>
    %419 = arith.addf %417, %418 : vector<16x32xf32>
    %c0_271 = arith.constant 0 : index
    %c0_272 = arith.constant 0 : index
    %420 = vector.load %arg27[%c0_271, %c0_272] : memref<32x64xf32, #tpu.memory_space<vmem>>, vector<32x64xf32>
    %cst_273 = arith.constant dense<0.000000e+00> : vector<16x64xf32>
    %421 = tpu.matmul %419, %420, %cst_273 {dimension_numbers = #tpu.dot_dimension_numbers<[1], [0], [0], [1], [0, 0, 1, 1], [], []>} : vector<16x32xf32>, vector<32x64xf32>, vector<16x64xf32> -> vector<16x64xf32>
    %c0_274 = arith.constant 0 : index
    %c0_275 = arith.constant 0 : index
    %422 = vector.load %arg28[%c0_274, %c0_275] : memref<1x64xf32, #tpu.memory_space<vmem>>, vector<1x64xf32>
    %423 = vector.broadcast %422 : vector<1x64xf32> to vector<16x64xf32>
    %424 = arith.addf %421, %423 : vector<16x64xf32>
    %cst_276 = arith.constant 0.000000e+00 : f32
    %425 = vector.broadcast %cst_276 : f32 to vector<16x64xf32>
    %426 = arith.maximumf %424, %425 : vector<16x64xf32>
    %c0_277 = arith.constant 0 : index
    %c0_278 = arith.constant 0 : index
    %427 = vector.load %arg29[%c0_277, %c0_278] : memref<64x32xf32, #tpu.memory_space<vmem>>, vector<64x32xf32>
    %cst_279 = arith.constant dense<0.000000e+00> : vector<16x32xf32>
    %428 = tpu.matmul %426, %427, %cst_279 {dimension_numbers = #tpu.dot_dimension_numbers<[1], [0], [0], [1], [0, 0, 1, 1], [], []>} : vector<16x64xf32>, vector<64x32xf32>, vector<16x32xf32> -> vector<16x32xf32>
    %c0_280 = arith.constant 0 : index
    %c0_281 = arith.constant 0 : index
    %429 = vector.load %arg30[%c0_280, %c0_281] : memref<1x32xf32, #tpu.memory_space<vmem>>, vector<1x32xf32>
    %430 = vector.broadcast %429 : vector<1x32xf32> to vector<16x32xf32>
    %431 = arith.addf %428, %430 : vector<16x32xf32>
    %432 = arith.addf %419, %431 : vector<16x32xf32>
    %c0_282 = arith.constant 0 : index
    %c0_283 = arith.constant 0 : index
    %433 = vector.load %arg31[%c0_282, %c0_283] : memref<1x32xf32, #tpu.memory_space<vmem>>, vector<1x32xf32>
    %c0_284 = arith.constant 0 : index
    %c0_285 = arith.constant 0 : index
    %434 = vector.load %arg32[%c0_284, %c0_285] : memref<1x32xf32, #tpu.memory_space<vmem>>, vector<1x32xf32>
    %cst_286 = arith.constant dense<0.000000e+00> : vector<16xf32>
    %435 = vector.multi_reduction <add>, %432, %cst_286 [1] : vector<16x32xf32> to vector<16xf32>
    %436 = vector.shape_cast %435 : vector<16xf32> to vector<16x1xf32>
    %cst_287 = arith.constant 3.200000e+01 : f32
    %437 = vector.broadcast %cst_287 : f32 to vector<16x1xf32>
    %438 = arith.divf %436, %437 : vector<16x1xf32>
    %439 = vector.broadcast %438 : vector<16x1xf32> to vector<16x32xf32>
    %440 = arith.subf %432, %439 : vector<16x32xf32>
    %441 = arith.mulf %440, %440 : vector<16x32xf32>
    %cst_288 = arith.constant dense<0.000000e+00> : vector<16xf32>
    %442 = vector.multi_reduction <add>, %441, %cst_288 [1] : vector<16x32xf32> to vector<16xf32>
    %443 = vector.shape_cast %442 : vector<16xf32> to vector<16x1xf32>
    %cst_289 = arith.constant 3.200000e+01 : f32
    %444 = vector.broadcast %cst_289 : f32 to vector<16x1xf32>
    %445 = arith.divf %443, %444 : vector<16x1xf32>
    %446 = vector.broadcast %438 : vector<16x1xf32> to vector<16x32xf32>
    %447 = arith.subf %432, %446 : vector<16x32xf32>
    %cst_290 = arith.constant 9.99999974E-6 : f32
    %448 = vector.broadcast %cst_290 : f32 to vector<16x1xf32>
    %449 = arith.addf %445, %448 : vector<16x1xf32>
    %450 = math.rsqrt %449 : vector<16x1xf32>
    %451 = vector.broadcast %450 : vector<16x1xf32> to vector<16x32xf32>
    %452 = arith.mulf %447, %451 : vector<16x32xf32>
    %453 = vector.broadcast %433 : vector<1x32xf32> to vector<16x32xf32>
    %454 = arith.mulf %452, %453 : vector<16x32xf32>
    %455 = vector.broadcast %434 : vector<1x32xf32> to vector<16x32xf32>
    %456 = arith.addf %454, %455 : vector<16x32xf32>
    %457 = vector.shape_cast %456 : vector<16x32xf32> to vector<2x8x32xf32>
    %458 = vector.extract_strided_slice %457 {offsets = [0, 0, 0], sizes = [2, 1, 32], strides = [1, 1, 1]} : vector<2x8x32xf32> to vector<2x1x32xf32>
    %459 = vector.shape_cast %458 : vector<2x1x32xf32> to vector<2x32xf32>
    %c0_291 = arith.constant 0 : index
    %c0_292 = arith.constant 0 : index
    %460 = vector.load %arg33[%c0_291, %c0_292] : memref<32x1xf32, #tpu.memory_space<vmem>>, vector<32x1xf32>
    %cst_293 = arith.constant dense<0.000000e+00> : vector<2x1xf32>
    %461 = tpu.matmul %459, %460, %cst_293 {dimension_numbers = #tpu.dot_dimension_numbers<[1], [0], [0], [1], [0, 0, 1, 1], [], []>} : vector<2x32xf32>, vector<32x1xf32>, vector<2x1xf32> -> vector<2x1xf32>
    %c0_294 = arith.constant 0 : index
    %c0_295 = arith.constant 0 : index
    %462 = vector.load %arg34[%c0_294, %c0_295] : memref<1x1xf32, #tpu.memory_space<vmem>>, vector<1x1xf32>
    %463 = vector.broadcast %462 : vector<1x1xf32> to vector<2x1xf32>
    %464 = arith.addf %461, %463 : vector<2x1xf32>
    %c0_296 = arith.constant 0 : index
    %c0_297 = arith.constant 0 : index
    %465 = vector.load %arg35[%c0_296, %c0_297] : memref<2x1xf32, #tpu.memory_space<vmem>>, vector<2x1xf32>
    tpu.vector_store %arg35[%c0_296, %c0_297], %464 {strides = array<i32>} : memref<2x1xf32, #tpu.memory_space<vmem>>, vector<2x1xf32>,
    return
  }
}

</mosaic_0001>

<bundles_post_ra>
// kernel: tpu_custom_call.1
= control target key start
LH: loop header
LB: loop body
LE: loop exit
PB: predicated region body
PF: predicated region fallthrough
CT: control target
= control target key end

     0   :  { %s7384_s3 = smov 2   ;;  %s7385_s7 = smov 1   ;;  %vm161_vm0 = vcmask 261120   ;;  %v7386_v10 = vmov 0.0   ;;  %vm7387_vm1 = vmmov 0   ;;  %vm415_vm2 = vcmask 64512   ;;  %s8089_s0 = inlined_call_operand.smem [shape: u32[36], index: -1, kind: input, shape index: {}] }
   0x1   :  { %s7429_s6 = sld [smem:[%s8089_s0 + %s7384_s3]]   ;;  %s7388_s14 = smov 5   ;;  %vm2988_vm3 = vcmask 523264   ;;  %vm6092_vm4 = vcmask 1041409   ;;  %vm6166_vm5 = vcmask 1024  }
   0x2   :  { %s7434_s10 = sld [smem:[%s8089_s0 + %s7385_s7]]   ;;  %s7389_s18 = smov 4  }
   0x3   :  { %s1_s13 = sld [smem:[%s8089_s0]]   ;;  %s7390_s22 = smov 3  }
   0x4   :  { %s7467_s17 = sld [smem:[%s8089_s0 + %s7388_s14]]   ;;  %s7391_s26 = smov 6  }
   0x5   :  { %s7472_s21 = sld [smem:[%s8089_s0 + %s7389_s18]]   ;;  %s7392_s30 = smov 7  }
   0x6   :  { %s7489_s25 = sld [smem:[%s8089_s0 + %s7390_s22]]   ;;  %s7393_s4 = smov 8  }
   0x7   :  { %v246_v0 = vld [vmem:[%s7429_s6 + $0x18] sm:$0xff]  ;;  %v245_v1 = vld [vmem:[%s7429_s6 + $0x10] sm:$0xff]  ;;  %v244_v4 = vld [vmem:[%s7429_s6 + $0x8] sm:$0xff]  ;;  %s7507_s29 = sld [smem:[%s8089_s0 + %s7391_s26]]   ;;  %s7394_s8 = smov 11  }
   0x8   :  { %6743 = vmatprep.subr.mxu1 %v246_v0  ;;  %v153_v2 = vld [vmem:[%s7434_s10 + $0x18] sm:$0xff]  ;;  %v152_v3 = vld [vmem:[%s7434_s10 + $0x10] sm:$0xff]  ;;  %v151_v5 = vld [vmem:[%s7434_s10 + $0x8] sm:$0xff]  ;;  %s7566_s3 = sld [smem:[%s8089_s0 + %s7392_s30]]   ;;  %s7395_s12 = smov 13  }
   0x9   :  { %6732 = vmatprep.subr.mxu0 %v153_v2  ;;  %6744 = vmatpush3.msra.mxu1 %v246_v0  ;;  %v243_v6 = vld [vmem:[%s7429_s6] sm:$0xff]  ;;  %v7449_v9 = vld [vmem:[%s1_s13 + $0x8] sm:$0xff]  ;;  %v6233_v46 = vld [vmem:[%s7429_s6 + $0x38] sm:$0xff]  ;;  %s6179_s7 = sld [smem:[%s8089_s0 + %s7393_s4]]   ;;  %s7396_s16 = smov 9  }
   0xa   :  { %6733 = vmatpush3.msra.mxu0 %v153_v2  ;;  %6745 = vmatprep.subr.mxu1 %v245_v1  ;;  %v150_v7 = vld [vmem:[%s7434_s10] sm:$0xff]  ;;  %v6225_v47 = vld [vmem:[%s7434_s10 + $0x38] sm:$0xff]  ;;  %v6232_v52 = vld [vmem:[%s7429_s6 + $0x30] sm:$0xff]  ;;  %s6182_s11 = sld [smem:[%s8089_s0 + %s7394_s8]]   ;;  %s7397_s20 = smov 10  }
   0xb   :  { %6734 = vmatprep.subr.mxu0 %v152_v3  ;;  %6746 = vmatpush3.msra.mxu1 %v245_v1  ;;  %v7447_v8 = vld [vmem:[%s1_s13] sm:$0xff]  ;;  %v6231_v54 = vld [vmem:[%s7429_s6 + $0x28] sm:$0xff]  ;;  %v6224_v56 = vld [vmem:[%s7434_s10 + $0x30] sm:$0xff]  ;;  %s7715_s15 = sld [smem:[%s8089_s0 + %s7395_s12]]   ;;  %s7398_s24 = smov 12  }
   0xc   :  { %6735 = vmatpush3.msra.mxu0 %v152_v3  ;;  %6747 = vmatprep.subr.mxu1 %v244_v4  ;;  %v6210_v13 = vld [vmem:[%s7467_s17] ss:$0 sm:$0xff]  ;;  %v332_v21 = vld [vmem:[%s7489_s25 + $0x18] sm:$0xff]  ;;  %v331_v22 = vld [vmem:[%s7489_s25 + $0x10] sm:$0xff]  ;;  %s6180_s19 = sld [smem:[%s8089_s0 + %s7396_s16]]   ;;  %s7399_s28 = smov 14  }
   0xd   :  { %6736 = vmatprep.subr.mxu0 %v151_v5  ;;  %6748 = vmatpush3.msra.mxu1 %v244_v4  ;;  %v6207_v15 = vld [vmem:[%s7472_s21] ss:$0 sm:$0xff]  ;;  %v330_v23 = vld [vmem:[%s7489_s25 + $0x8] sm:$0xff]  ;;  %v6235_v1 = vld [vmem:[%s7467_s17 + $0x1] ss:$0 sm:$0xff]  ;;  %s6181_s23 = sld [smem:[%s8089_s0 + %s7397_s20]]   ;;  %s7400_s2 = smov 17  }
   0xe   :  { %6737 = vmatpush3.msra.mxu0 %v151_v5  ;;  %6749 = vmatprep.subr.mxu1 %v243_v6  ;;  %v329_v24 = vld [vmem:[%s7489_s25] sm:$0xff]  ;;  %v6223_v58 = vld [vmem:[%s7434_s10 + $0x28] sm:$0xff]  ;;  %s6183_s27 = sld [smem:[%s8089_s0 + %s7398_s24]]   ;;  %s7403_s14 = smov 15  }
   0xf   :  { %6738 = vmatprep.subr.mxu0 %v150_v7  ;;  %6750 = vmatpush3.msra.mxu1 %v243_v6  ;;  %v6213_v43 = vld [vmem:[%s7507_s29] ss:$0 sm:$0xff]  ;;  %v6227_v5 = vld [vmem:[%s7472_s21 + $0x1] ss:$0 sm:$0xff]  ;;  %s6185_s1 = sld [smem:[%s8089_s0 + %s7399_s28]]   ;;  %s7404_s18 = smov 16  }
  0x10   :  { %6751 = vmatprep.mubr.msk.f32.mxu1 %vm161_vm0, %v7447_v8  ;;  %6739 = vmatpush3.msra.mxu0 %v150_v7  ;;  %v6230_v57 = vld [vmem:[%s7429_s6 + $0x20] sm:$0xff]  ;;  %s7748_s5 = sld [smem:[%s8089_s0 + %s7400_s2]]   ;;  %s7405_s22 = smov 21  }
  0x11   :  { %6740 = vmatprep.mubr.msk.f32.mxu0 %vm161_vm0, %v7447_v8  ;;  %6752 = vmatmul.mubr.msk.f32.vlgmr.msra.gmra.mxu1 %vm161_vm0, %v7449_v9  ;;  %v6222_v59 = vld [vmem:[%s7434_s10 + $0x20] sm:$0xff]  ;;  %s7406_s26 = smov 20   ;;  %s7407_s30 = smov 22  }
  0x12   :  { %6741 = vmatmul.mubr.msk.f32.vlgmr.msra.gmra.mxu0 %vm161_vm0, %v7449_v9  ;;  %6765 = vmatprep.subr.mxu1 %v7386_v10  ;;  %s7408_s4 = smov 23   ;;  %s7410_s12 = smov 27  }
  0x13   :  { %6762 = vmatprep.mubr.msk.f32.mxu0 %vm161_vm0, %v7447_v8  ;;  %6767 = vmatprep.mubr.msk.f32.mxu1 %vm7387_vm1, %v7386_v10  ;;  %s7888_s8 = sld [smem:[%s8089_s0 + %s7408_s4]]   ;;  %s7411_s16 = smov 29  }
  0x14   :  { %6754 = vmatprep.subr.mxu0 %v332_v21  ;;  %s7412_s20 = smov 25   ;;  %s7413_s24 = smov 26  }
  0x15   :  { %6755 = vmatpush3.msra.mxu0 %v332_v21  ;;  %s7414_s28 = smov 28   ;;  %s7415_s2 = smov 30  }
  0x16   :  { %6756 = vmatprep.subr.mxu0 %v331_v22 }
  0x17   :  { %6757 = vmatpush3.msra.mxu0 %v331_v22 }
  0x18   :  { %6758 = vmatprep.subr.mxu0 %v330_v23 }
  0x19   :  { %6759 = vmatpush3.msra.mxu0 %v330_v23 }
  0x1a   :  { %6760 = vmatprep.subr.mxu0 %v329_v24 }
  0x1b   :  { %6761 = vmatpush3.msra.mxu0 %v329_v24 }
  0x1c   :  { %6763 = vmatmul.mubr.msk.f32.vlgmr.msra.gmra.mxu0 %vm161_vm0, %v7449_v9  ;;  %6775 = vmatprep.subr.mxu0 %v7386_v10 }
  0x1d   :  { %6777 = vmatprep.mubr.msk.f32.mxu0 %vm7387_vm1, %v7386_v10 }
  0xd1   :  { %v6753_v11 = vpop.f32.mrf.mxu1 }
  0xd2   :  { %v6742_v12 = vpop.f32.mrf.mxu0  ;;  %v326_v19 = vadd.f32 %v6753_v11, %v6210_v13 }
  0xd3   :  { %v320_v14 = vpop.f32.mrf.mxu1  ;;  %v240_v20 = vadd.f32 %v6742_v12, %v6207_v15 }
  0xd4   :  { %v321_v16 = vadd.f32 %v6210_v13, %v320_v14  ;;  %v234_v17 = vpop.f32.mrf.mxu0  ;;  %v6241_v13 = vld [vmem:[%s7489_s25 + $0x38] sm:$0xff]  ;;  %v6240_v14 = vld [vmem:[%s7489_s25 + $0x30] sm:$0xff] }
  0xd5   :  { %v235_v18 = vadd.f32 %v6207_v15, %v234_v17  ;;  %v6239_v15 = vld [vmem:[%s7489_s25 + $0x28] sm:$0xff] }
  0xd6   :  { %6766 = vmatpush3.xpose.msk.msra.mxu1 %vm415_vm2, %v321_v16  ;;  %v6238_v16 = vld [vmem:[%s7489_s25 + $0x20] sm:$0xff] }
  0xd7   :  { %6770 = vmatprep.subr.mxu1 %v7386_v10 }
  0xd9   :  { %6768 = vmatmul.mubr.msk.f32.vlgmr.msra.gmra.mxu1 %vm415_vm2, %v235_v18 }
  0xda   :  { %6771 = vmatpush3.xpose.msk.msra.mxu1 %vm415_vm2, %v326_v19  ;;  %6772 = vmatprep.mubr.msk.f32.mxu1 %vm7387_vm1, %v7386_v10 }
  0xdb   :  { %6780 = vmatprep.subr.mxu1 %v7386_v10 }
  0xdc   :  { %v6764_v41 = vpop.f32.mrf.mxu0 }
  0xdd   :  { %6773 = vmatmul.mubr.msk.f32.vlgmr.msra.gmra.mxu1 %vm415_vm2, %v240_v20  ;;  %v412_v44 = vadd.f32 %v6764_v41, %v6213_v43 }
  0xde   :  { %6782 = vmatprep.mubr.msk.f32.mxu1 %vm7387_vm1, %v7386_v10  ;;  %v406_v42 = vpop.f32.mrf.mxu0 }
  0xdf   :  { %v407_v45 = vadd.f32 %v6213_v43, %v406_v42  ;;  %6781 = vmatpush3.msra.mxu1 %v412_v44 }
  0xe0   :  { %6796 = vmatprep.subr.mxu1 %v6233_v46 }
  0xe1   :  { %6776 = vmatpush3.msra.mxu0 %v407_v45  ;;  %v6268_v45 = vld [vmem:[%s7429_s6 + $0x58] sm:$0xff] }
  0xe2   :  { %6785 = vmatprep.subr.mxu0 %v6225_v47 }
 0x199   :  { %v488_v25 = vpop.f32.mrf.mxu1 }
 0x19a   :  { %v568_v30 = vsel %vm415_vm2, %v488_v25, -inf }
 0x19b   :  { %v6769_v26 = vpop.f32.mrf.mxu1 }
 0x19d   :  { %v564_v27 = vpop.f32.mrf.mxu1 }
 0x19e   :  { %v571_v28 = vsel %vm415_vm2, %v564_v27, -inf }
 0x19f   :  { %572 = vmax.xlane.f32.xlu0 %v571_v28  ;;  %v6774_v29 = vpop.f32.mrf.mxu1 }
 0x1a3   :  { %569 = vmax.xlane.f32.xlu0 %v568_v30 }
 0x228   :  { %v573_v31 = vpop.xlane.xlu0 %572 }
 0x229   :  { %v575_v32 = vsub.f32 %v564_v27, %v573_v31 }
 0x22b   :  { %v578_v33 = vmul.f32 1.442695, %v575_v32 }
 0x22c   :  { %v570_v34 = vpop.xlane.xlu0 %569 }
 0x22d   :  { %7304 = vpow2.f32 %v578_v33  ;;  %v574_v35 = vsub.f32 %v488_v25, %v570_v34  ;;  %v6243_v34 = vld [vmem:[%s7507_s29 + $0x1] ss:$0 sm:$0xff] }
 0x22f   :  { %v576_v36 = vmul.f32 1.442695, %v574_v35 }
 0x231   :  { %7306 = vpow2.f32 %v576_v36 }
 0x23a   :  { %v7305_v37 = vpop.eup %7304 }
 0x23b   :  { %v583_v38 = vsel %vm415_vm2, %v7305_v37, 0.0 }
 0x23c   :  { %584 = vadd.xlane.f32.xlu1 %v583_v38  ;;  %v736_v38 = vld [vmem:[%s7566_s3] sm:$0xff] }
 0x23e   :  { %v7307_v39 = vpop.eup %7306 }
 0x23f   :  { %v580_v40 = vsel %vm415_vm2, %v7307_v39, 0.0 }
 0x240   :  { %581 = vadd.xlane.f32.xlu1 %v580_v40 }
 0x2c5   :  { %v585_v48 = vpop.xlane.xlu1 %584 }
 0x2c6   :  { %7308 = vrcp.f32 %v585_v48  ;;  %v6266_v48 = vld [vmem:[%s7429_s6 + $0x48] sm:$0xff] }
 0x2c9   :  { %v582_v49 = vpop.xlane.xlu1 %581 }
 0x2ca   :  { %7310 = vrcp.f32 %v582_v49  ;;  %v6260_v49 = vld [vmem:[%s7434_s10 + $0x58] sm:$0xff] }
 0x2d3   :  { %v7309_v50 = vpop.eup %7308 }
 0x2d4   :  { %v589_v51 = vmul.f32 %v7309_v50, %v7305_v37  ;;  %v6265_v50 = vld [vmem:[%s7429_s6 + $0x40] sm:$0xff] }
 0x2d6   :  { %6783 = vmatmul.mubr.msk.f32.vlgmr.msra.gmra.mxu1 %vm415_vm2, %v589_v51 }
 0x2d7   :  { %v7311_v53 = vpop.eup %7310  ;;  %6797 = vmatpush3.msra.mxu1 %v6233_v46  ;;  %6804 = vmatprep.mubr.msk.f32.mxu1 %vm161_vm0, %v7447_v8  ;;  %v6252_v46 = vld [vmem:[%s7566_s3 + $0x8] sm:$0xff] }
 0x2d8   :  { %6798 = vmatprep.subr.mxu1 %v6232_v52  ;;  %v588_v55 = vmul.f32 %v7311_v53, %v7307_v39 }
 0x2d9   :  { %6799 = vmatpush3.msra.mxu1 %v6232_v52 }
 0x2da   :  { %6800 = vmatprep.subr.mxu1 %v6231_v54  ;;  %6778 = vmatmul.mubr.msk.f32.vlgmr.msra.gmra.mxu0 %vm415_vm2, %v588_v55 }
 0x2db   :  { %6786 = vmatpush3.msra.mxu0 %v6225_v47  ;;  %6801 = vmatpush3.msra.mxu1 %v6231_v54  ;;  %v6267_v47 = vld [vmem:[%s7429_s6 + $0x50] sm:$0xff] }
 0x2dc   :  { %6787 = vmatprep.subr.mxu0 %v6224_v56  ;;  %6802 = vmatprep.subr.mxu1 %v6230_v57  ;;  %v6259_v54 = vld [vmem:[%s7434_s10 + $0x50] sm:$0xff] }
 0x2dd   :  { %6788 = vmatpush3.msra.mxu0 %v6224_v56  ;;  %6803 = vmatpush3.msra.mxu1 %v6230_v57  ;;  %v6258_v56 = vld [vmem:[%s7434_s10 + $0x48] sm:$0xff]  ;;  %v6257_v57 = vld [vmem:[%s7434_s10 + $0x40] sm:$0xff] }
 0x2de   :  { %6789 = vmatprep.subr.mxu0 %v6223_v58  ;;  %6805 = vmatmul.mubr.msk.f32.vlgmr.msra.gmra.mxu1 %vm161_vm0, %v7449_v9 }
 0x2df   :  { %6790 = vmatpush3.msra.mxu0 %v6223_v58  ;;  %6793 = vmatprep.mubr.msk.f32.mxu0 %vm161_vm0, %v7447_v8 }
 0x2e0   :  { %6791 = vmatprep.subr.mxu0 %v6222_v59  ;;  %6818 = vmatprep.subr.mxu1 %v7386_v10 }
 0x2e1   :  { %6792 = vmatpush3.msra.mxu0 %v6222_v59  ;;  %6820 = vmatprep.mubr.msk.f32.mxu1 %vm7387_vm1, %v7386_v10 }
 0x2e2   :  { %6794 = vmatmul.mubr.msk.f32.vlgmr.msra.gmra.mxu0 %vm161_vm0, %v7449_v9  ;;  %6807 = vmatprep.subr.mxu0 %v6241_v13 }
 0x2e3   :  { %6815 = vmatprep.mubr.msk.f32.mxu0 %vm161_vm0, %v7447_v8  ;;  %6808 = vmatpush3.msra.mxu0 %v6241_v13  ;;  %v6274_v13 = vld [vmem:[%s7489_s25 + $0x48] sm:$0xff] }
 0x2e4   :  { %6809 = vmatprep.subr.mxu0 %v6240_v14 }
 0x2e5   :  { %6810 = vmatpush3.msra.mxu0 %v6240_v14  ;;  %v6273_v14 = vld [vmem:[%s7489_s25 + $0x40] sm:$0xff] }
 0x2e6   :  { %6811 = vmatprep.subr.mxu0 %v6239_v15 }
 0x2e7   :  { %6812 = vmatpush3.msra.mxu0 %v6239_v15 }
 0x2e8   :  { %6813 = vmatprep.subr.mxu0 %v6238_v16 }
 0x2e9   :  { %6814 = vmatpush3.msra.mxu0 %v6238_v16 }
 0x2ea   :  { %6816 = vmatmul.mubr.msk.f32.vlgmr.msra.gmra.mxu0 %vm161_vm0, %v7449_v9  ;;  %6828 = vmatprep.subr.mxu0 %v7386_v10 }
 0x2eb   :  { %6830 = vmatprep.mubr.msk.f32.mxu0 %vm7387_vm1, %v7386_v10 }
 0x396   :  { %v7533_v60 = vpop.f32.mrf.mxu1 }
 0x398   :  { %v6784_v61 = vpop.f32.mrf.mxu1 }
 0x399   :  { %v6270_v61 = vld [vmem:[%s7467_s17 + $0x2] ss:$0 sm:$0xff] }
 0x39a   :  { %v7535_v62 = vpop.f32.mrf.mxu0 }
 0x39c   :  { %v6779_v63 = vpop.f32.mrf.mxu0 }
 0x39e   :  { %v6806_v0 = vpop.f32.mrf.mxu1 }
 0x39f   :  { %v910_v11 = vadd.f32 %v6806_v0, %v6235_v1 }
 0x3a0   :  { %v904_v2 = vpop.f32.mrf.mxu1 }
 0x3a1   :  { %v905_v3 = vadd.f32 %v6235_v1, %v904_v2 }
 0x3a2   :  { %v6795_v4 = vpop.f32.mrf.mxu0 }
 0x3a3   :  { %6819 = vmatpush3.xpose.msk.msra.mxu1 %vm415_vm2, %v905_v3  ;;  %v822_v12 = vadd.f32 %v6795_v4, %v6227_v5  ;;  %v6262_v4 = vld [vmem:[%s7472_s21 + $0x2] ss:$0 sm:$0xff] }
 0x3a4   :  { %v816_v6 = vpop.f32.mrf.mxu0  ;;  %6823 = vmatprep.subr.mxu1 %v7386_v10 }
 0x3a5   :  { %v817_v7 = vadd.f32 %v6227_v5, %v816_v6 }
 0x3a7   :  { %6821 = vmatmul.mubr.msk.f32.vlgmr.msra.gmra.mxu1 %vm415_vm2, %v817_v7 }
 0x3a8   :  { %6824 = vmatpush3.xpose.msk.msra.mxu1 %vm415_vm2, %v910_v11  ;;  %6825 = vmatprep.mubr.msk.f32.mxu1 %vm7387_vm1, %v7386_v10  ;;  %v6276_v11 = vld [vmem:[%s7489_s25 + $0x58] sm:$0xff] }
 0x3a9   :  { %6833 = vmatprep.subr.mxu1 %v7386_v10 }
 0x3aa   :  { %v6817_v33 = vpop.f32.mrf.mxu0 }
 0x3ab   :  { %6826 = vmatmul.mubr.msk.f32.vlgmr.msra.gmra.mxu1 %vm415_vm2, %v822_v12  ;;  %v998_v35 = vadd.f32 %v6817_v33, %v6243_v34  ;;  %v6275_v12 = vld [vmem:[%s7489_s25 + $0x50] sm:$0xff] }
 0x3ac   :  { %6835 = vmatprep.mubr.msk.f32.mxu1 %vm7387_vm1, %v7386_v10  ;;  %v992_v36 = vpop.f32.mrf.mxu0 }
 0x3ad   :  { %v993_v37 = vadd.f32 %v6243_v34, %v992_v36  ;;  %6834 = vmatpush3.msra.mxu1 %v998_v35 }
 0x3ae   :  { %6843 = vmatprep.subr.mxu1 %v736_v38 }
 0x3af   :  { %6829 = vmatpush3.msra.mxu0 %v993_v37 }
 0x3b0   :  { %6838 = vmatprep.subr.mxu0 %v6252_v46 }
 0x467   :  { %v1073_v17 = vpop.f32.mrf.mxu1 }
 0x468   :  { %v1153_v18 = vsel %vm415_vm2, %v1073_v17, -inf }
 0x469   :  { %1154 = vmax.xlane.f32.xlu0 %v1153_v18  ;;  %v6822_v19 = vpop.f32.mrf.mxu1 }
 0x46b   :  { %v1149_v20 = vpop.f32.mrf.mxu1 }
 0x46c   :  { %v1156_v21 = vsel %vm415_vm2, %v1149_v20, -inf }
 0x46d   :  { %1157 = vmax.xlane.f32.xlu1 %v1156_v21  ;;  %v6827_v22 = vpop.f32.mrf.mxu1 }
 0x4f2   :  { %v1155_v23 = vpop.xlane.xlu0 %1154 }
 0x4f3   :  { %v1159_v24 = vsub.f32 %v1073_v17, %v1155_v23 }
 0x4f5   :  { %v1161_v25 = vmul.f32 1.442695, %v1159_v24 }
 0x4f6   :  { %v1158_v26 = vpop.xlane.xlu1 %1157 }
 0x4f7   :  { %7312 = vpow2.f32 %v1161_v25  ;;  %v1160_v27 = vsub.f32 %v1149_v20, %v1158_v26 }
 0x4f9   :  { %v1163_v28 = vmul.f32 1.442695, %v1160_v27 }
 0x4fb   :  { %7314 = vpow2.f32 %v1163_v28 }
 0x504   :  { %v7313_v29 = vpop.eup %7312 }
 0x505   :  { %v1165_v30 = vsel %vm415_vm2, %v7313_v29, 0.0 }
 0x506   :  { %1166 = vadd.xlane.f32.xlu0 %v1165_v30 }
 0x508   :  { %v7315_v31 = vpop.eup %7314 }
 0x509   :  { %v1168_v32 = vsel %vm415_vm2, %v7315_v31, 0.0 }
 0x50a   :  { %1169 = vadd.xlane.f32.xlu1 %v1168_v32  ;;  %v6278_v32 = vld [vmem:[%s7507_s29 + $0x2] ss:$0 sm:$0xff] }
 0x58f   :  { %v1167_v39 = vpop.xlane.xlu0 %1166 }
 0x590   :  { %7316 = vrcp.f32 %v1167_v39 }
 0x593   :  { %v1170_v40 = vpop.xlane.xlu1 %1169 }
 0x594   :  { %7318 = vrcp.f32 %v1170_v40 }
 0x59d   :  { %v7317_v41 = vpop.eup %7316 }
 0x59e   :  { %v1173_v42 = vmul.f32 %v7317_v41, %v7313_v29 }
 0x5a0   :  { %6831 = vmatmul.mubr.msk.f32.vlgmr.msra.gmra.mxu0 %vm415_vm2, %v1173_v42  ;;  %v6287_v42 = vld [vmem:[%s7566_s3 + $0x10] sm:$0xff] }
 0x5a1   :  { %v7319_v43 = vpop.eup %7318  ;;  %6839 = vmatpush3.msra.mxu0 %v6252_v46  ;;  %v6291_v46 = vld [vmem:[%s7434_s10 + $0x68] sm:$0xff] }
 0x5a2   :  { %v1174_v44 = vmul.f32 %v7319_v43, %v7315_v31  ;;  %6848 = vmatprep.subr.mxu0 %v6260_v49  ;;  %v6301_v43 = vld [vmem:[%s7429_s6 + $0x78] sm:$0xff] }
 0x5a4   :  { %6836 = vmatmul.mubr.msk.f32.vlgmr.msra.gmra.mxu1 %vm415_vm2, %v1174_v44  ;;  %v6293_v44 = vld [vmem:[%s7434_s10 + $0x78] sm:$0xff] }
 0x5a5   :  { %6845 = vmatprep.mubr.msk.f32.mxu1 %vm415_vm2, %v7535_v62  ;;  %6844 = vmatpush3.msra.mxu1 %v736_v38 }
 0x5a6   :  { %6859 = vmatprep.subr.mxu1 %v6268_v45 }
 0x5a8   :  { %6846 = vmatmul.mubr.msk.f32.vlgmr.msra.gmra.mxu1 %vm415_vm2, %v7533_v60 }
 0x5a9   :  { %6860 = vmatpush3.msra.mxu1 %v6268_v45  ;;  %6867 = vmatprep.mubr.msk.f32.mxu1 %vm161_vm0, %v7447_v8  ;;  %v6292_v45 = vld [vmem:[%s7434_s10 + $0x70] sm:$0xff] }
 0x5aa   :  { %6861 = vmatprep.subr.mxu1 %v6267_v47 }
 0x5ab   :  { %6862 = vmatpush3.msra.mxu1 %v6267_v47  ;;  %v6290_v47 = vld [vmem:[%s7434_s10 + $0x60] sm:$0xff]  ;;  %s7402_s10 = smov 18  }
 0x5ac   :  { %6863 = vmatprep.subr.mxu1 %v6266_v48  ;;  %s7761_s13 = sld [smem:[%s8089_s0 + %s7402_s10]]   ;;  %s7417_s10 = smov 34  }
 0x5ad   :  { %6864 = vmatpush3.msra.mxu1 %v6266_v48 }
 0x5ae   :  { %6865 = vmatprep.subr.mxu1 %v6265_v50 }
 0x5af   :  { %6866 = vmatpush3.msra.mxu1 %v6265_v50 }
 0x5b0   :  { %6868 = vmatmul.mubr.msk.f32.vlgmr.msra.gmra.mxu1 %vm161_vm0, %v7449_v9  ;;  %6881 = vmatprep.subr.mxu1 %v7386_v10 }
 0x5b1   :  { %6883 = vmatprep.mubr.msk.f32.mxu1 %vm7387_vm1, %v7386_v10 }
 0x660   :  { %v1244_v51 = vpop.f32.mrf.mxu0 }
 0x661   :  { %6840 = vmatprep.mubr.msk.f32.mxu0 %vm415_vm2, %v1244_v51  ;;  %v6300_v51 = vld [vmem:[%s7429_s6 + $0x70] sm:$0xff] }
 0x662   :  { %v6832_v52 = vpop.f32.mrf.mxu0 }
 0x664   :  { %v1317_v53 = vpop.f32.mrf.mxu1 }
 0x665   :  { %6841 = vmatmul.mubr.msk.f32.vlgmr.msra.gmra.mxu0 %vm415_vm2, %v1317_v53  ;;  %v6299_v53 = vld [vmem:[%s7429_s6 + $0x68] sm:$0xff] }
 0x666   :  { %6849 = vmatpush3.msra.mxu0 %v6260_v49  ;;  %v6837_v55 = vpop.f32.mrf.mxu1  ;;  %6856 = vmatprep.mubr.msk.f32.mxu0 %vm161_vm0, %v7447_v8 }
 0x667   :  { %6850 = vmatprep.subr.mxu0 %v6259_v54 }
 0x668   :  { %6851 = vmatpush3.msra.mxu0 %v6259_v54  ;;  %v7599_v58 = vpop.f32.mrf.mxu1  ;;  %v6298_v54 = vld [vmem:[%s7429_s6 + $0x60] sm:$0xff]  ;;  %s7401_s6 = smov 19  }
 0x669   :  { %6852 = vmatprep.subr.mxu0 %v6258_v56  ;;  %s7753_s9 = sld [smem:[%s8089_s0 + %s7401_s6]]  }
 0x66a   :  { %6853 = vmatpush3.msra.mxu0 %v6258_v56  ;;  %v7601_v59 = vpop.f32.mrf.mxu1  ;;  %s6201_s6 = sld [smem:[%s8089_s0 + %s7415_s2]]  }
 0x66b   :  { %6854 = vmatprep.subr.mxu0 %v6257_v57 }
 0x66c   :  { %6855 = vmatpush3.msra.mxu0 %v6257_v57 }
 0x66d   :  { %6857 = vmatmul.mubr.msk.f32.vlgmr.msra.gmra.mxu0 %vm161_vm0, %v7449_v9  ;;  %6870 = vmatprep.subr.mxu0 %v6276_v11 }
 0x66e   :  { %6878 = vmatprep.mubr.msk.f32.mxu0 %vm161_vm0, %v7447_v8  ;;  %6871 = vmatpush3.msra.mxu0 %v6276_v11  ;;  %v6308_v11 = vld [vmem:[%s7489_s25 + $0x70] sm:$0xff] }
 0x66f   :  { %6872 = vmatprep.subr.mxu0 %v6275_v12 }
 0x670   :  { %v6869_v60 = vpop.f32.mrf.mxu1  ;;  %6873 = vmatpush3.msra.mxu0 %v6275_v12  ;;  %v6307_v12 = vld [vmem:[%s7489_s25 + $0x68] sm:$0xff] }
 0x671   :  { %v1658_v62 = vadd.f32 %v6869_v60, %v6270_v61  ;;  %6874 = vmatprep.subr.mxu0 %v6274_v13 }
 0x672   :  { %v1652_v63 = vpop.f32.mrf.mxu1  ;;  %6875 = vmatpush3.msra.mxu0 %v6274_v13  ;;  %v6306_v13 = vld [vmem:[%s7489_s25 + $0x60] sm:$0xff] }
 0x673   :  { %v1653_v0 = vadd.f32 %v6270_v61, %v1652_v63  ;;  %6876 = vmatprep.subr.mxu0 %v6273_v14 }
 0x674   :  { %6877 = vmatpush3.msra.mxu0 %v6273_v14 }
 0x675   :  { %6882 = vmatpush3.xpose.msk.msra.mxu1 %vm415_vm2, %v1653_v0  ;;  %6879 = vmatmul.mubr.msk.f32.vlgmr.msra.gmra.mxu0 %vm161_vm0, %v7449_v9 }
 0x676   :  { %6886 = vmatprep.subr.mxu1 %v7386_v10  ;;  %6891 = vmatprep.subr.mxu0 %v7386_v10 }
 0x677   :  { %6893 = vmatprep.mubr.msk.f32.mxu0 %vm7387_vm1, %v7386_v10 }
 0x725   :  { %v7606_v1 = vpop.f32.mrf.mxu0 }
 0x726   :  { %v1482_v55 = vadd.f32 %v7599_v58, %v7606_v1 }
 0x727   :  { %v7608_v2 = vpop.f32.mrf.mxu0 }
 0x728   :  { %v1477_v57 = vadd.f32 %v7601_v59, %v7608_v2  ;;  %v6309_v2 = vld [vmem:[%s7489_s25 + $0x78] sm:$0xff]  ;;  %s7803_s25 = sld [smem:[%s8089_s0 + %s7405_s22]]   ;;  %s7420_s22 = smov 35  }
 0x72d   :  { %v6858_v3 = vpop.f32.mrf.mxu0 }
 0x72e   :  { %v1570_v7 = vadd.f32 %v6858_v3, %v6262_v4  ;;  %v6303_v3 = vld [vmem:[%s7467_s17 + $0x3] ss:$0 sm:$0xff]  ;;  %s6186_s17 = sld [smem:[%s8089_s0 + %s7403_s14]]   ;;  %s7418_s14 = smov 31  }
 0x72f   :  { %v1564_v5 = vpop.f32.mrf.mxu0 }
 0x730   :  { %v1565_v6 = vadd.f32 %v6262_v4, %v1564_v5  ;;  %v6295_v5 = vld [vmem:[%s7472_s21 + $0x3] ss:$0 sm:$0xff]  ;;  %s6187_s21 = sld [smem:[%s8089_s0 + %s7404_s18]]   ;;  %s7419_s18 = smov 32  }
 0x732   :  { %6884 = vmatmul.mubr.msk.f32.vlgmr.msra.gmra.mxu1 %vm415_vm2, %v1565_v6 }
 0x733   :  { %6887 = vmatpush3.xpose.msk.msra.mxu1 %vm415_vm2, %v1658_v62  ;;  %6888 = vmatprep.mubr.msk.f32.mxu1 %vm7387_vm1, %v7386_v10 }
 0x734   :  { %6896 = vmatprep.subr.mxu1 %v7386_v10 }
 0x735   :  { %v6880_v31 = vpop.f32.mrf.mxu0 }
 0x736   :  { %6889 = vmatmul.mubr.msk.f32.vlgmr.msra.gmra.mxu1 %vm415_vm2, %v1570_v7  ;;  %v1746_v33 = vadd.f32 %v6880_v31, %v6278_v32  ;;  %v6311_v31 = vld [vmem:[%s7507_s29 + $0x3] ss:$0 sm:$0xff]  ;;  %s7808_s29 = sld [smem:[%s8089_s0 + %s7406_s26]]  }
 0x737   :  { %6898 = vmatprep.mubr.msk.f32.mxu1 %vm7387_vm1, %v7386_v10  ;;  %v1740_v34 = vpop.f32.mrf.mxu0 }
 0x738   :  { %v1741_v35 = vadd.f32 %v6278_v32, %v1740_v34  ;;  %6897 = vmatpush3.msra.mxu1 %v1746_v33 }
 0x739   :  { %6906 = vmatprep.subr.mxu1 %v6293_v44 }
 0x73a   :  { %6892 = vmatpush3.msra.mxu0 %v1741_v35 }
 0x73b   :  { %6901 = vmatprep.subr.mxu0 %v6287_v42 }
 0x7f2   :  { %v1821_v15 = vpop.f32.mrf.mxu1 }
 0x7f3   :  { %v1901_v16 = vsel %vm415_vm2, %v1821_v15, -inf }
 0x7f4   :  { %1902 = vmax.xlane.f32.xlu0 %v1901_v16  ;;  %v6885_v17 = vpop.f32.mrf.mxu1 }
 0x7f6   :  { %v1897_v18 = vpop.f32.mrf.mxu1 }
 0x7f7   :  { %v1904_v19 = vsel %vm415_vm2, %v1897_v18, -inf }
 0x7f8   :  { %1905 = vmax.xlane.f32.xlu1 %v1904_v19  ;;  %v6890_v20 = vpop.f32.mrf.mxu1 }
 0x87d   :  { %v1903_v21 = vpop.xlane.xlu0 %1902 }
 0x87e   :  { %v1907_v22 = vsub.f32 %v1821_v15, %v1903_v21 }
 0x880   :  { %v1909_v23 = vmul.f32 1.442695, %v1907_v22 }
 0x881   :  { %v1906_v24 = vpop.xlane.xlu1 %1905 }
 0x882   :  { %7320 = vpow2.f32 %v1909_v23  ;;  %v1908_v25 = vsub.f32 %v1897_v18, %v1906_v24 }
 0x884   :  { %v1911_v26 = vmul.f32 1.442695, %v1908_v25 }
 0x886   :  { %7322 = vpow2.f32 %v1911_v26 }
 0x88f   :  { %v7321_v27 = vpop.eup %7320 }
 0x890   :  { %v1913_v28 = vsel %vm415_vm2, %v7321_v27, 0.0 }
 0x891   :  { %1914 = vadd.xlane.f32.xlu0 %v1913_v28 }
 0x893   :  { %v7323_v29 = vpop.eup %7322 }
 0x894   :  { %v1916_v30 = vsel %vm415_vm2, %v7323_v29, 0.0 }
 0x895   :  { %1917 = vadd.xlane.f32.xlu1 %v1916_v30 }
 0x91a   :  { %v1915_v36 = vpop.xlane.xlu0 %1914 }
 0x91b   :  { %7324 = vrcp.f32 %v1915_v36 }
 0x91e   :  { %v1918_v37 = vpop.xlane.xlu1 %1917 }
 0x91f   :  { %7326 = vrcp.f32 %v1918_v37 }
 0x928   :  { %v7325_v38 = vpop.eup %7324 }
 0x929   :  { %v1921_v39 = vmul.f32 %v7325_v38, %v7321_v27 }
 0x92b   :  { %6894 = vmatmul.mubr.msk.f32.vlgmr.msra.gmra.mxu0 %vm415_vm2, %v1921_v39 }
 0x92c   :  { %v7327_v40 = vpop.eup %7326  ;;  %6902 = vmatpush3.msra.mxu0 %v6287_v42 }
 0x92d   :  { %v1922_v41 = vmul.f32 %v7327_v40, %v7323_v29  ;;  %6917 = vmatprep.subr.mxu0 %v6301_v43 }
 0x92f   :  { %6899 = vmatmul.mubr.msk.f32.vlgmr.msra.gmra.mxu1 %vm415_vm2, %v1922_v41  ;;  %v6320_v41 = vld [vmem:[%s7566_s3 + $0x18] sm:$0xff]  ;;  %s7813_s3 = sld [smem:[%s8089_s0 + %s7407_s30]]  }
 0x930   :  { %6914 = vmatprep.mubr.msk.f32.mxu1 %vm161_vm0, %v7447_v8  ;;  %6907 = vmatpush3.msra.mxu1 %v6293_v44 }
 0x931   :  { %6908 = vmatprep.subr.mxu1 %v6292_v45 }
 0x932   :  { %6909 = vmatpush3.msra.mxu1 %v6292_v45 }
 0x933   :  { %6910 = vmatprep.subr.mxu1 %v6291_v46 }
 0x934   :  { %6911 = vmatpush3.msra.mxu1 %v6291_v46 }
 0x935   :  { %6912 = vmatprep.subr.mxu1 %v6290_v47 }
 0x936   :  { %6913 = vmatpush3.msra.mxu1 %v6290_v47  ;;  %v6323_v47 = vld [vmem:[%s6179_s7] ss:$0 sm:$0xff]  ;;  %s7416_s7 = smov 33  }
 0x937   :  { %6915 = vmatmul.mubr.msk.f32.vlgmr.msra.gmra.mxu1 %vm161_vm0, %v7449_v9  ;;  %6928 = vmatprep.subr.mxu1 %v6309_v2 }
 0x938   :  { %6936 = vmatprep.mubr.msk.f32.mxu1 %vm161_vm0, %v7447_v8  ;;  %6929 = vmatpush3.msra.mxu1 %v6309_v2  ;;  %v2978_v2 = vld [vmem:[%s7715_s15 + $0x28] sm:$0xff] }
 0x939   :  { %6930 = vmatprep.subr.mxu1 %v6308_v11 }
 0x93a   :  { %6931 = vmatpush3.msra.mxu1 %v6308_v11  ;;  %v2977_v11 = vld [vmem:[%s7715_s15 + $0x20] sm:$0xff] }
 0x93b   :  { %6932 = vmatprep.subr.mxu1 %v6307_v12 }
 0x93c   :  { %6933 = vmatpush3.msra.mxu1 %v6307_v12 }
 0x93d   :  { %6934 = vmatprep.subr.mxu1 %v6306_v13 }
 0x93e   :  { %6935 = vmatpush3.msra.mxu1 %v6306_v13 }
 0x93f   :  { %6937 = vmatmul.mubr.msk.f32.vlgmr.msra.gmra.mxu1 %vm161_vm0, %v7449_v9  ;;  %6949 = vmatprep.subr.mxu1 %v7386_v10 }
 0x940   :  { %6951 = vmatprep.mubr.msk.f32.mxu1 %vm7387_vm1, %v7386_v10 }
 0x9eb   :  { %v1992_v48 = vpop.f32.mrf.mxu0 }
 0x9ec   :  { %6903 = vmatprep.mubr.msk.f32.mxu0 %vm415_vm2, %v1992_v48 }
 0x9ed   :  { %v6895_v49 = vpop.f32.mrf.mxu0 }
 0x9ef   :  { %v2065_v50 = vpop.f32.mrf.mxu1 }
 0x9f0   :  { %6904 = vmatmul.mubr.msk.f32.vlgmr.msra.gmra.mxu0 %vm415_vm2, %v2065_v50 }
 0x9f1   :  { %6918 = vmatpush3.msra.mxu0 %v6301_v43  ;;  %v6900_v52 = vpop.f32.mrf.mxu1  ;;  %6925 = vmatprep.mubr.msk.f32.mxu0 %vm161_vm0, %v7447_v8 }
 0x9f2   :  { %6919 = vmatprep.subr.mxu0 %v6300_v51 }
 0x9f3   :  { %6920 = vmatpush3.msra.mxu0 %v6300_v51 }
 0x9f4   :  { %6921 = vmatprep.subr.mxu0 %v6299_v53 }
 0x9f5   :  { %6922 = vmatpush3.msra.mxu0 %v6299_v53 }
 0x9f6   :  { %6923 = vmatprep.subr.mxu0 %v6298_v54 }
 0x9f7   :  { %6924 = vmatpush3.msra.mxu0 %v6298_v54  ;;  %v6916_v63 = vpop.f32.mrf.mxu1 }
 0x9f8   :  { %6926 = vmatmul.mubr.msk.f32.vlgmr.msra.gmra.mxu0 %vm161_vm0, %v7449_v9  ;;  %6939 = vmatprep.subr.mxu0 %v7386_v10  ;;  %v2239_v1 = vadd.f32 %v6916_v63, %v6295_v5 }
 0x9f9   :  { %6941 = vmatprep.mubr.msk.f32.mxu0 %vm7387_vm1, %v7386_v10  ;;  %v2233_v7 = vpop.f32.mrf.mxu1 }
 0x9fa   :  { %v2234_v58 = vadd.f32 %v6295_v5, %v2233_v7  ;;  %v2880_v7 = vld [vmem:[%s6182_s11 + $0x8] sm:$0xff] }
 0x9ff   :  { %v6938_v30 = vpop.f32.mrf.mxu1 }
 0xa00   :  { %v2415_v32 = vadd.f32 %v6938_v30, %v6311_v31  ;;  %v2974_v30 = vld [vmem:[%s7715_s15 + $0x8] sm:$0xff] }
 0xa01   :  { %v2409_v33 = vpop.f32.mrf.mxu1 }
 0xa02   :  { %v2410_v34 = vadd.f32 %v6311_v31, %v2409_v33  ;;  %v2973_v31 = vld [vmem:[%s7715_s15] sm:$0xff] }
 0xa04   :  { %6950 = vmatpush3.msra.mxu1 %v2410_v34 }
 0xa05   :  { %6959 = vmatprep.subr.mxu1 %v6320_v41 }
 0xab0   :  { %v6905_v56 = vpop.f32.mrf.mxu0 }
 0xab1   :  { %v7663_v60 = vadd.f32 %v6905_v56, %v1482_v55 }
 0xab2   :  { %v2143_v61 = vpop.f32.mrf.mxu0 }
 0xab3   :  { %v7665_v62 = vadd.f32 %v2143_v61, %v1477_v57 }
 0xab8   :  { %v6927_v0 = vpop.f32.mrf.mxu0 }
 0xab9   :  { %v2327_v59 = vadd.f32 %v6927_v0, %v6303_v3 }
 0xaba   :  { %v2321_v4 = vpop.f32.mrf.mxu0 }
 0xabb   :  { %v2322_v6 = vadd.f32 %v6303_v3, %v2321_v4 }
 0xabd   :  { %6940 = vmatpush3.xpose.msk.msra.mxu0 %vm415_vm2, %v2322_v6  ;;  %v2881_v6 = vld [vmem:[%s6182_s11 + $0x10] sm:$0xff] }
 0xabe   :  { %6944 = vmatprep.subr.mxu0 %v7386_v10 }
 0xac0   :  { %6942 = vmatmul.mubr.msk.f32.vlgmr.msra.gmra.mxu0 %vm415_vm2, %v2234_v58  ;;  %v2879_v58 = vld [vmem:[%s6182_s11] sm:$0xff] }
 0xac1   :  { %6945 = vmatpush3.xpose.msk.msra.mxu0 %vm415_vm2, %v2327_v59  ;;  %6946 = vmatprep.mubr.msk.f32.mxu0 %vm7387_vm1, %v7386_v10  ;;  %v2980_v59 = vld [vmem:[%s7715_s15 + $0x38] sm:$0xff] }
 0xac2   :  { %6954 = vmatprep.subr.mxu0 %v7386_v10 }
 0xac4   :  { %6947 = vmatmul.mubr.msk.f32.vlgmr.msra.gmra.mxu0 %vm415_vm2, %v2239_v1  ;;  %v2979_v1 = vld [vmem:[%s7715_s15 + $0x30] sm:$0xff] }
 0xac5   :  { %6956 = vmatprep.mubr.msk.f32.mxu0 %vm7387_vm1, %v7386_v10  ;;  %6955 = vmatpush3.msra.mxu0 %v2415_v32  ;;  %v6326_v32 = vld [vmem:[%s6183_s27] ss:$0 sm:$0xff]  ;;  %s6197_s27 = sld [smem:[%s8089_s0 + %s7413_s24]]  }
 0xb80   :  { %v2490_v14 = vpop.f32.mrf.mxu0 }
 0xb81   :  { %v2570_v15 = vsel %vm415_vm2, %v2490_v14, -inf }
 0xb82   :  { %2571 = vmax.xlane.f32.xlu0 %v2570_v15  ;;  %v6943_v16 = vpop.f32.mrf.mxu0 }
 0xb84   :  { %v2566_v17 = vpop.f32.mrf.mxu0 }
 0xb85   :  { %v2573_v18 = vsel %vm415_vm2, %v2566_v17, -inf }
 0xb86   :  { %2574 = vmax.xlane.f32.xlu1 %v2573_v18  ;;  %v6948_v19 = vpop.f32.mrf.mxu0 }
 0xb87   :  { %v6324_v19 = vld [vmem:[%s6180_s19] ss:$0 sm:$0xff]  ;;  %s8038_s19 = sld [smem:[%s8089_s0 + %s7411_s16]]  }
 0xc0b   :  { %v2572_v20 = vpop.xlane.xlu0 %2571 }
 0xc0c   :  { %v2576_v21 = vsub.f32 %v2490_v14, %v2572_v20 }
 0xc0e   :  { %v2578_v22 = vmul.f32 1.442695, %v2576_v21 }
 0xc0f   :  { %v2575_v23 = vpop.xlane.xlu1 %2574 }
 0xc10   :  { %7328 = vpow2.f32 %v2578_v22  ;;  %v2577_v24 = vsub.f32 %v2566_v17, %v2575_v23 }
 0xc12   :  { %v2580_v25 = vmul.f32 1.442695, %v2577_v24  ;;  %v6325_v24 = vld [vmem:[%s6181_s23] ss:$0 sm:$0xff]  ;;  %s6196_s23 = sld [smem:[%s8089_s0 + %s7412_s20]]  }
 0xc14   :  { %7330 = vpow2.f32 %v2580_v25 }
 0xc1d   :  { %v7329_v26 = vpop.eup %7328 }
 0xc1e   :  { %v2582_v27 = vsel %vm415_vm2, %v7329_v26, 0.0 }
 0xc1f   :  { %2583 = vadd.xlane.f32.xlu0 %v2582_v27 }
 0xc21   :  { %v7331_v28 = vpop.eup %7330 }
 0xc22   :  { %v2585_v29 = vsel %vm415_vm2, %v7331_v28, 0.0 }
 0xc23   :  { %2586 = vadd.xlane.f32.xlu1 %v2585_v29  ;;  %v2975_v29 = vld [vmem:[%s7715_s15 + $0x10] sm:$0xff] }
 0xca8   :  { %v2584_v35 = vpop.xlane.xlu0 %2583 }
 0xca9   :  { %7332 = vrcp.f32 %v2584_v35 }
 0xcac   :  { %v2587_v36 = vpop.xlane.xlu1 %2586 }
 0xcad   :  { %7334 = vrcp.f32 %v2587_v36 }
 0xcb6   :  { %v7333_v37 = vpop.eup %7332 }
 0xcb7   :  { %v2590_v38 = vmul.f32 %v7333_v37, %v7329_v26 }
 0xcb9   :  { %6952 = vmatmul.mubr.msk.f32.vlgmr.msra.gmra.mxu1 %vm415_vm2, %v2590_v38 }
 0xcba   :  { %v7335_v39 = vpop.eup %7334  ;;  %6960 = vmatpush3.msra.mxu1 %v6320_v41 }
 0xcbb   :  { %v2591_v40 = vmul.f32 %v7335_v39, %v7331_v28  ;;  %6975 = vmatprep.subr.mxu1 %v2980_v59  ;;  %v2976_v28 = vld [vmem:[%s7715_s15 + $0x18] sm:$0xff]  ;;  %v6329_v39 = vld [vmem:[%s6185_s1] ss:$0 sm:$0xff]  ;;  %s6198_s15 = sld [smem:[%s8089_s0 + %s7410_s12]]  }
 0xcbc   :  { %s6199_s1 = sld [smem:[%s8089_s0 + %s7414_s28]]  }
 0xcbd   :  { %6957 = vmatmul.mubr.msk.f32.vlgmr.msra.gmra.mxu0 %vm415_vm2, %v2591_v40 }
 0xd79   :  { %v2661_v42 = vpop.f32.mrf.mxu1 }
 0xd7a   :  { %6961 = vmatprep.mubr.msk.f32.mxu1 %vm415_vm2, %v2661_v42 }
 0xd7b   :  { %v6953_v43 = vpop.f32.mrf.mxu1 }
 0xd7d   :  { %v2734_v44 = vpop.f32.mrf.mxu0 }
 0xd7e   :  { %6962 = vmatmul.mubr.msk.f32.vlgmr.msra.gmra.mxu1 %vm415_vm2, %v2734_v44 }
 0xd7f   :  { %v6958_v45 = vpop.f32.mrf.mxu0  ;;  %6976 = vmatpush3.msra.mxu1 %v2980_v59 }
 0xd80   :  { %6977 = vmatprep.subr.mxu1 %v2979_v1 }
 0xd81   :  { %6978 = vmatpush3.msra.mxu1 %v2979_v1 }
 0xd82   :  { %6979 = vmatprep.subr.mxu1 %v2978_v2 }
 0xd83   :  { %6980 = vmatpush3.msra.mxu1 %v2978_v2 }
 0xd84   :  { %6981 = vmatprep.subr.mxu1 %v2977_v11 }
 0xd85   :  { %6982 = vmatpush3.msra.mxu1 %v2977_v11  ;;  %v6332_v11 = vld [vmem:[%s6186_s17] ss:$0 sm:$0xff]  ;;  %s6202_s17 = sld [smem:[%s8089_s0 + %s7418_s14]]  }
 0xd86   :  { %6983 = vmatprep.subr.mxu1 %v2976_v28 }
 0xd87   :  { %6984 = vmatpush3.msra.mxu1 %v2976_v28  ;;  %v6334_v28 = vld [vmem:[%s7808_s29] ss:$0 sm:$0xff] }
 0xd88   :  { %6985 = vmatprep.subr.mxu1 %v2975_v29 }
 0xd89   :  { %6986 = vmatpush3.msra.mxu1 %v2975_v29 }
 0xd8a   :  { %6987 = vmatprep.subr.mxu1 %v2974_v30 }
 0xd8b   :  { %6988 = vmatpush3.msra.mxu1 %v2974_v30  ;;  %v6340_v30 = vld [vmem:[%s7813_s3] ss:$0 sm:$0xff] }
 0xd8c   :  { %6989 = vmatprep.subr.mxu1 %v2973_v31 }
 0xd8d   :  { %6990 = vmatpush3.msra.mxu1 %v2973_v31 }
 0xe3e   :  { %v6963_v46 = vpop.f32.mrf.mxu1 }
 0xe3f   :  { %v2822_v48 = vadd.f32 %v6963_v46, %v7663_v60 }
 0xe40   :  { %v2812_v49 = vpop.f32.mrf.mxu1 }
 0xe41   :  { %v2831_v50 = vadd.f32 %v6323_v47, %v2822_v48  ;;  %v2821_v51 = vadd.f32 %v2812_v49, %v7665_v62 }
 0xe43   :  { %v2830_v52 = vadd.f32 %v6323_v47, %v2821_v51  ;;  %v2833_v53 = vadd.f32 %v2831_v50, %v7449_v9 }
 0xe45   :  { %v2839_v54 = vsel %vm161_vm0, %v2833_v53, 0.0  ;;  %v2832_v55 = vadd.f32 %v2830_v52, %v7447_v8  ;;  %v2882_v8 = vld [vmem:[%s6182_s11 + $0x18] sm:$0xff] }
 0xe46   :  { %2840 = vadd.xlane.f32.xlu1 %v2839_v54  ;;  %6964 = vmatprep.subr.mxu0 %v2882_v8 }
 0xe47   :  { %v2836_v56 = vsel %vm161_vm0, %v2832_v55, 0.0  ;;  %6965 = vmatpush3.msra.mxu0 %v2882_v8 }
 0xe48   :  { %2837 = vadd.xlane.f32.xlu0 %v2836_v56  ;;  %6966 = vmatprep.subr.mxu0 %v2881_v6 }
 0xe49   :  { %6967 = vmatpush3.msra.mxu0 %v2881_v6 }
 0xe4a   :  { %6968 = vmatprep.subr.mxu0 %v2880_v7 }
 0xe4b   :  { %6969 = vmatpush3.msra.mxu0 %v2880_v7 }
 0xe4c   :  { %6970 = vmatprep.subr.mxu0 %v2879_v58 }
 0xe4d   :  { %6971 = vmatpush3.msra.mxu0 %v2879_v58 }
 0xecf   :  { %v2841_v57 = vpop.xlane.xlu1 %2840 }
 0xed0   :  { %v2844_v61 = vmul.f32 0.03125, %v2841_v57 }
 0xed1   :  { %v2838_v63 = vpop.xlane.xlu0 %2837 }
 0xed2   :  { %v2846_v0 = vsub.f32 %v2833_v53, %v2844_v61  ;;  %v2843_v60 = vmul.f32 0.03125, %v2838_v63  ;;  %v3119_v61 = vld [vmem:[%s7748_s5 + $0x18] sm:$0xff] }
 0xed3   :  { %6994 = vmatprep.subr.mxu0 %v3119_v61  ;;  %v3297_v63 = vld [vmem:[%s7753_s9 + $0x18] sm:$0xff] }
 0xed4   :  { %v2845_v3 = vsub.f32 %v2832_v55, %v2843_v60  ;;  %v2848_v4 = vmul.f32 %v2846_v0, %v2846_v0  ;;  %7016 = vmatprep.subr.mxu1 %v3297_v63  ;;  %v3296_v60 = vld [vmem:[%s7753_s9 + $0x10] sm:$0xff] }
 0xed6   :  { %v2852_v62 = vsel %vm161_vm0, %v2848_v4, 0.0  ;;  %v2847_v5 = vmul.f32 %v2845_v3, %v2845_v3  ;;  %v3295_v4 = vld [vmem:[%s7753_s9 + $0x8] sm:$0xff] }
 0xed7   :  { %2853 = vadd.xlane.f32.xlu1 %v2852_v62  ;;  %v3116_v62 = vld [vmem:[%s7748_s5] sm:$0xff] }
 0xed8   :  { %v2849_v9 = vsel %vm161_vm0, %v2847_v5, 0.0  ;;  %v3294_v5 = vld [vmem:[%s7753_s9] sm:$0xff] }
 0xed9   :  { %2850 = vadd.xlane.f32.xlu0 %v2849_v9  ;;  %v3211_v9 = vld [vmem:[%s7761_s13 + $0x18] sm:$0xff] }
 0xf60   :  { %v2854_v12 = vpop.xlane.xlu1 %2853 }
 0xf61   :  { %v2856_v13 = vmul.f32 0.03125, %v2854_v12 }
 0xf62   :  { %v2851_v14 = vpop.xlane.xlu0 %2850 }
 0xf63   :  { %v2858_v15 = vadd.f32 1e-05, %v2856_v13  ;;  %v2855_v16 = vmul.f32 0.03125, %v2851_v14 }
 0xf65   :  { %7336 = vrsqrt.f32 %v2858_v15  ;;  %v2857_v17 = vadd.f32 1e-05, %v2855_v16  ;;  %v6333_v16 = vld [vmem:[%s6187_s21] ss:$0 sm:$0xff]  ;;  %s6203_s21 = sld [smem:[%s8089_s0 + %s7419_s18]]  }
 0xf67   :  { %7338 = vrsqrt.f32 %v2857_v17 }
 0xf72   :  { %v7337_v18 = vpop.eup %7336 }
 0xf73   :  { %v2862_v20 = vmul.f32 %v7337_v18, %v2846_v0  ;;  %v3118_v0 = vld [vmem:[%s7748_s5 + $0x10] sm:$0xff] }
 0xf74   :  { %v7339_v21 = vpop.eup %7338 }
 0xf75   :  { %v2861_v22 = vmul.f32 %v7339_v21, %v2845_v3  ;;  %v2870_v23 = vmul.f32 %v6324_v19, %v2862_v20  ;;  %v3117_v3 = vld [vmem:[%s7748_s5 + $0x8] sm:$0xff]  ;;  %v3210_v20 = vld [vmem:[%s7761_s13 + $0x10] sm:$0xff] }
 0xf76   :  { %v3209_v21 = vld [vmem:[%s7761_s13 + $0x8] sm:$0xff] }
 0xf77   :  { %v2869_v25 = vmul.f32 %v6324_v19, %v2861_v22  ;;  %v2878_v27 = vadd.f32 %v6325_v24, %v2870_v23  ;;  %v3208_v22 = vld [vmem:[%s7761_s13] sm:$0xff] }
 0xf79   :  { %v2877_v26 = vadd.f32 %v6325_v24, %v2869_v25  ;;  %v6337_v25 = vld [vmem:[%s7803_s25] ss:$0 sm:$0xff] }
 0xf7b   :  { %6972 = vmatprep.mubr.msk.f32.mxu0 %vm161_vm0, %v2877_v26 }
 0xf7c   :  { %6973 = vmatmul.mubr.msk.f32.vlgmr.msra.gmra.mxu0 %vm161_vm0, %v2878_v27 }
 0xf7d   :  { %6995 = vmatpush3.msra.mxu0 %v3119_v61 }
 0xf7e   :  { %6996 = vmatprep.subr.mxu0 %v3118_v0 }
 0xf7f   :  { %6997 = vmatpush3.msra.mxu0 %v3118_v0 }
 0xf80   :  { %6998 = vmatprep.subr.mxu0 %v3117_v3 }
 0xf81   :  { %6999 = vmatpush3.msra.mxu0 %v3117_v3 }
 0xf82   :  { %7000 = vmatprep.subr.mxu0 %v3116_v62 }
 0xf83   :  { %7001 = vmatpush3.msra.mxu0 %v3116_v62  ;;  %v6358_v62 = vld [vmem:[%s7761_s13 + $0x28] sm:$0xff] }
 0xf84   :  { %7005 = vmatprep.subr.mxu0 %v3211_v9 }
0x103c   :  { %v6974_v33 = vpop.f32.mrf.mxu0 }
0x103d   :  { %v2968_v34 = vadd.f32 %v6974_v33, %v6326_v32 }
0x103e   :  { %v2962_v35 = vpop.f32.mrf.mxu0 }
0x103f   :  { %v2963_v36 = vadd.f32 %v6326_v32, %v2962_v35  ;;  %v2972_v38 = vmax.f32 %v2968_v34, 0.0 }
0x1041   :  { %v2971_v37 = vmax.f32 %v2963_v36, 0.0 }
0x1043   :  { %6991 = vmatprep.mubr.msk.f32.mxu1 %vm2988_vm3, %v2971_v37 }
0x1044   :  { %6992 = vmatmul.mubr.msk.f32.vlgmr.msra.gmra.mxu1 %vm2988_vm3, %v2972_v38 }
0x1045   :  { %7017 = vmatpush3.msra.mxu1 %v3297_v63 }
0x1046   :  { %7018 = vmatprep.subr.mxu1 %v3296_v60 }
0x1047   :  { %7019 = vmatpush3.msra.mxu1 %v3296_v60  ;;  %v6359_v60 = vld [vmem:[%s7761_s13 + $0x30] sm:$0xff] }
0x1048   :  { %7020 = vmatprep.subr.mxu1 %v3295_v4 }
0x1049   :  { %7021 = vmatpush3.msra.mxu1 %v3295_v4  ;;  %v6351_v4 = vld [vmem:[%s7748_s5 + $0x30] sm:$0xff] }
0x104a   :  { %7022 = vmatprep.subr.mxu1 %v3294_v5 }
0x104b   :  { %7023 = vmatpush3.msra.mxu1 %v3294_v5  ;;  %v6350_v5 = vld [vmem:[%s7748_s5 + $0x28] sm:$0xff] }
0x104c   :  { %7032 = vmatprep.subr.mxu1 %v7386_v10 }
0x1104   :  { %v6993_v40 = vpop.f32.mrf.mxu1 }
0x1105   :  { %v3067_v41 = vadd.f32 %v6993_v40, %v6329_v39 }
0x1106   :  { %v3061_v42 = vpop.f32.mrf.mxu1 }
0x1107   :  { %v3062_v43 = vadd.f32 %v6329_v39, %v3061_v42  ;;  %v3071_v44 = vadd.f32 %v3067_v41, %v2878_v27 }
0x1109   :  { %v3077_v45 = vsel %vm161_vm0, %v3071_v44, 0.0  ;;  %v3070_v46 = vadd.f32 %v3062_v43, %v2877_v26 }
0x110a   :  { %3078 = vadd.xlane.f32.xlu1 %v3077_v45 }
0x110b   :  { %v3074_v47 = vsel %vm161_vm0, %v3070_v46, 0.0 }
0x110c   :  { %3075 = vadd.xlane.f32.xlu0 %v3074_v47 }
0x1193   :  { %v3079_v48 = vpop.xlane.xlu1 %3078 }
0x1194   :  { %v3081_v49 = vmul.f32 0.03125, %v3079_v48 }
0x1195   :  { %v3076_v50 = vpop.xlane.xlu0 %3075 }
0x1196   :  { %v3083_v51 = vsub.f32 %v3071_v44, %v3081_v49  ;;  %v3080_v52 = vmul.f32 0.03125, %v3076_v50 }
0x1198   :  { %v3082_v53 = vsub.f32 %v3070_v46, %v3080_v52  ;;  %v3085_v54 = vmul.f32 %v3083_v51, %v3083_v51 }
0x119a   :  { %v3089_v55 = vsel %vm161_vm0, %v3085_v54, 0.0  ;;  %v3084_v56 = vmul.f32 %v3082_v53, %v3082_v53  ;;  %v6360_v54 = vld [vmem:[%s7761_s13 + $0x38] sm:$0xff] }
0x119b   :  { %3090 = vadd.xlane.f32.xlu1 %v3089_v55  ;;  %v6352_v55 = vld [vmem:[%s7748_s5 + $0x38] sm:$0xff] }
0x119c   :  { %v3086_v57 = vsel %vm161_vm0, %v3084_v56, 0.0 }
0x119d   :  { %3087 = vadd.xlane.f32.xlu0 %v3086_v57 }
0x1224   :  { %v3091_v8 = vpop.xlane.xlu1 %3090 }
0x1225   :  { %v3093_v6 = vmul.f32 0.03125, %v3091_v8  ;;  %v6349_v8 = vld [vmem:[%s7748_s5 + $0x20] sm:$0xff] }
0x1226   :  { %v3088_v7 = vpop.xlane.xlu0 %3087 }
0x1227   :  { %v3095_v58 = vadd.f32 1e-05, %v3093_v6  ;;  %v3092_v59 = vmul.f32 0.03125, %v3088_v7  ;;  %v6368_v6 = vld [vmem:[%s7753_s9 + $0x38] sm:$0xff]  ;;  %v6367_v7 = vld [vmem:[%s7753_s9 + $0x30] sm:$0xff] }
0x1229   :  { %7340 = vrsqrt.f32 %v3095_v58  ;;  %v3094_v1 = vadd.f32 1e-05, %v3092_v59  ;;  %v6366_v58 = vld [vmem:[%s7753_s9 + $0x28] sm:$0xff]  ;;  %v6365_v59 = vld [vmem:[%s7753_s9 + $0x20] sm:$0xff] }
0x122b   :  { %7342 = vrsqrt.f32 %v3094_v1 }
0x1236   :  { %v7341_v2 = vpop.eup %7340 }
0x1237   :  { %v3099_v12 = vmul.f32 %v7341_v2, %v3083_v51 }
0x1238   :  { %v7343_v13 = vpop.eup %7342 }
0x1239   :  { %v3098_v14 = vmul.f32 %v7343_v13, %v3082_v53  ;;  %v3107_v15 = vmul.f32 %v6332_v11, %v3099_v12 }
0x123b   :  { %v3106_v17 = vmul.f32 %v6332_v11, %v3098_v14  ;;  %v7778_v19 = vadd.f32 %v6333_v16, %v3107_v15  ;;  %v6362_v15 = vld [vmem:[%s7803_s25 + $0x1] ss:$0 sm:$0xff] }
0x123d   :  { %v7776_v18 = vadd.f32 %v6333_v16, %v3106_v17  ;;  %v6354_v17 = vld [vmem:[%s7808_s29 + $0x1] ss:$0 sm:$0xff] }
0x123f   :  { %7002 = vmatprep.mubr.msk.f32.mxu0 %vm161_vm0, %v7776_v18  ;;  %7024 = vmatprep.mubr.msk.f32.mxu1 %vm161_vm0, %v7776_v18 }
0x1240   :  { %7003 = vmatmul.mubr.msk.f32.vlgmr.msra.gmra.mxu0 %vm161_vm0, %v7778_v19  ;;  %7025 = vmatmul.mubr.msk.f32.vlgmr.msra.gmra.mxu1 %vm161_vm0, %v7778_v19 }
0x1241   :  { %7006 = vmatpush3.msra.mxu0 %v3211_v9  ;;  %7013 = vmatprep.mubr.msk.f32.mxu0 %vm161_vm0, %v7776_v18  ;;  %v6357_v9 = vld [vmem:[%s7761_s13 + $0x20] sm:$0xff] }
0x1242   :  { %7007 = vmatprep.subr.mxu0 %v3210_v20  ;;  %7034 = vmatprep.mubr.msk.f32.mxu1 %vm7387_vm1, %v7386_v10 }
0x1243   :  { %7008 = vmatpush3.msra.mxu0 %v3210_v20 }
0x1244   :  { %7009 = vmatprep.subr.mxu0 %v3209_v21 }
0x1245   :  { %7010 = vmatpush3.msra.mxu0 %v3209_v21 }
0x1246   :  { %7011 = vmatprep.subr.mxu0 %v3208_v22 }
0x1247   :  { %7012 = vmatpush3.msra.mxu0 %v3208_v22 }
0x1248   :  { %7014 = vmatmul.mubr.msk.f32.vlgmr.msra.gmra.mxu0 %vm161_vm0, %v7778_v19  ;;  %7027 = vmatprep.subr.mxu0 %v7386_v10 }
0x1249   :  { %7029 = vmatprep.mubr.msk.f32.mxu0 %vm7387_vm1, %v7386_v10 }
0x1300   :  { %v7004_v23 = vpop.f32.mrf.mxu0  ;;  %v7026_v26 = vpop.f32.mrf.mxu1 }
0x1301   :  { %v3205_v33 = vadd.f32 %v7004_v23, %v6334_v28  ;;  %v3377_v35 = vadd.f32 %v7026_v26, %v6340_v30 }
0x1302   :  { %v3199_v24 = vpop.f32.mrf.mxu0  ;;  %v3371_v34 = vpop.f32.mrf.mxu1 }
0x1303   :  { %v3200_v36 = vadd.f32 %v6334_v28, %v3199_v24  ;;  %v3372_v37 = vadd.f32 %v6340_v30, %v3371_v34  ;;  %v6370_v24 = vld [vmem:[%s7813_s3 + $0x1] ss:$0 sm:$0xff] }
0x1308   :  { %v7015_v27 = vpop.f32.mrf.mxu0 }
0x1309   :  { %v3291_v29 = vadd.f32 %v7015_v27, %v6337_v25 }
0x130a   :  { %v3285_v31 = vpop.f32.mrf.mxu0 }
0x130b   :  { %v3286_v32 = vadd.f32 %v6337_v25, %v3285_v31  ;;  %7033 = vmatpush3.xpose.msk.msra.mxu1 %vm415_vm2, %v3291_v29 }
0x130c   :  { %7042 = vmatprep.subr.mxu1 %v7386_v10 }
0x130d   :  { %7028 = vmatpush3.xpose.msk.msra.mxu0 %vm415_vm2, %v3286_v32 }
0x130e   :  { %7035 = vmatmul.mubr.msk.f32.vlgmr.msra.gmra.mxu1 %vm415_vm2, %v3205_v33  ;;  %7037 = vmatprep.subr.mxu0 %v7386_v10 }
0x130f   :  { %7043 = vmatpush3.msra.mxu1 %v3377_v35  ;;  %7044 = vmatprep.mubr.msk.f32.mxu1 %vm7387_vm1, %v7386_v10 }
0x1310   :  { %7030 = vmatmul.mubr.msk.f32.vlgmr.msra.gmra.mxu0 %vm415_vm2, %v3200_v36  ;;  %7058 = vmatprep.subr.mxu1 %v6360_v54 }
0x1311   :  { %7038 = vmatpush3.msra.mxu0 %v3372_v37  ;;  %7039 = vmatprep.mubr.msk.f32.mxu0 %vm7387_vm1, %v7386_v10 }
0x1312   :  { %7047 = vmatprep.subr.mxu0 %v6352_v55 }
0x13ce   :  { %v3528_v38 = vpop.f32.mrf.mxu1 }
0x13cf   :  { %v3535_v39 = vsel %vm415_vm2, %v3528_v38, -inf }
0x13d0   :  { %3536 = vmax.xlane.f32.xlu0 %v3535_v39  ;;  %v3452_v40 = vpop.f32.mrf.mxu0  ;;  %v7036_v41 = vpop.f32.mrf.mxu1 }
0x13d1   :  { %v3532_v42 = vsel %vm415_vm2, %v3452_v40, -inf }
0x13d2   :  { %3533 = vmax.xlane.f32.xlu1 %v3532_v42  ;;  %v7031_v43 = vpop.f32.mrf.mxu0 }
0x1459   :  { %v3537_v44 = vpop.xlane.xlu0 %3536 }
0x145a   :  { %v3539_v45 = vsub.f32 %v3528_v38, %v3537_v44 }
0x145b   :  { %v3534_v46 = vpop.xlane.xlu1 %3533 }
0x145c   :  { %v3542_v47 = vmul.f32 1.442695, %v3539_v45  ;;  %v3538_v48 = vsub.f32 %v3452_v40, %v3534_v46  ;;  %v3700_v46 = vld [vmem:[%s7888_s8] sm:$0xff] }
0x145e   :  { %7344 = vpow2.f32 %v3542_v47  ;;  %v3540_v49 = vmul.f32 1.442695, %v3538_v48 }
0x1460   :  { %7346 = vpow2.f32 %v3540_v49 }
0x146b   :  { %v7345_v50 = vpop.eup %7344 }
0x146c   :  { %v3547_v51 = vsel %vm415_vm2, %v7345_v50, 0.0 }
0x146d   :  { %v7347_v52 = vpop.eup %7346  ;;  %3548 = vadd.xlane.f32.xlu0 %v3547_v51 }
0x146e   :  { %v3544_v53 = vsel %vm415_vm2, %v7347_v52, 0.0 }
0x146f   :  { %3545 = vadd.xlane.f32.xlu1 %v3544_v53  ;;  %v6395_v53 = vld [vmem:[%s7761_s13 + $0x58] sm:$0xff] }
0x14f6   :  { %v3549_v56 = vpop.xlane.xlu0 %3548 }
0x14f7   :  { %7348 = vrcp.f32 %v3549_v56  ;;  %v6392_v56 = vld [vmem:[%s7761_s13 + $0x40] sm:$0xff] }
0x14f8   :  { %v3546_v57 = vpop.xlane.xlu1 %3545 }
0x14f9   :  { %7350 = vrcp.f32 %v3546_v57  ;;  %v6379_v57 = vld [vmem:[%s7888_s8 + $0x8] sm:$0xff] }
0x1504   :  { %v7349_v61 = vpop.eup %7348 }
0x1505   :  { %v3553_v63 = vmul.f32 %v7349_v61, %v7345_v50  ;;  %v6387_v61 = vld [vmem:[%s7748_s5 + $0x58] sm:$0xff] }
0x1506   :  { %v7351_v0 = vpop.eup %7350 }
0x1507   :  { %7045 = vmatmul.mubr.msk.f32.vlgmr.msra.gmra.mxu1 %vm415_vm2, %v3553_v63  ;;  %v3552_v3 = vmul.f32 %v7351_v0, %v7347_v52 }
0x1508   :  { %7059 = vmatpush3.msra.mxu1 %v6360_v54  ;;  %7066 = vmatprep.mubr.msk.f32.mxu1 %vm161_vm0, %v7776_v18  ;;  %v6394_v54 = vld [vmem:[%s7761_s13 + $0x50] sm:$0xff] }
0x1509   :  { %7060 = vmatprep.subr.mxu1 %v6359_v60  ;;  %7040 = vmatmul.mubr.msk.f32.vlgmr.msra.gmra.mxu0 %vm415_vm2, %v3552_v3  ;;  %v6386_v3 = vld [vmem:[%s7748_s5 + $0x50] sm:$0xff] }
0x150a   :  { %7048 = vmatpush3.msra.mxu0 %v6352_v55  ;;  %7061 = vmatpush3.msra.mxu1 %v6359_v60  ;;  %v6393_v55 = vld [vmem:[%s7761_s13 + $0x48] sm:$0xff] }
0x150b   :  { %7049 = vmatprep.subr.mxu0 %v6351_v4  ;;  %7055 = vmatprep.mubr.msk.f32.mxu0 %vm161_vm0, %v7776_v18 }
0x150c   :  { %7062 = vmatprep.subr.mxu1 %v6358_v62  ;;  %7050 = vmatpush3.msra.mxu0 %v6351_v4 }
0x150d   :  { %7063 = vmatpush3.msra.mxu1 %v6358_v62  ;;  %7051 = vmatprep.subr.mxu0 %v6350_v5  ;;  %v6385_v62 = vld [vmem:[%s7748_s5 + $0x48] sm:$0xff] }
0x150e   :  { %7064 = vmatprep.subr.mxu1 %v6357_v9  ;;  %7052 = vmatpush3.msra.mxu0 %v6350_v5  ;;  %v6384_v5 = vld [vmem:[%s7748_s5 + $0x40] sm:$0xff] }
0x150f   :  { %7065 = vmatpush3.msra.mxu1 %v6357_v9  ;;  %7053 = vmatprep.subr.mxu0 %v6349_v8 }
0x1510   :  { %7067 = vmatmul.mubr.msk.f32.vlgmr.msra.gmra.mxu1 %vm161_vm0, %v7778_v19  ;;  %7054 = vmatpush3.msra.mxu0 %v6349_v8  ;;  %v6403_v8 = vld [vmem:[%s7753_s9 + $0x58] sm:$0xff] }
0x1511   :  { %7056 = vmatmul.mubr.msk.f32.vlgmr.msra.gmra.mxu0 %vm161_vm0, %v7778_v19  ;;  %7069 = vmatprep.subr.mxu0 %v6368_v6 }
0x1512   :  { %7070 = vmatpush3.msra.mxu0 %v6368_v6  ;;  %7077 = vmatprep.mubr.msk.f32.mxu0 %vm161_vm0, %v7776_v18  ;;  %v6402_v6 = vld [vmem:[%s7753_s9 + $0x50] sm:$0xff] }
0x1513   :  { %7071 = vmatprep.subr.mxu0 %v6367_v7  ;;  %7080 = vmatprep.subr.mxu1 %v7386_v10 }
0x1514   :  { %7072 = vmatpush3.msra.mxu0 %v6367_v7  ;;  %7082 = vmatprep.mubr.msk.f32.mxu1 %vm7387_vm1, %v7386_v10 }
0x1515   :  { %7073 = vmatprep.subr.mxu0 %v6366_v58 }
0x1516   :  { %7074 = vmatpush3.msra.mxu0 %v6366_v58  ;;  %v6397_v58 = vld [vmem:[%s7803_s25 + $0x2] ss:$0 sm:$0xff] }
0x1517   :  { %7075 = vmatprep.subr.mxu0 %v6365_v59 }
0x1518   :  { %7076 = vmatpush3.msra.mxu0 %v6365_v59  ;;  %v6401_v59 = vld [vmem:[%s7753_s9 + $0x48] sm:$0xff] }
0x1519   :  { %7078 = vmatmul.mubr.msk.f32.vlgmr.msra.gmra.mxu0 %vm161_vm0, %v7778_v19  ;;  %7090 = vmatprep.subr.mxu0 %v7386_v10 }
0x151a   :  { %7092 = vmatprep.mubr.msk.f32.mxu0 %vm7387_vm1, %v7386_v10 }
0x15c7   :  { %v7864_v1 = vpop.f32.mrf.mxu1 }
0x15c9   :  { %v7866_v2 = vpop.f32.mrf.mxu0  ;;  %v7046_v11 = vpop.f32.mrf.mxu1 }
0x15cb   :  { %v7041_v12 = vpop.f32.mrf.mxu0 }
0x15d0   :  { %v7068_v13 = vpop.f32.mrf.mxu1 }
0x15d1   :  { %v7057_v14 = vpop.f32.mrf.mxu0  ;;  %v3874_v23 = vadd.f32 %v7068_v13, %v6362_v15 }
0x15d2   :  { %v3868_v16 = vpop.f32.mrf.mxu1  ;;  %v3786_v26 = vadd.f32 %v7057_v14, %v6354_v17 }
0x15d3   :  { %v3869_v20 = vadd.f32 %v6362_v15, %v3868_v16  ;;  %v3780_v21 = vpop.f32.mrf.mxu0 }
0x15d4   :  { %v3781_v22 = vadd.f32 %v6354_v17, %v3780_v21  ;;  %v6389_v17 = vld [vmem:[%s7808_s29 + $0x2] ss:$0 sm:$0xff] }
0x15d5   :  { %7081 = vmatpush3.xpose.msk.msra.mxu1 %vm415_vm2, %v3869_v20 }
0x15d6   :  { %7085 = vmatprep.subr.mxu1 %v7386_v10 }
0x15d8   :  { %7083 = vmatmul.mubr.msk.f32.vlgmr.msra.gmra.mxu1 %vm415_vm2, %v3781_v22  ;;  %v6405_v22 = vld [vmem:[%s7813_s3 + $0x2] ss:$0 sm:$0xff] }
0x15d9   :  { %7086 = vmatpush3.xpose.msk.msra.mxu1 %vm415_vm2, %v3874_v23  ;;  %v7079_v25 = vpop.f32.mrf.mxu0  ;;  %7087 = vmatprep.mubr.msk.f32.mxu1 %vm7387_vm1, %v7386_v10 }
0x15da   :  { %v3962_v27 = vadd.f32 %v7079_v25, %v6370_v24  ;;  %7095 = vmatprep.subr.mxu1 %v7386_v10 }
0x15db   :  { %v3956_v28 = vpop.f32.mrf.mxu0 }
0x15dc   :  { %v3957_v29 = vadd.f32 %v6370_v24, %v3956_v28  ;;  %7088 = vmatmul.mubr.msk.f32.vlgmr.msra.gmra.mxu1 %vm415_vm2, %v3786_v26 }
0x15dd   :  { %7096 = vmatpush3.msra.mxu1 %v3962_v27  ;;  %7097 = vmatprep.mubr.msk.f32.mxu1 %vm7387_vm1, %v7386_v10 }
0x15de   :  { %7091 = vmatpush3.msra.mxu0 %v3957_v29  ;;  %7105 = vmatprep.subr.mxu1 %v3700_v46 }
0x15df   :  { %7100 = vmatprep.subr.mxu0 %v6379_v57 }
0x1698   :  { %v4037_v30 = vpop.f32.mrf.mxu1 }
0x1699   :  { %v4117_v31 = vsel %vm415_vm2, %v4037_v30, -inf }
0x169a   :  { %4118 = vmax.xlane.f32.xlu0 %v4117_v31  ;;  %v7084_v32 = vpop.f32.mrf.mxu1 }
0x169c   :  { %v4113_v33 = vpop.f32.mrf.mxu1 }
0x169d   :  { %v4120_v34 = vsel %vm415_vm2, %v4113_v33, -inf }
0x169e   :  { %4121 = vmax.xlane.f32.xlu1 %v4120_v34  ;;  %v7089_v35 = vpop.f32.mrf.mxu1 }
0x1723   :  { %v4119_v36 = vpop.xlane.xlu0 %4118 }
0x1724   :  { %v4123_v37 = vsub.f32 %v4037_v30, %v4119_v36 }
0x1726   :  { %v4125_v38 = vmul.f32 1.442695, %v4123_v37 }
0x1727   :  { %v4122_v39 = vpop.xlane.xlu1 %4121 }
0x1728   :  { %7352 = vpow2.f32 %v4125_v38  ;;  %v4124_v40 = vsub.f32 %v4113_v33, %v4122_v39 }
0x172a   :  { %v4127_v41 = vmul.f32 1.442695, %v4124_v40 }
0x172c   :  { %7354 = vpow2.f32 %v4127_v41 }
0x1735   :  { %v7353_v42 = vpop.eup %7352 }
0x1736   :  { %v4129_v43 = vsel %vm415_vm2, %v7353_v42, 0.0 }
0x1737   :  { %4130 = vadd.xlane.f32.xlu0 %v4129_v43 }
0x1739   :  { %v7355_v44 = vpop.eup %7354 }
0x173a   :  { %v4132_v45 = vsel %vm415_vm2, %v7355_v44, 0.0 }
0x173b   :  { %4133 = vadd.xlane.f32.xlu1 %v4132_v45 }
0x17c0   :  { %v4131_v47 = vpop.xlane.xlu0 %4130 }
0x17c1   :  { %7356 = vrcp.f32 %v4131_v47 }
0x17c4   :  { %v4134_v48 = vpop.xlane.xlu1 %4133 }
0x17c5   :  { %7358 = vrcp.f32 %v4134_v48 }
0x17ce   :  { %v7357_v49 = vpop.eup %7356 }
0x17cf   :  { %v4137_v50 = vmul.f32 %v7357_v49, %v7353_v42 }
0x17d1   :  { %7093 = vmatmul.mubr.msk.f32.vlgmr.msra.gmra.mxu0 %vm415_vm2, %v4137_v50 }
0x17d2   :  { %v7359_v51 = vpop.eup %7358  ;;  %7101 = vmatpush3.msra.mxu0 %v6379_v57  ;;  %v6433_v57 = vld [vmem:[%s7753_s9 + $0x60] sm:$0xff] }
0x17d3   :  { %v4138_v52 = vmul.f32 %v7359_v51, %v7355_v44  ;;  %7110 = vmatprep.subr.mxu0 %v6387_v61  ;;  %v6420_v44 = vld [vmem:[%s7748_s5 + $0x78] sm:$0xff]  ;;  %v6419_v51 = vld [vmem:[%s7748_s5 + $0x70] sm:$0xff] }
0x17d5   :  { %7098 = vmatmul.mubr.msk.f32.vlgmr.msra.gmra.mxu1 %vm415_vm2, %v4138_v52  ;;  %v6418_v52 = vld [vmem:[%s7748_s5 + $0x68] sm:$0xff] }
0x17d6   :  { %7107 = vmatprep.mubr.msk.f32.mxu1 %vm415_vm2, %v7866_v2  ;;  %7106 = vmatpush3.msra.mxu1 %v3700_v46  ;;  %v6400_v2 = vld [vmem:[%s7753_s9 + $0x40] sm:$0xff] }
0x17d7   :  { %7121 = vmatprep.subr.mxu1 %v6395_v53 }
0x17d9   :  { %7108 = vmatmul.mubr.msk.f32.vlgmr.msra.gmra.mxu1 %vm415_vm2, %v7864_v1 }
0x17da   :  { %7122 = vmatpush3.msra.mxu1 %v6395_v53  ;;  %7129 = vmatprep.mubr.msk.f32.mxu1 %vm161_vm0, %v7776_v18  ;;  %v6417_v53 = vld [vmem:[%s7748_s5 + $0x60] sm:$0xff]  ;;  %s7409_s5 = smov 24  }
0x17db   :  { %7123 = vmatprep.subr.mxu1 %v6394_v54  ;;  %s6195_s11 = sld [smem:[%s8089_s0 + %s7409_s5]]  }
0x17dc   :  { %7124 = vmatpush3.msra.mxu1 %v6394_v54  ;;  %v6436_v54 = vld [vmem:[%s7753_s9 + $0x78] sm:$0xff] }
0x17dd   :  { %7125 = vmatprep.subr.mxu1 %v6393_v55 }
0x17de   :  { %7126 = vmatpush3.msra.mxu1 %v6393_v55  ;;  %v6435_v55 = vld [vmem:[%s7753_s9 + $0x70] sm:$0xff] }
0x17df   :  { %7127 = vmatprep.subr.mxu1 %v6392_v56 }
0x17e0   :  { %7128 = vmatpush3.msra.mxu1 %v6392_v56  ;;  %v6434_v56 = vld [vmem:[%s7753_s9 + $0x68] sm:$0xff]  ;;  %s6204_s9 = sld [smem:[%s8089_s0 + %s7416_s7]]  }
0x17e1   :  { %7130 = vmatmul.mubr.msk.f32.vlgmr.msra.gmra.mxu1 %vm161_vm0, %v7778_v19  ;;  %7143 = vmatprep.subr.mxu1 %v7386_v10 }
0x17e2   :  { %7145 = vmatprep.mubr.msk.f32.mxu1 %vm7387_vm1, %v7386_v10 }
0x1891   :  { %v4208_v63 = vpop.f32.mrf.mxu0 }
0x1892   :  { %7102 = vmatprep.mubr.msk.f32.mxu0 %vm415_vm2, %v4208_v63  ;;  %v6428_v63 = vld [vmem:[%s7761_s13 + $0x78] sm:$0xff] }
0x1893   :  { %v7094_v0 = vpop.f32.mrf.mxu0 }
0x1895   :  { %v4281_v60 = vpop.f32.mrf.mxu1 }
0x1896   :  { %7103 = vmatmul.mubr.msk.f32.vlgmr.msra.gmra.mxu0 %vm415_vm2, %v4281_v60 }
0x1897   :  { %7111 = vmatpush3.msra.mxu0 %v6387_v61  ;;  %v7099_v4 = vpop.f32.mrf.mxu1  ;;  %7118 = vmatprep.mubr.msk.f32.mxu0 %vm161_vm0, %v7776_v18  ;;  %v6414_v61 = vld [vmem:[%s7888_s8 + $0x10] sm:$0xff] }
0x1898   :  { %7112 = vmatprep.subr.mxu0 %v6386_v3  ;;  %v6427_v4 = vld [vmem:[%s7761_s13 + $0x70] sm:$0xff] }
0x1899   :  { %7113 = vmatpush3.msra.mxu0 %v6386_v3  ;;  %v7917_v9 = vpop.f32.mrf.mxu1 }
0x189a   :  { %7114 = vmatprep.subr.mxu0 %v6385_v62 }
0x189b   :  { %7115 = vmatpush3.msra.mxu0 %v6385_v62  ;;  %v7923_v7 = vpop.f32.mrf.mxu1 }
0x189c   :  { %7116 = vmatprep.subr.mxu0 %v6384_v5 }
0x189d   :  { %7117 = vmatpush3.msra.mxu0 %v6384_v5  ;;  %v6426_v5 = vld [vmem:[%s7761_s13 + $0x68] sm:$0xff] }
0x189e   :  { %7119 = vmatmul.mubr.msk.f32.vlgmr.msra.gmra.mxu0 %vm161_vm0, %v7778_v19  ;;  %7132 = vmatprep.subr.mxu0 %v6403_v8 }
0x189f   :  { %7133 = vmatpush3.msra.mxu0 %v6403_v8  ;;  %7140 = vmatprep.mubr.msk.f32.mxu0 %vm161_vm0, %v7776_v18  ;;  %v6425_v8 = vld [vmem:[%s7761_s13 + $0x60] sm:$0xff]  ;;  %s6205_s13 = sld [smem:[%s8089_s0 + %s7417_s10]]  }
0x18a0   :  { %7134 = vmatprep.subr.mxu0 %v6402_v6 }
0x18a1   :  { %v7131_v1 = vpop.f32.mrf.mxu1  ;;  %7135 = vmatpush3.msra.mxu0 %v6402_v6 }
0x18a2   :  { %v4622_v11 = vadd.f32 %v7131_v1, %v6397_v58  ;;  %7136 = vmatprep.subr.mxu0 %v6401_v59 }
0x18a3   :  { %v4616_v12 = vpop.f32.mrf.mxu1  ;;  %7137 = vmatpush3.msra.mxu0 %v6401_v59  ;;  %v6438_v59 = vld [vmem:[%s7813_s3 + $0x3] ss:$0 sm:$0xff] }
0x18a4   :  { %v4617_v13 = vadd.f32 %v6397_v58, %v4616_v12  ;;  %7138 = vmatprep.subr.mxu0 %v6400_v2 }
0x18a5   :  { %7139 = vmatpush3.msra.mxu0 %v6400_v2 }
0x18a6   :  { %7141 = vmatmul.mubr.msk.f32.vlgmr.msra.gmra.mxu0 %vm161_vm0, %v7778_v19  ;;  %7144 = vmatpush3.xpose.msk.msra.mxu1 %vm415_vm2, %v4617_v13 }
0x18a7   :  { %7148 = vmatprep.subr.mxu1 %v7386_v10  ;;  %7153 = vmatprep.subr.mxu0 %v7386_v10 }
0x18a8   :  { %7155 = vmatprep.mubr.msk.f32.mxu0 %vm7387_vm1, %v7386_v10 }
0x1956   :  { %v7937_v14 = vpop.f32.mrf.mxu0 }
0x1957   :  { %v4446_v13 = vadd.f32 %v7917_v9, %v7937_v14 }
0x1958   :  { %v7939_v15 = vpop.f32.mrf.mxu0 }
0x195e   :  { %v7120_v16 = vpop.f32.mrf.mxu0 }
0x195f   :  { %v4534_v23 = vadd.f32 %v7120_v16, %v6389_v17 }
0x1960   :  { %v4528_v20 = vpop.f32.mrf.mxu0 }
0x1961   :  { %v4529_v21 = vadd.f32 %v6389_v17, %v4528_v20  ;;  %v4441_v17 = vadd.f32 %v7923_v7, %v7939_v15 }
0x1963   :  { %7146 = vmatmul.mubr.msk.f32.vlgmr.msra.gmra.mxu1 %vm415_vm2, %v4529_v21 }
0x1964   :  { %7149 = vmatpush3.xpose.msk.msra.mxu1 %vm415_vm2, %v4622_v11  ;;  %7150 = vmatprep.mubr.msk.f32.mxu1 %vm7387_vm1, %v7386_v10 }
0x1965   :  { %7158 = vmatprep.subr.mxu1 %v7386_v10 }
0x1966   :  { %v7142_v24 = vpop.f32.mrf.mxu0 }
0x1967   :  { %v4710_v25 = vadd.f32 %v7142_v24, %v6405_v22  ;;  %7151 = vmatmul.mubr.msk.f32.vlgmr.msra.gmra.mxu1 %vm415_vm2, %v4534_v23  ;;  %v6430_v24 = vld [vmem:[%s7803_s25 + $0x3] ss:$0 sm:$0xff]  ;;  %s6206_s25 = sld [smem:[%s8089_s0 + %s7420_s22]]  }
0x1968   :  { %v4704_v26 = vpop.f32.mrf.mxu0  ;;  %7160 = vmatprep.mubr.msk.f32.mxu1 %vm7387_vm1, %v7386_v10 }
0x1969   :  { %v4705_v27 = vadd.f32 %v6405_v22, %v4704_v26  ;;  %7159 = vmatpush3.msra.mxu1 %v4710_v25 }
0x196a   :  { %7168 = vmatprep.subr.mxu1 %v6420_v44 }
0x196b   :  { %7154 = vmatpush3.msra.mxu0 %v4705_v27  ;;  %v6422_v27 = vld [vmem:[%s7808_s29 + $0x3] ss:$0 sm:$0xff] }
0x196c   :  { %7163 = vmatprep.subr.mxu0 %v6414_v61 }
0x1a23   :  { %v4785_v28 = vpop.f32.mrf.mxu1 }
0x1a24   :  { %v4865_v29 = vsel %vm415_vm2, %v4785_v28, -inf }
0x1a25   :  { %4866 = vmax.xlane.f32.xlu0 %v4865_v29  ;;  %v7147_v30 = vpop.f32.mrf.mxu1 }
0x1a27   :  { %v4861_v31 = vpop.f32.mrf.mxu1 }
0x1a28   :  { %v4868_v32 = vsel %vm415_vm2, %v4861_v31, -inf }
0x1a29   :  { %4869 = vmax.xlane.f32.xlu1 %v4868_v32  ;;  %v7152_v33 = vpop.f32.mrf.mxu1 }
0x1aae   :  { %v4867_v34 = vpop.xlane.xlu0 %4866 }
0x1aaf   :  { %v4871_v35 = vsub.f32 %v4785_v28, %v4867_v34 }
0x1ab1   :  { %v4873_v36 = vmul.f32 1.442695, %v4871_v35 }
0x1ab2   :  { %v4870_v37 = vpop.xlane.xlu1 %4869 }
0x1ab3   :  { %7360 = vpow2.f32 %v4873_v36  ;;  %v4872_v38 = vsub.f32 %v4861_v31, %v4870_v37 }
0x1ab5   :  { %v4875_v39 = vmul.f32 1.442695, %v4872_v38 }
0x1ab7   :  { %7362 = vpow2.f32 %v4875_v39 }
0x1ac0   :  { %v7361_v40 = vpop.eup %7360 }
0x1ac1   :  { %v4877_v41 = vsel %vm415_vm2, %v7361_v40, 0.0 }
0x1ac2   :  { %4878 = vadd.xlane.f32.xlu0 %v4877_v41 }
0x1ac4   :  { %v7363_v42 = vpop.eup %7362 }
0x1ac5   :  { %v4880_v43 = vsel %vm415_vm2, %v7363_v42, 0.0 }
0x1ac6   :  { %4881 = vadd.xlane.f32.xlu1 %v4880_v43 }
0x1b4b   :  { %v4879_v45 = vpop.xlane.xlu0 %4878 }
0x1b4c   :  { %7364 = vrcp.f32 %v4879_v45 }
0x1b4f   :  { %v4882_v46 = vpop.xlane.xlu1 %4881 }
0x1b50   :  { %7366 = vrcp.f32 %v4882_v46 }
0x1b59   :  { %v7365_v47 = vpop.eup %7364 }
0x1b5a   :  { %v4885_v48 = vmul.f32 %v7365_v47, %v7361_v40 }
0x1b5c   :  { %7156 = vmatmul.mubr.msk.f32.vlgmr.msra.gmra.mxu0 %vm415_vm2, %v4885_v48 }
0x1b5d   :  { %v7367_v49 = vpop.eup %7366  ;;  %7164 = vmatpush3.msra.mxu0 %v6414_v61 }
0x1b5e   :  { %v4886_v50 = vmul.f32 %v7367_v49, %v7363_v42  ;;  %7179 = vmatprep.subr.mxu0 %v6428_v63  ;;  %v6447_v49 = vld [vmem:[%s7888_s8 + $0x18] sm:$0xff] }
0x1b60   :  { %7161 = vmatmul.mubr.msk.f32.vlgmr.msra.gmra.mxu1 %vm415_vm2, %v4886_v50 }
0x1b61   :  { %7169 = vmatpush3.msra.mxu1 %v6420_v44  ;;  %7176 = vmatprep.mubr.msk.f32.mxu1 %vm161_vm0, %v7776_v18 }
0x1b62   :  { %7170 = vmatprep.subr.mxu1 %v6419_v51 }
0x1b63   :  { %7171 = vmatpush3.msra.mxu1 %v6419_v51 }
0x1b64   :  { %7172 = vmatprep.subr.mxu1 %v6418_v52 }
0x1b65   :  { %7173 = vmatpush3.msra.mxu1 %v6418_v52 }
0x1b66   :  { %7174 = vmatprep.subr.mxu1 %v6417_v53 }
0x1b67   :  { %7175 = vmatpush3.msra.mxu1 %v6417_v53 }
0x1b68   :  { %7177 = vmatmul.mubr.msk.f32.vlgmr.msra.gmra.mxu1 %vm161_vm0, %v7778_v19  ;;  %7190 = vmatprep.subr.mxu1 %v6436_v54 }
0x1b69   :  { %7191 = vmatpush3.msra.mxu1 %v6436_v54  ;;  %7198 = vmatprep.mubr.msk.f32.mxu1 %vm161_vm0, %v7776_v18 }
0x1b6a   :  { %7192 = vmatprep.subr.mxu1 %v6435_v55 }
0x1b6b   :  { %7193 = vmatpush3.msra.mxu1 %v6435_v55  ;;  %v6450_v55 = vld [vmem:[%s6195_s11] ss:$0 sm:$0xff] }
0x1b6c   :  { %7194 = vmatprep.subr.mxu1 %v6434_v56 }
0x1b6d   :  { %7195 = vmatpush3.msra.mxu1 %v6434_v56 }
0x1b6e   :  { %7196 = vmatprep.subr.mxu1 %v6433_v57 }
0x1b6f   :  { %7197 = vmatpush3.msra.mxu1 %v6433_v57 }
0x1b70   :  { %7199 = vmatmul.mubr.msk.f32.vlgmr.msra.gmra.mxu1 %vm161_vm0, %v7778_v19  ;;  %7211 = vmatprep.subr.mxu1 %v7386_v10 }
0x1b71   :  { %7213 = vmatprep.mubr.msk.f32.mxu1 %vm7387_vm1, %v7386_v10 }
0x1c1c   :  { %v4956_v0 = vpop.f32.mrf.mxu0 }
0x1c1d   :  { %7165 = vmatprep.mubr.msk.f32.mxu0 %vm415_vm2, %v4956_v0 }
0x1c1e   :  { %v7157_v60 = vpop.f32.mrf.mxu0 }
0x1c20   :  { %v5029_v3 = vpop.f32.mrf.mxu1 }
0x1c21   :  { %7166 = vmatmul.mubr.msk.f32.vlgmr.msra.gmra.mxu0 %vm415_vm2, %v5029_v3 }
0x1c22   :  { %7180 = vmatpush3.msra.mxu0 %v6428_v63  ;;  %v7162_v62 = vpop.f32.mrf.mxu1  ;;  %7187 = vmatprep.mubr.msk.f32.mxu0 %vm161_vm0, %v7776_v18 }
0x1c23   :  { %7181 = vmatprep.subr.mxu0 %v6427_v4 }
0x1c24   :  { %7182 = vmatpush3.msra.mxu0 %v6427_v4 }
0x1c25   :  { %7183 = vmatprep.subr.mxu0 %v6426_v5 }
0x1c26   :  { %7184 = vmatpush3.msra.mxu0 %v6426_v5 }
0x1c27   :  { %7185 = vmatprep.subr.mxu0 %v6425_v8 }
0x1c28   :  { %7186 = vmatpush3.msra.mxu0 %v6425_v8  ;;  %v7178_v6 = vpop.f32.mrf.mxu1 }
0x1c29   :  { %7188 = vmatmul.mubr.msk.f32.vlgmr.msra.gmra.mxu0 %vm161_vm0, %v7778_v19  ;;  %7201 = vmatprep.subr.mxu0 %v7386_v10  ;;  %v5203_v7 = vadd.f32 %v7178_v6, %v6422_v27 }
0x1c2a   :  { %7203 = vmatprep.mubr.msk.f32.mxu0 %vm7387_vm1, %v7386_v10  ;;  %v5197_v58 = vpop.f32.mrf.mxu1 }
0x1c2b   :  { %v5198_v28 = vadd.f32 %v6422_v27, %v5197_v58 }
0x1c30   :  { %v7200_v1 = vpop.f32.mrf.mxu1 }
0x1c31   :  { %v5379_v2 = vadd.f32 %v7200_v1, %v6438_v59 }
0x1c32   :  { %v5373_v11 = vpop.f32.mrf.mxu1 }
0x1c33   :  { %v5374_v12 = vadd.f32 %v6438_v59, %v5373_v11 }
0x1c35   :  { %7212 = vmatpush3.msra.mxu1 %v5374_v12 }
0x1c36   :  { %7221 = vmatprep.subr.mxu1 %v6447_v49 }
0x1ce1   :  { %v7167_v16 = vpop.f32.mrf.mxu0 }
0x1ce2   :  { %v7995_v20 = vadd.f32 %v7167_v16, %v4446_v13  ;;  %v5844_v13 = vld [vmem:[%s6198_s15 + $0x10] sm:$0xff]  ;;  %v5843_v16 = vld [vmem:[%s6198_s15 + $0x8] sm:$0xff] }
0x1ce3   :  { %v5107_v21 = vpop.f32.mrf.mxu0 }
0x1ce4   :  { %v7997_v22 = vadd.f32 %v5107_v21, %v4441_v17  ;;  %v5842_v17 = vld [vmem:[%s6198_s15] sm:$0xff]  ;;  %v5942_v21 = vld [vmem:[%s8038_s19 + $0x30] sm:$0xff] }
0x1ce9   :  { %v7189_v23 = vpop.f32.mrf.mxu0 }
0x1cea   :  { %v5291_v9 = vadd.f32 %v7189_v23, %v6430_v24  ;;  %v5940_v23 = vld [vmem:[%s8038_s19 + $0x20] sm:$0xff] }
0x1ceb   :  { %v5285_v25 = vpop.f32.mrf.mxu0 }
0x1cec   :  { %v5286_v26 = vadd.f32 %v6430_v24, %v5285_v25 }
0x1cee   :  { %7202 = vmatpush3.xpose.msk.msra.mxu0 %vm415_vm2, %v5286_v26 }
0x1cef   :  { %7206 = vmatprep.subr.mxu0 %v7386_v10 }
0x1cf1   :  { %7204 = vmatmul.mubr.msk.f32.vlgmr.msra.gmra.mxu0 %vm415_vm2, %v5198_v28 }
0x1cf2   :  { %7207 = vmatpush3.xpose.msk.msra.mxu0 %vm415_vm2, %v5291_v9  ;;  %7208 = vmatprep.mubr.msk.f32.mxu0 %vm7387_vm1, %v7386_v10 }
0x1cf3   :  { %7216 = vmatprep.subr.mxu0 %v7386_v10 }
0x1cf5   :  { %7209 = vmatmul.mubr.msk.f32.vlgmr.msra.gmra.mxu0 %vm415_vm2, %v5203_v7 }
0x1cf6   :  { %7217 = vmatpush3.msra.mxu0 %v5379_v2  ;;  %7218 = vmatprep.mubr.msk.f32.mxu0 %vm7387_vm1, %v7386_v10 }
0x1db1   :  { %v5454_v14 = vpop.f32.mrf.mxu0 }
0x1db2   :  { %v5534_v15 = vsel %vm415_vm2, %v5454_v14, -inf }
0x1db3   :  { %5535 = vmax.xlane.f32.xlu0 %v5534_v15  ;;  %v7205_v29 = vpop.f32.mrf.mxu0 }
0x1db5   :  { %v5530_v30 = vpop.f32.mrf.mxu0 }
0x1db6   :  { %v5537_v31 = vsel %vm415_vm2, %v5530_v30, -inf }
0x1db7   :  { %5538 = vmax.xlane.f32.xlu1 %v5537_v31  ;;  %v7210_v32 = vpop.f32.mrf.mxu0 }
0x1db8   :  { %v6452_v32 = vld [vmem:[%s6197_s27] ss:$0 sm:$0xff] }
0x1e3c   :  { %v5536_v33 = vpop.xlane.xlu0 %5535 }
0x1e3d   :  { %v5540_v34 = vsub.f32 %v5454_v14, %v5536_v33  ;;  %v6451_v14 = vld [vmem:[%s6196_s23] ss:$0 sm:$0xff] }
0x1e3f   :  { %v5542_v35 = vmul.f32 1.442695, %v5540_v34 }
0x1e40   :  { %v5539_v36 = vpop.xlane.xlu1 %5538 }
0x1e41   :  { %7368 = vpow2.f32 %v5542_v35  ;;  %v5541_v37 = vsub.f32 %v5530_v30, %v5539_v36  ;;  %v5939_v36 = vld [vmem:[%s8038_s19 + $0x18] sm:$0xff] }
0x1e43   :  { %v5544_v38 = vmul.f32 1.442695, %v5541_v37  ;;  %v5938_v37 = vld [vmem:[%s8038_s19 + $0x10] sm:$0xff] }
0x1e45   :  { %7370 = vpow2.f32 %v5544_v38  ;;  %v5937_v38 = vld [vmem:[%s8038_s19 + $0x8] sm:$0xff] }
0x1e4e   :  { %v7369_v39 = vpop.eup %7368 }
0x1e4f   :  { %v5546_v40 = vsel %vm415_vm2, %v7369_v39, 0.0 }
0x1e50   :  { %5547 = vadd.xlane.f32.xlu0 %v5546_v40  ;;  %v6453_v40 = vld [vmem:[%s6199_s1] ss:$0 sm:$0xff] }
0x1e52   :  { %v7371_v41 = vpop.eup %7370 }
0x1e53   :  { %v5549_v42 = vsel %vm415_vm2, %v7371_v41, 0.0 }
0x1e54   :  { %5550 = vadd.xlane.f32.xlu1 %v5549_v42 }
0x1ed9   :  { %v5548_v43 = vpop.xlane.xlu0 %5547 }
0x1eda   :  { %7372 = vrcp.f32 %v5548_v43 }
0x1edd   :  { %v5551_v44 = vpop.xlane.xlu1 %5550 }
0x1ede   :  { %7374 = vrcp.f32 %v5551_v44 }
0x1ee7   :  { %v7373_v45 = vpop.eup %7372 }
0x1ee8   :  { %v5554_v46 = vmul.f32 %v7373_v45, %v7369_v39  ;;  %v5936_v39 = vld [vmem:[%s8038_s19] sm:$0xff] }
0x1eea   :  { %7214 = vmatmul.mubr.msk.f32.vlgmr.msra.gmra.mxu1 %vm415_vm2, %v5554_v46 }
0x1eeb   :  { %v7375_v47 = vpop.eup %7374  ;;  %7222 = vmatpush3.msra.mxu1 %v6447_v49 }
0x1eec   :  { %v5555_v48 = vmul.f32 %v7375_v47, %v7371_v41  ;;  %v6456_v47 = vld [vmem:[%s6201_s6] ss:$0 sm:$0xff] }
0x1eee   :  { %7219 = vmatmul.mubr.msk.f32.vlgmr.msra.gmra.mxu0 %vm415_vm2, %v5555_v48 }
0x1faa   :  { %v5625_v50 = vpop.f32.mrf.mxu1 }
0x1fab   :  { %7223 = vmatprep.mubr.msk.f32.mxu1 %vm415_vm2, %v5625_v50 }
0x1fac   :  { %v7215_v51 = vpop.f32.mrf.mxu1 }
0x1fae   :  { %v5698_v52 = vpop.f32.mrf.mxu0 }
0x1faf   :  { %7224 = vmatmul.mubr.msk.f32.vlgmr.msra.gmra.mxu1 %vm415_vm2, %v5698_v52 }
0x1fb0   :  { %v7220_v53 = vpop.f32.mrf.mxu0 }
0x206f   :  { %v7225_v54 = vpop.f32.mrf.mxu1 }
0x2070   :  { %v5786_v56 = vadd.f32 %v7225_v54, %v7995_v20  ;;  %v5943_v20 = vld [vmem:[%s8038_s19 + $0x38] sm:$0xff] }
0x2071   :  { %v5776_v57 = vpop.f32.mrf.mxu1  ;;  %7237 = vmatprep.subr.mxu1 %v5943_v20 }
0x2072   :  { %v5795_v61 = vadd.f32 %v6450_v55, %v5786_v56  ;;  %v5785_v63 = vadd.f32 %v5776_v57, %v7997_v22  ;;  %7238 = vmatpush3.msra.mxu1 %v5943_v20  ;;  %v5941_v22 = vld [vmem:[%s8038_s19 + $0x28] sm:$0xff] }
0x2073   :  { %7239 = vmatprep.subr.mxu1 %v5942_v21 }
0x2074   :  { %v5794_v0 = vadd.f32 %v6450_v55, %v5785_v63  ;;  %v5797_v60 = vadd.f32 %v5795_v61, %v7778_v19  ;;  %7240 = vmatpush3.msra.mxu1 %v5942_v21  ;;  %v6460_v21 = vld [vmem:[%s6203_s21] ss:$0 sm:$0xff] }
0x2075   :  { %7241 = vmatprep.subr.mxu1 %v5941_v22 }
0x2076   :  { %v5803_v3 = vsel %vm161_vm0, %v5797_v60, 0.0  ;;  %v5796_v4 = vadd.f32 %v5794_v0, %v7776_v18  ;;  %v5845_v18 = vld [vmem:[%s6198_s15 + $0x18] sm:$0xff]  ;;  %7242 = vmatpush3.msra.mxu1 %v5941_v22 }
0x2077   :  { %5804 = vadd.xlane.f32.xlu1 %v5803_v3  ;;  %7226 = vmatprep.subr.mxu0 %v5845_v18 }
0x2078   :  { %v5800_v62 = vsel %vm161_vm0, %v5796_v4, 0.0  ;;  %7227 = vmatpush3.msra.mxu0 %v5845_v18  ;;  %7243 = vmatprep.subr.mxu1 %v5940_v23 }
0x2079   :  { %5801 = vadd.xlane.f32.xlu0 %v5800_v62  ;;  %7228 = vmatprep.subr.mxu0 %v5844_v13 }
0x207a   :  { %7229 = vmatpush3.msra.mxu0 %v5844_v13  ;;  %7244 = vmatpush3.msra.mxu1 %v5940_v23 }
0x207b   :  { %7230 = vmatprep.subr.mxu0 %v5843_v16  ;;  %7245 = vmatprep.subr.mxu1 %v5939_v36 }
0x207c   :  { %7231 = vmatpush3.msra.mxu0 %v5843_v16  ;;  %7246 = vmatpush3.msra.mxu1 %v5939_v36  ;;  %v6459_v16 = vld [vmem:[%s6202_s17] ss:$0 sm:$0xff] }
0x207d   :  { %7232 = vmatprep.subr.mxu0 %v5842_v17  ;;  %7247 = vmatprep.subr.mxu1 %v5938_v37 }
0x207e   :  { %7233 = vmatpush3.msra.mxu0 %v5842_v17  ;;  %7248 = vmatpush3.msra.mxu1 %v5938_v37 }
0x207f   :  { %7256 = vmatprep.subr.mxu0 %v7386_v10  ;;  %7249 = vmatprep.subr.mxu1 %v5937_v38 }
0x2080   :  { %7250 = vmatpush3.msra.mxu1 %v5937_v38 }
0x2081   :  { %7251 = vmatprep.subr.mxu1 %v5936_v39 }
0x2082   :  { %7252 = vmatpush3.msra.mxu1 %v5936_v39 }
0x2100   :  { %v5805_v5 = vpop.xlane.xlu1 %5804 }
0x2101   :  { %v5807_v8 = vmul.f32 0.03125, %v5805_v5 }
0x2102   :  { %v5802_v6 = vpop.xlane.xlu0 %5801 }
0x2103   :  { %v5809_v58 = vsub.f32 %v5797_v60, %v5807_v8  ;;  %v5806_v59 = vmul.f32 0.03125, %v5802_v6  ;;  %v6081_v8 = vld [vmem:[%s6204_s9 + $0x18] sm:$0xff]  ;;  %v6080_v6 = vld [vmem:[%s6204_s9 + $0x10] sm:$0xff] }
0x2105   :  { %v5808_v1 = vsub.f32 %v5796_v4, %v5806_v59  ;;  %v5811_v2 = vmul.f32 %v5809_v58, %v5809_v58  ;;  %v6078_v59 = vld [vmem:[%s6204_s9] sm:$0xff] }
0x2107   :  { %v5815_v11 = vsel %vm161_vm0, %v5811_v2, 0.0  ;;  %v5810_v12 = vmul.f32 %v5808_v1, %v5808_v1 }
0x2108   :  { %5816 = vadd.xlane.f32.xlu1 %v5815_v11 }
0x2109   :  { %v5812_v19 = vsel %vm161_vm0, %v5810_v12, 0.0 }
0x210a   :  { %5813 = vadd.xlane.f32.xlu0 %v5812_v19 }
0x2191   :  { %v5817_v24 = vpop.xlane.xlu1 %5816 }
0x2192   :  { %v5819_v25 = vmul.f32 0.03125, %v5817_v24 }
0x2193   :  { %v5814_v26 = vpop.xlane.xlu0 %5813 }
0x2194   :  { %v5821_v27 = vadd.f32 1e-05, %v5819_v25  ;;  %v5818_v28 = vmul.f32 0.03125, %v5814_v26 }
0x2196   :  { %7376 = vrsqrt.f32 %v5821_v27  ;;  %v5820_v9 = vadd.f32 1e-05, %v5818_v28 }
0x2198   :  { %7378 = vrsqrt.f32 %v5820_v9 }
0x21a3   :  { %v7377_v7 = vpop.eup %7376 }
0x21a4   :  { %v5825_v15 = vmul.f32 %v7377_v7, %v5809_v58  ;;  %v6079_v58 = vld [vmem:[%s6204_s9 + $0x8] sm:$0xff] }
0x21a5   :  { %v7379_v29 = vpop.eup %7378 }
0x21a6   :  { %v5824_v30 = vmul.f32 %v7379_v29, %v5808_v1  ;;  %v5833_v31 = vmul.f32 %v6451_v14, %v5825_v15  ;;  %v76_v1 = vstv %s6205_s13 }
0x21a7   :  { %77 = vst [vmem:[#allocation2] sm:$0x1] %v76_v1 }
0x21a8   :  { %v5832_v33 = vmul.f32 %v6451_v14, %v5824_v30  ;;  %v5841_v35 = vadd.f32 %v6452_v32, %v5833_v31 }
0x21aa   :  { %v5840_v34 = vadd.f32 %v6452_v32, %v5832_v33 }
0x21ac   :  { %7234 = vmatprep.mubr.msk.f32.mxu0 %vm161_vm0, %v5840_v34 }
0x21ad   :  { %7235 = vmatmul.mubr.msk.f32.vlgmr.msra.gmra.mxu0 %vm161_vm0, %v5841_v35 }
0x21ae   :  { %7264 = vmatprep.mubr.msk.f32.mxu0 %vm7387_vm1, %v7386_v10  ;;  %7257 = vmatpush3.msra.mxu0 %v6081_v8  ;;  %v6461_v9 = vld [vmem:[#allocation2] ss:$0 sm:$0xff] }
0x21af   :  { %7258 = vmatprep.subr.mxu0 %v7386_v10 }
0x21b0   :  { %7259 = vmatpush3.msra.mxu0 %v6080_v6 }
0x21b1   :  { %7260 = vmatprep.subr.mxu0 %v7386_v10 }
0x21b2   :  { %7261 = vmatpush3.msra.mxu0 %v6079_v58 }
0x21b3   :  { %7262 = vmatprep.subr.mxu0 %v7386_v10 }
0x21b4   :  { %7263 = vmatpush3.msra.mxu0 %v6078_v59 }
0x226d   :  { %v7236_v41 = vpop.f32.mrf.mxu0 }
0x226e   :  { %v5931_v42 = vadd.f32 %v7236_v41, %v6453_v40 }
0x226f   :  { %v5925_v43 = vpop.f32.mrf.mxu0 }
0x2270   :  { %v5926_v44 = vadd.f32 %v6453_v40, %v5925_v43  ;;  %v5935_v46 = vmax.f32 %v5931_v42, 0.0 }
0x2272   :  { %v5934_v45 = vmax.f32 %v5926_v44, 0.0 }
0x2274   :  { %7253 = vmatprep.mubr.msk.f32.mxu1 %vm2988_vm3, %v5934_v45 }
0x2275   :  { %7254 = vmatmul.mubr.msk.f32.vlgmr.msra.gmra.mxu1 %vm2988_vm3, %v5935_v46 }
0x2335   :  { %v7255_v48 = vpop.f32.mrf.mxu1 }
0x2336   :  { %v6029_v49 = vadd.f32 %v7255_v48, %v6456_v47 }
0x2337   :  { %v6023_v50 = vpop.f32.mrf.mxu1 }
0x2338   :  { %v6024_v51 = vadd.f32 %v6456_v47, %v6023_v50  ;;  %v6033_v52 = vadd.f32 %v6029_v49, %v5841_v35 }
0x233a   :  { %v6039_v53 = vsel %vm161_vm0, %v6033_v52, 0.0  ;;  %v6032_v54 = vadd.f32 %v6024_v51, %v5840_v34 }
0x233b   :  { %6040 = vadd.xlane.f32.xlu0 %v6039_v53 }
0x233c   :  { %v6036_v55 = vsel %vm161_vm0, %v6032_v54, 0.0 }
0x233d   :  { %6037 = vadd.xlane.f32.xlu1 %v6036_v55 }
0x23c4   :  { %v6041_v56 = vpop.xlane.xlu0 %6040 }
0x23c5   :  { %v6043_v57 = vmul.f32 0.03125, %v6041_v56 }
0x23c6   :  { %v6038_v61 = vpop.xlane.xlu1 %6037 }
0x23c7   :  { %v6045_v63 = vsub.f32 %v6033_v52, %v6043_v57  ;;  %v6042_v0 = vmul.f32 0.03125, %v6038_v61 }
0x23c9   :  { %v6044_v60 = vsub.f32 %v6032_v54, %v6042_v0  ;;  %v6047_v3 = vmul.f32 %v6045_v63, %v6045_v63 }
0x23cb   :  { %v6051_v4 = vsel %vm161_vm0, %v6047_v3, 0.0  ;;  %v6046_v62 = vmul.f32 %v6044_v60, %v6044_v60 }
0x23cc   :  { %6052 = vadd.xlane.f32.xlu0 %v6051_v4 }
0x23cd   :  { %v6048_v5 = vsel %vm161_vm0, %v6046_v62, 0.0 }
0x23ce   :  { %6049 = vadd.xlane.f32.xlu1 %v6048_v5 }
0x2455   :  { %v6053_v2 = vpop.xlane.xlu0 %6052 }
0x2456   :  { %v6055_v11 = vmul.f32 0.03125, %v6053_v2 }
0x2457   :  { %v6050_v12 = vpop.xlane.xlu1 %6049 }
0x2458   :  { %v6057_v19 = vadd.f32 1e-05, %v6055_v11  ;;  %v6054_v18 = vmul.f32 0.03125, %v6050_v12 }
0x245a   :  { %7380 = vrsqrt.f32 %v6057_v19  ;;  %v6056_v13 = vadd.f32 1e-05, %v6054_v18 }
0x245c   :  { %7382 = vrsqrt.f32 %v6056_v13 }
0x2467   :  { %v7381_v10 = vpop.eup %7380 }
0x2468   :  { %v6061_v17 = vmul.f32 %v7381_v10, %v6045_v63 }
0x2469   :  { %v7383_v20 = vpop.eup %7382 }
0x246a   :  { %v6060_v22 = vmul.f32 %v7383_v20, %v6044_v60  ;;  %v6069_v23 = vmul.f32 %v6459_v16, %v6061_v17 }
0x246c   :  { %v6068_v24 = vmul.f32 %v6459_v16, %v6060_v22  ;;  %v6077_v25 = vadd.f32 %v6460_v21, %v6069_v23 }
0x246e   :  { %v6076_v26 = vadd.f32 %v6460_v21, %v6068_v24  ;;  %v6091_v27 = vrot.slane %v6077_v25, 7 }
0x2470   :  { %v6093_v28 = vsel %vm6092_vm4, %v6091_v27, %v6076_v26 }
0x2471   :  { %7265 = vmatmul.mubr.msk.f32.vlgmr.msra.gmra.mxu0 %vm161_vm0, %v6093_v28 }
0x2531   :  { %v6162_v7 = vpop.f32.mrf.mxu0 }
0x2532   :  { %v6163_v14 = vadd.f32 %v6461_v9, %v6162_v7 }
0x2533   :  { %v7266_v15 = vpop.f32.mrf.mxu0 }
0x2534   :  { %6167 = vst.msk [vmem:[%s6206_s25] sm:$0x3] %vm6166_vm5, %v6163_v14 }

</bundles_post_ra>
